<compile_context>
chip_gen: v7x
topology: tpu7x:2x2x1
jax: 0.10.0
libtpu: 0.0.40
codegen_flags: <defaults>
</compile_context>

<pallas_src>
import functools

import jax
import jax.numpy as jnp
from jax.experimental import pallas as pl
from jax.experimental.pallas import tpu as pltpu

_BN_EPS = 1e-5
_LANE = 128
_TILE_M_TARGET = 512      # rows per tile: big enough to amortize grid overhead,
                          # small enough to fit v7x's 64 MiB VMEM with headroom.
_TILE_L_TARGET = 32768    # lanes per maxpool tile.


def _pick_tile(n, target, mult):
  """Largest t <= target with n % t == 0 and t % mult == 0; else n (full dim)."""
  if n <= target:
    return n
  t = target - (target % mult)
  while t >= mult:
    if n % t == 0:
      return t
    t -= mult
  return n


# ---------------------------------------------------------------------------
# Pallas kernels
# ---------------------------------------------------------------------------
def _maxpool_kernel(s_ref, o_ref):
  # s_ref: (8, TL) -- the 8 elements of each 2x2x2 window on sublanes.
  o_ref[...] = jnp.max(s_ref[...], axis=0, keepdims=True)


def _conv_bias_stats_kernel(p_ref, w_ref, b_ref, y_ref, sum_ref, ssq_ref):
  """Pass 1: y = patches @ w + b per M-tile; accumulate per-channel sum/sum-sq.

  sum_ref / ssq_ref have a constant block index across the M grid axis, so they
  stay resident in VMEM and act as cross-tile accumulators (axis "arbitrary").
  """
  @pl.when(pl.program_id(0) == 0)
  def _():
    sum_ref[...] = jnp.zeros_like(sum_ref)
    ssq_ref[...] = jnp.zeros_like(ssq_ref)

  y = jnp.dot(p_ref[...], w_ref[...], preferred_element_type=jnp.float32)
  y = y + b_ref[...]                      # (TM, Cpad) + (1, Cpad)
  y_ref[...] = y
  sum_ref[...] += jnp.sum(y, axis=0, keepdims=True)
  ssq_ref[...] += jnp.sum(y * y, axis=0, keepdims=True)


def _bn_elu_kernel(y_ref, sum_ref, ssq_ref, g_ref, be_ref, *rest,
                   m_total, eps, add_residual):
  """Pass 2: BatchNorm (batch stats, biased var) + ELU(alpha=1) [+ residual]."""
  if add_residual:
    res_ref, o_ref = rest
  else:
    (o_ref,) = rest
  inv_m = 1.0 / float(m_total)
  mean = sum_ref[...] * inv_m
  var = jnp.maximum(ssq_ref[...] * inv_m - mean * mean, 0.0)   # biased variance
  inv_std = jax.lax.rsqrt(var + eps)
  yn = (y_ref[...] - mean) * inv_std * g_ref[...] + be_ref[...]
  z = jnp.where(yn > 0, yn, jnp.exp(jnp.minimum(yn, 0.0)) - 1.0)  # ELU, alpha=1
  if add_residual:
    z = z + res_ref[...]
  o_ref[...] = z.astype(o_ref.dtype)


# ---------------------------------------------------------------------------
# Wrappers (glue: padding, im2col slab, reshapes/transposes)
# ---------------------------------------------------------------------------
def maxpool3d_2x2x2(x_ndhwc):
  n, d, h, w, c = x_ndhwc.shape
  do, ho, wo = d // 2, h // 2, w // 2
  l = n * do * ho * wo * c
  offs = []
  for dz in range(2):
    for dy in range(2):
      for dx in range(2):
        offs.append(x_ndhwc[:, dz::2, dy::2, dx::2, :].reshape(1, l))
  stacked = jnp.concatenate(offs, axis=0)                       # (8, L)
  tl = _pick_tile(l, _TILE_L_TARGET, _LANE)
  out = pl.pallas_call(
      _maxpool_kernel,
      out_shape=jax.ShapeDtypeStruct((1, l), x_ndhwc.dtype),
      grid=(l // tl,),
      in_specs=[pl.BlockSpec((8, tl), lambda i: (0, i))],
      out_specs=pl.BlockSpec((1, tl), lambda i: (0, i)),
      compiler_params=pltpu.CompilerParams(dimension_semantics=("parallel",)),
  )(stacked)
  return out.reshape(n, do, ho, wo, c)


def _im2col_slab(x_ndhwc):
  """(N,D,H,W,Cin) -> (M, 27*Cin) bf16 slab; taps folded into the contraction."""
  n, d, h, w, cin = x_ndhwc.shape
  m = n * d * h * w
  xpad = jnp.pad(x_ndhwc, ((0, 0), (1, 1), (1, 1), (1, 1), (0, 0)))
  cols = []
  for kd in range(3):
    for kh in range(3):
      for kw in range(3):
        cols.append(xpad[:, kd:kd + d, kh:kh + h, kw:kw + w, :].reshape(m, cin))
  return jnp.concatenate(cols, axis=1).astype(jnp.bfloat16)      # (M, 27*Cin)


def conv3d_bn_elu(x_ndhwc, w, b, gamma, beta, residual_padded=None):
  """Fused Conv3d(3,pad=1)+bias -> BatchNorm3d (batch stats) -> ELU [-> +res].

  Returns the lane-dense, channel-padded, spatially-flattened activation
  (M, Cpad) float32, where Cpad = round_up(Cout, 128).
  """
  n, d, h, wd, cin = x_ndhwc.shape
  cout = w.shape[-1]
  cpad = max(_LANE, ((cout + _LANE - 1) // _LANE) * _LANE)
  m = n * d * h * wd
  k27 = 27 * cin

  patches = _im2col_slab(x_ndhwc)                                # (M, 27*Cin) bf16
  w2 = jnp.pad(w.reshape(k27, cout),
               ((0, 0), (0, cpad - cout))).astype(jnp.bfloat16)  # (27*Cin, Cpad)
  b2 = jnp.pad(b.reshape(1, cout), ((0, 0), (0, cpad - cout)))
  g2 = jnp.pad(gamma.reshape(1, cout), ((0, 0), (0, cpad - cout)),
               constant_values=1.0)
  be2 = jnp.pad(beta.reshape(1, cout), ((0, 0), (0, cpad - cout)))

  tm = _pick_tile(m, _TILE_M_TARGET, 16)
  grid = (m // tm,)

  # Pass 1: conv + bias, with resident per-channel sum / sum-of-squares.
  y, ysum, yssq = pl.pallas_call(
      _conv_bias_stats_kernel,
      out_shape=(jax.ShapeDtypeStruct((m, cpad), jnp.float32),
                 jax.ShapeDtypeStruct((1, cpad), jnp.float32),
                 jax.ShapeDtypeStruct((1, cpad), jnp.float32)),
      grid=grid,
      in_specs=[pl.BlockSpec((tm, k27), lambda i: (i, 0)),
                pl.BlockSpec((k27, cpad), lambda i: (0, 0)),
                pl.BlockSpec((1, cpad), lambda i: (0, 0))],
      out_specs=(pl.BlockSpec((tm, cpad), lambda i: (i, 0)),
                 pl.BlockSpec((1, cpad), lambda i: (0, 0)),
                 pl.BlockSpec((1, cpad), lambda i: (0, 0))),
      compiler_params=pltpu.CompilerParams(
          dimension_semantics=("arbitrary",)),      # stats accumulate across M
  )(patches, w2, b2)

  # Pass 2: normalize with the full-batch statistics + ELU (+ residual).
  add_res = residual_padded is not None
  kernel2 = functools.partial(_bn_elu_kernel, m_total=m, eps=_BN_EPS,
                              add_residual=add_res)
  in_specs = [pl.BlockSpec((tm, cpad), lambda i: (i, 0)),
              pl.BlockSpec((1, cpad), lambda i: (0, 0)),
              pl.BlockSpec((1, cpad), lambda i: (0, 0)),
              pl.BlockSpec((1, cpad), lambda i: (0, 0)),
              pl.BlockSpec((1, cpad), lambda i: (0, 0))]
  args = [y, ysum, yssq, g2, be2]
  if add_res:
    in_specs.append(pl.BlockSpec((tm, cpad), lambda i: (i, 0)))
    args.append(residual_padded)
  out = pl.pallas_call(
      kernel2,
      out_shape=jax.ShapeDtypeStruct((m, cpad), jnp.float32),
      grid=grid,
      in_specs=in_specs,
      out_specs=pl.BlockSpec((tm, cpad), lambda i: (i, 0)),
      compiler_params=pltpu.CompilerParams(dimension_semantics=("parallel",)),
  )(*args)
  return out                                                     # (M, Cpad)


def unet_down_block_forward(x_ncdhw, params, down_size):
  x = jnp.transpose(x_ncdhw, (0, 2, 3, 4, 1))                    # NCDHW -> NDHWC
  if down_size:
    x = maxpool3d_2x2x2(x)
  n, d, h, w, _ = x.shape
  cout = params["w1"].shape[-1]

  h1 = conv3d_bn_elu(x, params["w1"], params["b1"], params["g1"],
                     params["be1"])                              # (M, Cpad)
  h1_act = h1[:, :cout].reshape(n, d, h, w, cout)
  h2 = conv3d_bn_elu(h1_act, params["w2"], params["b2"], params["g2"],
                     params["be2"])
  h2_act = h2[:, :cout].reshape(n, d, h, w, cout)
  h3 = conv3d_bn_elu(h2_act, params["w3"], params["b3"], params["g3"],
                     params["be3"], residual_padded=h1)          # residual = h1
  out = h3[:, :cout].reshape(n, d, h, w, cout)
  return jnp.transpose(out, (0, 4, 1, 2, 3))                     # back to NCDHW


# ---------------------------------------------------------------------------
# Deterministic parameter init (shapes from the PyTorch module)
# ---------------------------------------------------------------------------
def init_params(key, cin, cout):
  ks = jax.random.split(key, 6)

  def conv_w(k, ci):
    bound = 1.0 / float(jnp.sqrt(ci * 27.0))
    return jax.random.uniform(k, (3, 3, 3, ci, cout), jnp.float32, -bound, bound)

  def conv_b(k, ci):
    bound = 1.0 / float(jnp.sqrt(ci * 27.0))
    return jax.random.uniform(k, (cout,), jnp.float32, -bound, bound)

  ones = jnp.ones((cout,), jnp.float32)
  zeros = jnp.zeros((cout,), jnp.float32)
  return {
      "w1": conv_w(ks[0], cin), "b1": conv_b(ks[1], cin), "g1": ones, "be1": zeros,
      "w2": conv_w(ks[2], cout), "b2": conv_b(ks[3], cout), "g2": ones, "be2": zeros,
      "w3": conv_w(ks[4], cout), "b3": conv_b(ks[5], cout), "g3": ones, "be3": zeros,
  }
  # TODO(synk): BatchNorm running_mean/running_var updates (stateful train-time
  # bookkeeping) are not modeled; they do not affect this forward's outputs.


# ---------------------------------------------------------------------------
# Pure-JAX reference (sanity check only).  mxu_dtype lets us build a reference
# that also feeds bf16 to the conv (the kernel intentionally uses bf16 MXU
# operands with f32 accumulation, per TPU best practice).
# ---------------------------------------------------------------------------
def _ref_forward(x, params, down_size, mxu_dtype=jnp.float32):
  def conv(xv, w, b):
    w_oidhw = jnp.transpose(w, (4, 3, 0, 1, 2))
    y = jax.lax.conv_general_dilated(
        xv.astype(mxu_dtype), w_oidhw.astype(mxu_dtype), (1, 1, 1),
        [(1, 1), (1, 1), (1, 1)],
        dimension_numbers=("NCDHW", "OIDHW", "NCDHW"),
        preferred_element_type=jnp.float32)
    return y + b[None, :, None, None, None]

  def bn_elu(y, g, be):
    mean = jnp.mean(y, axis=(0, 2, 3, 4), keepdims=True)
    var = jnp.mean((y - mean) ** 2, axis=(0, 2, 3, 4), keepdims=True)
    yn = (y - mean) * jax.lax.rsqrt(var + _BN_EPS)
    yn = yn * g[None, :, None, None, None] + be[None, :, None, None, None]
    return jnp.where(yn > 0, yn, jnp.exp(jnp.minimum(yn, 0.0)) - 1.0)

  if down_size:
    n, c, d, h, w = x.shape
    x = x.reshape(n, c, d // 2, 2, h // 2, 2, w // 2, 2).max(axis=(3, 5, 7))
  x1 = bn_elu(conv(x, params["w1"], params["b1"]), params["g1"], params["be1"])
  x2 = bn_elu(conv(x1, params["w2"], params["b2"]), params["g2"], params["be2"])
  x3 = bn_elu(conv(x2, params["w3"], params["b3"]), params["g3"], params["be3"])
  return x3 + x1


if __name__ == "__main__":
  key = jax.random.PRNGKey(0)
  kx, kp = jax.random.split(key)

  N, CIN, COUT, S = 2, 4, 8, 16          # input (2, 4, 16, 16, 16), down_size=True
  x = jax.random.normal(kx, (N, CIN, S, S, S), jnp.float32)
  params = init_params(kp, CIN, COUT)

  fwd = jax.jit(functools.partial(unet_down_block_forward, down_size=True))
  out = fwd(x, params)
  jax.block_until_ready(out)
  assert out.shape == (N, COUT, S // 2, S // 2, S // 2), out.shape

  # Tight check against a reference that also feeds bf16 to the conv/MXU
  # (isolates implementation correctness from bf16 quantization).
  ref_bf16 = _ref_forward(x, params, True, mxu_dtype=jnp.bfloat16)
  err_bf16 = float(jnp.max(jnp.abs(out - ref_bf16)))
  assert err_bf16 < 5e-3, f"max abs err vs bf16-consistent reference: {err_bf16}"

  # Loose sanity check against the full-f32 spec (difference = bf16 MXU inputs).
  ref_f32 = _ref_forward(x, params, True, mxu_dtype=jnp.float32)
  err_f32 = float(jnp.max(jnp.abs(out - ref_f32)))
  assert err_f32 < 1e-1, f"max abs err vs f32 reference: {err_f32}"

  print("KERNEL_OK")
</pallas_src>

<mosaic_0001>
module attributes {stable_mosaic.version = 11 : i64} {
  func.func @_maxpool_kernel(%arg0: i32, %arg1: memref<8x4096xf32, #tpu.memory_space<vmem>>, %arg2: memref<1x4096xf32, #tpu.memory_space<vmem>>) attributes {dimension_semantics = [#tpu.dimension_semantics<parallel>], iteration_bounds = array<i64: 1>, scalar_prefetch = 0 : i64, scratch_operands = 0 : i64, tpu.core_type = #tpu.core_type<tc>, window_params = [{transform_indices = @transform_0, window_bounds = array<i64: 8, 4096>}, {transform_indices = @transform_1, window_bounds = array<i64: 1, 4096>}]} {
    %c0 = arith.constant 0 : index
    %c0_0 = arith.constant 0 : index
    %0 = vector.load %arg1[%c0, %c0_0] : memref<8x4096xf32, #tpu.memory_space<vmem>>, vector<8x4096xf32>
    %cst = arith.constant dense<0xFF800000> : vector<4096xf32>
    %1 = vector.multi_reduction <maximumf>, %0, %cst [0] : vector<8x4096xf32> to vector<4096xf32>
    %2 = vector.shape_cast %1 : vector<4096xf32> to vector<1x4096xf32>
    %c0_1 = arith.constant 0 : index
    %c0_2 = arith.constant 0 : index
    %3 = vector.load %arg2[%c0_1, %c0_2] : memref<1x4096xf32, #tpu.memory_space<vmem>>, vector<1x4096xf32>
    tpu.vector_store %arg2[%c0_1, %c0_2], %2 {strides = array<i32>} : memref<1x4096xf32, #tpu.memory_space<vmem>>, vector<1x4096xf32>,
    return
  }
  func.func @transform_0(%arg0: i32) -> (i32, i32) {
    %c0_i32 = arith.constant 0 : i32
    %c0_i32_0 = arith.constant 0 : i32
    return %c0_i32, %arg0 : i32, i32
  }
  func.func @transform_1(%arg0: i32) -> (i32, i32) {
    %c0_i32 = arith.constant 0 : i32
    %c0_i32_0 = arith.constant 0 : i32
    return %c0_i32, %arg0 : i32, i32
  }
}

module attributes {stable_mosaic.version = 11 : i64} {
  func.func @_conv_bias_stats_kernel(%arg0: i32, %arg1: memref<512x108xbf16, #tpu.memory_space<vmem>>, %arg2: memref<108x128xbf16, #tpu.memory_space<vmem>>, %arg3: memref<1x128xf32, #tpu.memory_space<vmem>>, %arg4: memref<512x128xf32, #tpu.memory_space<vmem>>, %arg5: memref<1x128xf32, #tpu.memory_space<vmem>>, %arg6: memref<1x128xf32, #tpu.memory_space<vmem>>) attributes {dimension_semantics = [#tpu.dimension_semantics<arbitrary>], iteration_bounds = array<i64: 2>, scalar_prefetch = 0 : i64, scratch_operands = 0 : i64, tpu.core_type = #tpu.core_type<tc>, window_params = [{transform_indices = @transform_0, window_bounds = array<i64: 512, 108>}, {pipeline_mode = #tpu.pipeline_mode<synchronous>, transform_indices = @transform_1, window_bounds = array<i64: 108, 128>}, {pipeline_mode = #tpu.pipeline_mode<synchronous>, transform_indices = @transform_2, window_bounds = array<i64: 1, 128>}, {transform_indices = @transform_3, window_bounds = array<i64: 512, 128>}, {pipeline_mode = #tpu.pipeline_mode<synchronous>, transform_indices = @transform_4, window_bounds = array<i64: 1, 128>}, {pipeline_mode = #tpu.pipeline_mode<synchronous>, transform_indices = @transform_5, window_bounds = array<i64: 1, 128>}]} {
    %c0_i32 = arith.constant 0 : i32
    %0 = arith.cmpi eq, %arg0, %c0_i32 : i32
    %1 = arith.extui %0 : i1 to i32
    %c0_i32_0 = arith.constant 0 : i32
    %2 = arith.cmpi ne, %1, %c0_i32_0 : i32
    scf.if %2 {
      %cst_18 = arith.constant 0.000000e+00 : f32
      %21 = vector.broadcast %cst_18 : f32 to vector<1x128xf32>
      %c0_19 = arith.constant 0 : index
      %c0_20 = arith.constant 0 : index
      %22 = vector.load %arg5[%c0_19, %c0_20] : memref<1x128xf32, #tpu.memory_space<vmem>>, vector<1x128xf32>
      tpu.vector_store %arg5[%c0_19, %c0_20], %21 {strides = array<i32>} : memref<1x128xf32, #tpu.memory_space<vmem>>, vector<1x128xf32>,
      %cst_21 = arith.constant 0.000000e+00 : f32
      %23 = vector.broadcast %cst_21 : f32 to vector<1x128xf32>
      %c0_22 = arith.constant 0 : index
      %c0_23 = arith.constant 0 : index
      %24 = vector.load %arg6[%c0_22, %c0_23] : memref<1x128xf32, #tpu.memory_space<vmem>>, vector<1x128xf32>
      tpu.vector_store %arg6[%c0_22, %c0_23], %23 {strides = array<i32>} : memref<1x128xf32, #tpu.memory_space<vmem>>, vector<1x128xf32>,
    } else {
    }
    %c0 = arith.constant 0 : index
    %c0_1 = arith.constant 0 : index
    %3 = vector.load %arg1[%c0, %c0_1] : memref<512x108xbf16, #tpu.memory_space<vmem>>, vector<512x108xbf16>
    %c0_2 = arith.constant 0 : index
    %c0_3 = arith.constant 0 : index
    %4 = vector.load %arg2[%c0_2, %c0_3] : memref<108x128xbf16, #tpu.memory_space<vmem>>, vector<108x128xbf16>
    %cst = arith.constant dense<0.000000e+00> : vector<512x128xf32>
    %5 = tpu.matmul %3, %4, %cst {dimension_numbers = #tpu.dot_dimension_numbers<[1], [0], [0], [1], [0, 0, 1, 1], [], []>} : vector<512x108xbf16>, vector<108x128xbf16>, vector<512x128xf32> -> vector<512x128xf32>
    %c0_4 = arith.constant 0 : index
    %c0_5 = arith.constant 0 : index
    %6 = vector.load %arg3[%c0_4, %c0_5] : memref<1x128xf32, #tpu.memory_space<vmem>>, vector<1x128xf32>
    %7 = vector.broadcast %6 : vector<1x128xf32> to vector<512x128xf32>
    %8 = arith.addf %5, %7 : vector<512x128xf32>
    %c0_6 = arith.constant 0 : index
    %c0_7 = arith.constant 0 : index
    %9 = vector.load %arg4[%c0_6, %c0_7] : memref<512x128xf32, #tpu.memory_space<vmem>>, vector<512x128xf32>
    tpu.vector_store %arg4[%c0_6, %c0_7], %8 {strides = array<i32>} : memref<512x128xf32, #tpu.memory_space<vmem>>, vector<512x128xf32>,
    %c0_8 = arith.constant 0 : index
    %c0_9 = arith.constant 0 : index
    %10 = vector.load %arg5[%c0_8, %c0_9] : memref<1x128xf32, #tpu.memory_space<vmem>>, vector<1x128xf32>
    %cst_10 = arith.constant dense<0.000000e+00> : vector<128xf32>
    %11 = vector.multi_reduction <add>, %8, %cst_10 [0] : vector<512x128xf32> to vector<128xf32>
    %12 = vector.shape_cast %11 : vector<128xf32> to vector<1x128xf32>
    %13 = arith.addf %10, %12 : vector<1x128xf32>
    %c0_11 = arith.constant 0 : index
    %c0_12 = arith.constant 0 : index
    %14 = vector.load %arg5[%c0_11, %c0_12] : memref<1x128xf32, #tpu.memory_space<vmem>>, vector<1x128xf32>
    tpu.vector_store %arg5[%c0_11, %c0_12], %13 {strides = array<i32>} : memref<1x128xf32, #tpu.memory_space<vmem>>, vector<1x128xf32>,
    %c0_13 = arith.constant 0 : index
    %c0_14 = arith.constant 0 : index
    %15 = vector.load %arg6[%c0_13, %c0_14] : memref<1x128xf32, #tpu.memory_space<vmem>>, vector<1x128xf32>
    %16 = arith.mulf %8, %8 : vector<512x128xf32>
    %cst_15 = arith.constant dense<0.000000e+00> : vector<128xf32>
    %17 = vector.multi_reduction <add>, %16, %cst_15 [0] : vector<512x128xf32> to vector<128xf32>
    %18 = vector.shape_cast %17 : vector<128xf32> to vector<1x128xf32>
    %19 = arith.addf %15, %18 : vector<1x128xf32>
    %c0_16 = arith.constant 0 : index
    %c0_17 = arith.constant 0 : index
    %20 = vector.load %arg6[%c0_16, %c0_17] : memref<1x128xf32, #tpu.memory_space<vmem>>, vector<1x128xf32>
    tpu.vector_store %arg6[%c0_16, %c0_17], %19 {strides = array<i32>} : memref<1x128xf32, #tpu.memory_space<vmem>>, vector<1x128xf32>,
    return
  }
  func.func @transform_0(%arg0: i32) -> (i32, i32) {
    %c0_i32 = arith.constant 0 : i32
    %c0_i32_0 = arith.constant 0 : i32
    return %arg0, %c0_i32 : i32, i32
  }
  func.func @transform_1(%arg0: i32) -> (i32, i32) {
    %c0_i32 = arith.constant 0 : i32
    %c0_i32_0 = arith.constant 0 : i32
    %c0_i32_1 = arith.constant 0 : i32
    return %c0_i32, %c0_i32_0 : i32, i32
  }
  func.func @transform_2(%arg0: i32) -> (i32, i32) {
    %c0_i32 = arith.constant 0 : i32
    %c0_i32_0 = arith.constant 0 : i32
    %c0_i32_1 = arith.constant 0 : i32
    return %c0_i32, %c0_i32_0 : i32, i32
  }
  func.func @transform_3(%arg0: i32) -> (i32, i32) {
    %c0_i32 = arith.constant 0 : i32
    %c0_i32_0 = arith.constant 0 : i32
    return %arg0, %c0_i32 : i32, i32
  }
  func.func @transform_4(%arg0: i32) -> (i32, i32) {
    %c0_i32 = arith.constant 0 : i32
    %c0_i32_0 = arith.constant 0 : i32
    %c0_i32_1 = arith.constant 0 : i32
    return %c0_i32, %c0_i32_0 : i32, i32
  }
  func.func @transform_5(%arg0: i32) -> (i32, i32) {
    %c0_i32 = arith.constant 0 : i32
    %c0_i32_0 = arith.constant 0 : i32
    %c0_i32_1 = arith.constant 0 : i32
    return %c0_i32, %c0_i32_0 : i32, i32
  }
}

module attributes {stable_mosaic.version = 11 : i64} {
  func.func @_bn_elu_kernel(%arg0: i32, %arg1: memref<512x128xf32, #tpu.memory_space<vmem>>, %arg2: memref<1x128xf32, #tpu.memory_space<vmem>>, %arg3: memref<1x128xf32, #tpu.memory_space<vmem>>, %arg4: memref<1x128xf32, #tpu.memory_space<vmem>>, %arg5: memref<1x128xf32, #tpu.memory_space<vmem>>, %arg6: memref<512x128xf32, #tpu.memory_space<vmem>>) attributes {dimension_semantics = [#tpu.dimension_semantics<parallel>], iteration_bounds = array<i64: 2>, scalar_prefetch = 0 : i64, scratch_operands = 0 : i64, tpu.core_type = #tpu.core_type<tc>, window_params = [{transform_indices = @transform_0, window_bounds = array<i64: 512, 128>}, {pipeline_mode = #tpu.pipeline_mode<synchronous>, transform_indices = @transform_1, window_bounds = array<i64: 1, 128>}, {pipeline_mode = #tpu.pipeline_mode<synchronous>, transform_indices = @transform_2, window_bounds = array<i64: 1, 128>}, {pipeline_mode = #tpu.pipeline_mode<synchronous>, transform_indices = @transform_3, window_bounds = array<i64: 1, 128>}, {pipeline_mode = #tpu.pipeline_mode<synchronous>, transform_indices = @transform_4, window_bounds = array<i64: 1, 128>}, {transform_indices = @transform_5, window_bounds = array<i64: 512, 128>}]} {
    %c0 = arith.constant 0 : index
    %c0_0 = arith.constant 0 : index
    %0 = vector.load %arg2[%c0, %c0_0] : memref<1x128xf32, #tpu.memory_space<vmem>>, vector<1x128xf32>
    %cst = arith.constant 9.765625E-4 : f32
    %1 = vector.broadcast %cst : f32 to vector<1x128xf32>
    %2 = arith.mulf %0, %1 : vector<1x128xf32>
    %c0_1 = arith.constant 0 : index
    %c0_2 = arith.constant 0 : index
    %3 = vector.load %arg3[%c0_1, %c0_2] : memref<1x128xf32, #tpu.memory_space<vmem>>, vector<1x128xf32>
    %cst_3 = arith.constant 9.765625E-4 : f32
    %4 = vector.broadcast %cst_3 : f32 to vector<1x128xf32>
    %5 = arith.mulf %3, %4 : vector<1x128xf32>
    %6 = arith.mulf %2, %2 : vector<1x128xf32>
    %7 = arith.subf %5, %6 : vector<1x128xf32>
    %cst_4 = arith.constant 0.000000e+00 : f32
    %8 = vector.broadcast %cst_4 : f32 to vector<1x128xf32>
    %9 = arith.maximumf %7, %8 : vector<1x128xf32>
    %cst_5 = arith.constant 9.99999974E-6 : f32
    %10 = vector.broadcast %cst_5 : f32 to vector<1x128xf32>
    %11 = arith.addf %9, %10 : vector<1x128xf32>
    %12 = math.rsqrt %11 : vector<1x128xf32>
    %c0_6 = arith.constant 0 : index
    %c0_7 = arith.constant 0 : index
    %13 = vector.load %arg1[%c0_6, %c0_7] : memref<512x128xf32, #tpu.memory_space<vmem>>, vector<512x128xf32>
    %14 = vector.broadcast %2 : vector<1x128xf32> to vector<512x128xf32>
    %15 = arith.subf %13, %14 : vector<512x128xf32>
    %16 = vector.broadcast %12 : vector<1x128xf32> to vector<512x128xf32>
    %17 = arith.mulf %15, %16 : vector<512x128xf32>
    %c0_8 = arith.constant 0 : index
    %c0_9 = arith.constant 0 : index
    %18 = vector.load %arg4[%c0_8, %c0_9] : memref<1x128xf32, #tpu.memory_space<vmem>>, vector<1x128xf32>
    %19 = vector.broadcast %18 : vector<1x128xf32> to vector<512x128xf32>
    %20 = arith.mulf %17, %19 : vector<512x128xf32>
    %c0_10 = arith.constant 0 : index
    %c0_11 = arith.constant 0 : index
    %21 = vector.load %arg5[%c0_10, %c0_11] : memref<1x128xf32, #tpu.memory_space<vmem>>, vector<1x128xf32>
    %22 = vector.broadcast %21 : vector<1x128xf32> to vector<512x128xf32>
    %23 = arith.addf %20, %22 : vector<512x128xf32>
    %cst_12 = arith.constant 0.000000e+00 : f32
    %24 = vector.broadcast %cst_12 : f32 to vector<512x128xf32>
    %25 = arith.cmpf ogt, %23, %24 : vector<512x128xf32>
    %cst_13 = arith.constant 0.000000e+00 : f32
    %26 = vector.broadcast %cst_13 : f32 to vector<512x128xf32>
    %27 = arith.minimumf %23, %26 : vector<512x128xf32>
    %28 = math.exp %27 : vector<512x128xf32>
    %cst_14 = arith.constant 1.000000e+00 : f32
    %29 = vector.broadcast %cst_14 : f32 to vector<512x128xf32>
    %30 = arith.subf %28, %29 : vector<512x128xf32>
    %31 = arith.select %25, %23, %30 : vector<512x128xi1>, vector<512x128xf32>
    %c0_15 = arith.constant 0 : index
    %c0_16 = arith.constant 0 : index
    %32 = vector.load %arg6[%c0_15, %c0_16] : memref<512x128xf32, #tpu.memory_space<vmem>>, vector<512x128xf32>
    tpu.vector_store %arg6[%c0_15, %c0_16], %31 {strides = array<i32>} : memref<512x128xf32, #tpu.memory_space<vmem>>, vector<512x128xf32>,
    return
  }
  func.func @transform_0(%arg0: i32) -> (i32, i32) {
    %c0_i32 = arith.constant 0 : i32
    %c0_i32_0 = arith.constant 0 : i32
    return %arg0, %c0_i32 : i32, i32
  }
  func.func @transform_1(%arg0: i32) -> (i32, i32) {
    %c0_i32 = arith.constant 0 : i32
    %c0_i32_0 = arith.constant 0 : i32
    %c0_i32_1 = arith.constant 0 : i32
    return %c0_i32, %c0_i32_0 : i32, i32
  }
  func.func @transform_2(%arg0: i32) -> (i32, i32) {
    %c0_i32 = arith.constant 0 : i32
    %c0_i32_0 = arith.constant 0 : i32
    %c0_i32_1 = arith.constant 0 : i32
    return %c0_i32, %c0_i32_0 : i32, i32
  }
  func.func @transform_3(%arg0: i32) -> (i32, i32) {
    %c0_i32 = arith.constant 0 : i32
    %c0_i32_0 = arith.constant 0 : i32
    %c0_i32_1 = arith.constant 0 : i32
    return %c0_i32, %c0_i32_0 : i32, i32
  }
  func.func @transform_4(%arg0: i32) -> (i32, i32) {
    %c0_i32 = arith.constant 0 : i32
    %c0_i32_0 = arith.constant 0 : i32
    %c0_i32_1 = arith.constant 0 : i32
    return %c0_i32, %c0_i32_0 : i32, i32
  }
  func.func @transform_5(%arg0: i32) -> (i32, i32) {
    %c0_i32 = arith.constant 0 : i32
    %c0_i32_0 = arith.constant 0 : i32
    return %arg0, %c0_i32 : i32, i32
  }
}

module attributes {stable_mosaic.version = 11 : i64} {
  func.func @_conv_bias_stats_kernel(%arg0: i32, %arg1: memref<512x216xbf16, #tpu.memory_space<vmem>>, %arg2: memref<216x128xbf16, #tpu.memory_space<vmem>>, %arg3: memref<1x128xf32, #tpu.memory_space<vmem>>, %arg4: memref<512x128xf32, #tpu.memory_space<vmem>>, %arg5: memref<1x128xf32, #tpu.memory_space<vmem>>, %arg6: memref<1x128xf32, #tpu.memory_space<vmem>>) attributes {dimension_semantics = [#tpu.dimension_semantics<arbitrary>], iteration_bounds = array<i64: 2>, scalar_prefetch = 0 : i64, scratch_operands = 0 : i64, tpu.core_type = #tpu.core_type<tc>, window_params = [{transform_indices = @transform_0, window_bounds = array<i64: 512, 216>}, {pipeline_mode = #tpu.pipeline_mode<synchronous>, transform_indices = @transform_1, window_bounds = array<i64: 216, 128>}, {pipeline_mode = #tpu.pipeline_mode<synchronous>, transform_indices = @transform_2, window_bounds = array<i64: 1, 128>}, {transform_indices = @transform_3, window_bounds = array<i64: 512, 128>}, {pipeline_mode = #tpu.pipeline_mode<synchronous>, transform_indices = @transform_4, window_bounds = array<i64: 1, 128>}, {pipeline_mode = #tpu.pipeline_mode<synchronous>, transform_indices = @transform_5, window_bounds = array<i64: 1, 128>}]} {
    %c0_i32 = arith.constant 0 : i32
    %0 = arith.cmpi eq, %arg0, %c0_i32 : i32
    %1 = arith.extui %0 : i1 to i32
    %c0_i32_0 = arith.constant 0 : i32
    %2 = arith.cmpi ne, %1, %c0_i32_0 : i32
    scf.if %2 {
      %cst_18 = arith.constant 0.000000e+00 : f32
      %21 = vector.broadcast %cst_18 : f32 to vector<1x128xf32>
      %c0_19 = arith.constant 0 : index
      %c0_20 = arith.constant 0 : index
      %22 = vector.load %arg5[%c0_19, %c0_20] : memref<1x128xf32, #tpu.memory_space<vmem>>, vector<1x128xf32>
      tpu.vector_store %arg5[%c0_19, %c0_20], %21 {strides = array<i32>} : memref<1x128xf32, #tpu.memory_space<vmem>>, vector<1x128xf32>,
      %cst_21 = arith.constant 0.000000e+00 : f32
      %23 = vector.broadcast %cst_21 : f32 to vector<1x128xf32>
      %c0_22 = arith.constant 0 : index
      %c0_23 = arith.constant 0 : index
      %24 = vector.load %arg6[%c0_22, %c0_23] : memref<1x128xf32, #tpu.memory_space<vmem>>, vector<1x128xf32>
      tpu.vector_store %arg6[%c0_22, %c0_23], %23 {strides = array<i32>} : memref<1x128xf32, #tpu.memory_space<vmem>>, vector<1x128xf32>,
    } else {
    }
    %c0 = arith.constant 0 : index
    %c0_1 = arith.constant 0 : index
    %3 = vector.load %arg1[%c0, %c0_1] : memref<512x216xbf16, #tpu.memory_space<vmem>>, vector<512x216xbf16>
    %c0_2 = arith.constant 0 : index
    %c0_3 = arith.constant 0 : index
    %4 = vector.load %arg2[%c0_2, %c0_3] : memref<216x128xbf16, #tpu.memory_space<vmem>>, vector<216x128xbf16>
    %cst = arith.constant dense<0.000000e+00> : vector<512x128xf32>
    %5 = tpu.matmul %3, %4, %cst {dimension_numbers = #tpu.dot_dimension_numbers<[1], [0], [0], [1], [0, 0, 1, 1], [], []>} : vector<512x216xbf16>, vector<216x128xbf16>, vector<512x128xf32> -> vector<512x128xf32>
    %c0_4 = arith.constant 0 : index
    %c0_5 = arith.constant 0 : index
    %6 = vector.load %arg3[%c0_4, %c0_5] : memref<1x128xf32, #tpu.memory_space<vmem>>, vector<1x128xf32>
    %7 = vector.broadcast %6 : vector<1x128xf32> to vector<512x128xf32>
    %8 = arith.addf %5, %7 : vector<512x128xf32>
    %c0_6 = arith.constant 0 : index
    %c0_7 = arith.constant 0 : index
    %9 = vector.load %arg4[%c0_6, %c0_7] : memref<512x128xf32, #tpu.memory_space<vmem>>, vector<512x128xf32>
    tpu.vector_store %arg4[%c0_6, %c0_7], %8 {strides = array<i32>} : memref<512x128xf32, #tpu.memory_space<vmem>>, vector<512x128xf32>,
    %c0_8 = arith.constant 0 : index
    %c0_9 = arith.constant 0 : index
    %10 = vector.load %arg5[%c0_8, %c0_9] : memref<1x128xf32, #tpu.memory_space<vmem>>, vector<1x128xf32>
    %cst_10 = arith.constant dense<0.000000e+00> : vector<128xf32>
    %11 = vector.multi_reduction <add>, %8, %cst_10 [0] : vector<512x128xf32> to vector<128xf32>
    %12 = vector.shape_cast %11 : vector<128xf32> to vector<1x128xf32>
    %13 = arith.addf %10, %12 : vector<1x128xf32>
    %c0_11 = arith.constant 0 : index
    %c0_12 = arith.constant 0 : index
    %14 = vector.load %arg5[%c0_11, %c0_12] : memref<1x128xf32, #tpu.memory_space<vmem>>, vector<1x128xf32>
    tpu.vector_store %arg5[%c0_11, %c0_12], %13 {strides = array<i32>} : memref<1x128xf32, #tpu.memory_space<vmem>>, vector<1x128xf32>,
    %c0_13 = arith.constant 0 : index
    %c0_14 = arith.constant 0 : index
    %15 = vector.load %arg6[%c0_13, %c0_14] : memref<1x128xf32, #tpu.memory_space<vmem>>, vector<1x128xf32>
    %16 = arith.mulf %8, %8 : vector<512x128xf32>
    %cst_15 = arith.constant dense<0.000000e+00> : vector<128xf32>
    %17 = vector.multi_reduction <add>, %16, %cst_15 [0] : vector<512x128xf32> to vector<128xf32>
    %18 = vector.shape_cast %17 : vector<128xf32> to vector<1x128xf32>
    %19 = arith.addf %15, %18 : vector<1x128xf32>
    %c0_16 = arith.constant 0 : index
    %c0_17 = arith.constant 0 : index
    %20 = vector.load %arg6[%c0_16, %c0_17] : memref<1x128xf32, #tpu.memory_space<vmem>>, vector<1x128xf32>
    tpu.vector_store %arg6[%c0_16, %c0_17], %19 {strides = array<i32>} : memref<1x128xf32, #tpu.memory_space<vmem>>, vector<1x128xf32>,
    return
  }
  func.func @transform_0(%arg0: i32) -> (i32, i32) {
    %c0_i32 = arith.constant 0 : i32
    %c0_i32_0 = arith.constant 0 : i32
    return %arg0, %c0_i32 : i32, i32
  }
  func.func @transform_1(%arg0: i32) -> (i32, i32) {
    %c0_i32 = arith.constant 0 : i32
    %c0_i32_0 = arith.constant 0 : i32
    %c0_i32_1 = arith.constant 0 : i32
    return %c0_i32, %c0_i32_0 : i32, i32
  }
  func.func @transform_2(%arg0: i32) -> (i32, i32) {
    %c0_i32 = arith.constant 0 : i32
    %c0_i32_0 = arith.constant 0 : i32
    %c0_i32_1 = arith.constant 0 : i32
    return %c0_i32, %c0_i32_0 : i32, i32
  }
  func.func @transform_3(%arg0: i32) -> (i32, i32) {
    %c0_i32 = arith.constant 0 : i32
    %c0_i32_0 = arith.constant 0 : i32
    return %arg0, %c0_i32 : i32, i32
  }
  func.func @transform_4(%arg0: i32) -> (i32, i32) {
    %c0_i32 = arith.constant 0 : i32
    %c0_i32_0 = arith.constant 0 : i32
    %c0_i32_1 = arith.constant 0 : i32
    return %c0_i32, %c0_i32_0 : i32, i32
  }
  func.func @transform_5(%arg0: i32) -> (i32, i32) {
    %c0_i32 = arith.constant 0 : i32
    %c0_i32_0 = arith.constant 0 : i32
    %c0_i32_1 = arith.constant 0 : i32
    return %c0_i32, %c0_i32_0 : i32, i32
  }
}

module attributes {stable_mosaic.version = 11 : i64} {
  func.func @_bn_elu_kernel(%arg0: i32, %arg1: memref<512x128xf32, #tpu.memory_space<vmem>>, %arg2: memref<1x128xf32, #tpu.memory_space<vmem>>, %arg3: memref<1x128xf32, #tpu.memory_space<vmem>>, %arg4: memref<1x128xf32, #tpu.memory_space<vmem>>, %arg5: memref<1x128xf32, #tpu.memory_space<vmem>>, %arg6: memref<512x128xf32, #tpu.memory_space<vmem>>, %arg7: memref<512x128xf32, #tpu.memory_space<vmem>>) attributes {dimension_semantics = [#tpu.dimension_semantics<parallel>], iteration_bounds = array<i64: 2>, scalar_prefetch = 0 : i64, scratch_operands = 0 : i64, tpu.core_type = #tpu.core_type<tc>, window_params = [{transform_indices = @transform_0, window_bounds = array<i64: 512, 128>}, {pipeline_mode = #tpu.pipeline_mode<synchronous>, transform_indices = @transform_1, window_bounds = array<i64: 1, 128>}, {pipeline_mode = #tpu.pipeline_mode<synchronous>, transform_indices = @transform_2, window_bounds = array<i64: 1, 128>}, {pipeline_mode = #tpu.pipeline_mode<synchronous>, transform_indices = @transform_3, window_bounds = array<i64: 1, 128>}, {pipeline_mode = #tpu.pipeline_mode<synchronous>, transform_indices = @transform_4, window_bounds = array<i64: 1, 128>}, {transform_indices = @transform_5, window_bounds = array<i64: 512, 128>}, {transform_indices = @transform_6, window_bounds = array<i64: 512, 128>}]} {
    %c0 = arith.constant 0 : index
    %c0_0 = arith.constant 0 : index
    %0 = vector.load %arg2[%c0, %c0_0] : memref<1x128xf32, #tpu.memory_space<vmem>>, vector<1x128xf32>
    %cst = arith.constant 9.765625E-4 : f32
    %1 = vector.broadcast %cst : f32 to vector<1x128xf32>
    %2 = arith.mulf %0, %1 : vector<1x128xf32>
    %c0_1 = arith.constant 0 : index
    %c0_2 = arith.constant 0 : index
    %3 = vector.load %arg3[%c0_1, %c0_2] : memref<1x128xf32, #tpu.memory_space<vmem>>, vector<1x128xf32>
    %cst_3 = arith.constant 9.765625E-4 : f32
    %4 = vector.broadcast %cst_3 : f32 to vector<1x128xf32>
    %5 = arith.mulf %3, %4 : vector<1x128xf32>
    %6 = arith.mulf %2, %2 : vector<1x128xf32>
    %7 = arith.subf %5, %6 : vector<1x128xf32>
    %cst_4 = arith.constant 0.000000e+00 : f32
    %8 = vector.broadcast %cst_4 : f32 to vector<1x128xf32>
    %9 = arith.maximumf %7, %8 : vector<1x128xf32>
    %cst_5 = arith.constant 9.99999974E-6 : f32
    %10 = vector.broadcast %cst_5 : f32 to vector<1x128xf32>
    %11 = arith.addf %9, %10 : vector<1x128xf32>
    %12 = math.rsqrt %11 : vector<1x128xf32>
    %c0_6 = arith.constant 0 : index
    %c0_7 = arith.constant 0 : index
    %13 = vector.load %arg1[%c0_6, %c0_7] : memref<512x128xf32, #tpu.memory_space<vmem>>, vector<512x128xf32>
    %14 = vector.broadcast %2 : vector<1x128xf32> to vector<512x128xf32>
    %15 = arith.subf %13, %14 : vector<512x128xf32>
    %16 = vector.broadcast %12 : vector<1x128xf32> to vector<512x128xf32>
    %17 = arith.mulf %15, %16 : vector<512x128xf32>
    %c0_8 = arith.constant 0 : index
    %c0_9 = arith.constant 0 : index
    %18 = vector.load %arg4[%c0_8, %c0_9] : memref<1x128xf32, #tpu.memory_space<vmem>>, vector<1x128xf32>
    %19 = vector.broadcast %18 : vector<1x128xf32> to vector<512x128xf32>
    %20 = arith.mulf %17, %19 : vector<512x128xf32>
    %c0_10 = arith.constant 0 : index
    %c0_11 = arith.constant 0 : index
    %21 = vector.load %arg5[%c0_10, %c0_11] : memref<1x128xf32, #tpu.memory_space<vmem>>, vector<1x128xf32>
    %22 = vector.broadcast %21 : vector<1x128xf32> to vector<512x128xf32>
    %23 = arith.addf %20, %22 : vector<512x128xf32>
    %cst_12 = arith.constant 0.000000e+00 : f32
    %24 = vector.broadcast %cst_12 : f32 to vector<512x128xf32>
    %25 = arith.cmpf ogt, %23, %24 : vector<512x128xf32>
    %cst_13 = arith.constant 0.000000e+00 : f32
    %26 = vector.broadcast %cst_13 : f32 to vector<512x128xf32>
    %27 = arith.minimumf %23, %26 : vector<512x128xf32>
    %28 = math.exp %27 : vector<512x128xf32>
    %cst_14 = arith.constant 1.000000e+00 : f32
    %29 = vector.broadcast %cst_14 : f32 to vector<512x128xf32>
    %30 = arith.subf %28, %29 : vector<512x128xf32>
    %31 = arith.select %25, %23, %30 : vector<512x128xi1>, vector<512x128xf32>
    %c0_15 = arith.constant 0 : index
    %c0_16 = arith.constant 0 : index
    %32 = vector.load %arg6[%c0_15, %c0_16] : memref<512x128xf32, #tpu.memory_space<vmem>>, vector<512x128xf32>
    %33 = arith.addf %31, %32 : vector<512x128xf32>
    %c0_17 = arith.constant 0 : index
    %c0_18 = arith.constant 0 : index
    %34 = vector.load %arg7[%c0_17, %c0_18] : memref<512x128xf32, #tpu.memory_space<vmem>>, vector<512x128xf32>
    tpu.vector_store %arg7[%c0_17, %c0_18], %33 {strides = array<i32>} : memref<512x128xf32, #tpu.memory_space<vmem>>, vector<512x128xf32>,
    return
  }
  func.func @transform_0(%arg0: i32) -> (i32, i32) {
    %c0_i32 = arith.constant 0 : i32
    %c0_i32_0 = arith.constant 0 : i32
    return %arg0, %c0_i32 : i32, i32
  }
  func.func @transform_1(%arg0: i32) -> (i32, i32) {
    %c0_i32 = arith.constant 0 : i32
    %c0_i32_0 = arith.constant 0 : i32
    %c0_i32_1 = arith.constant 0 : i32
    return %c0_i32, %c0_i32_0 : i32, i32
  }
  func.func @transform_2(%arg0: i32) -> (i32, i32) {
    %c0_i32 = arith.constant 0 : i32
    %c0_i32_0 = arith.constant 0 : i32
    %c0_i32_1 = arith.constant 0 : i32
    return %c0_i32, %c0_i32_0 : i32, i32
  }
  func.func @transform_3(%arg0: i32) -> (i32, i32) {
    %c0_i32 = arith.constant 0 : i32
    %c0_i32_0 = arith.constant 0 : i32
    %c0_i32_1 = arith.constant 0 : i32
    return %c0_i32, %c0_i32_0 : i32, i32
  }
  func.func @transform_4(%arg0: i32) -> (i32, i32) {
    %c0_i32 = arith.constant 0 : i32
    %c0_i32_0 = arith.constant 0 : i32
    %c0_i32_1 = arith.constant 0 : i32
    return %c0_i32, %c0_i32_0 : i32, i32
  }
  func.func @transform_5(%arg0: i32) -> (i32, i32) {
    %c0_i32 = arith.constant 0 : i32
    %c0_i32_0 = arith.constant 0 : i32
    return %arg0, %c0_i32 : i32, i32
  }
  func.func @transform_6(%arg0: i32) -> (i32, i32) {
    %c0_i32 = arith.constant 0 : i32
    %c0_i32_0 = arith.constant 0 : i32
    return %arg0, %c0_i32 : i32, i32
  }
}

</mosaic_0001>

<bundles_post_ra>
// kernel: unet_down_block_forward.7
= control target key start
LH: loop header
LB: loop body
LE: loop exit
PB: predicated region body
PF: predicated region fallthrough
CT: control target
= control target key end

     0   :  { %v473_v3 = vmov 1966171168   ;;  %v271_v11 = vlaneseq  ;;  %s670_s0 = inlined_call_operand.vmem [shape: f32[8,4096], index: 0, kind: input, shape index: {}]   ;;  %s671_s1 = inlined_call_operand.vmem [shape: f32[1,4096], index: 1, kind: output, shape index: {}]  }
   0x1   :  { %v8_v0 = vld [vmem:[%s670_s0] sm:$0xff]  ;;  %v9_v1 = vld [vmem:[%s670_s0 + $0x8] sm:$0xff]  ;;  %v10_v2 = vld [vmem:[%s670_s0 + $0x10] sm:$0xff]  ;;  %v493_v4 = vunpack.c.l.s4 %v473_v3 }
   0x2   :  { %v11_v5 = vld [vmem:[%s670_s0 + $0x18] sm:$0xff]  ;;  %v12_v6 = vld [vmem:[%s670_s0 + $0x20] sm:$0xff]  ;;  %v13_v7 = vld [vmem:[%s670_s0 + $0x28] sm:$0xff]  ;;  %v40_v8 = vrot.slane %v8_v0, 4  ;;  %v46_v9 = vrot.slane %v9_v1, 4  ;;  %v52_v10 = vrot.slane %v10_v2, 4 }
   0x3   :  { %v14_v12 = vld [vmem:[%s670_s0 + $0x30] sm:$0xff]  ;;  %v15_v13 = vld [vmem:[%s670_s0 + $0x38] sm:$0xff]  ;;  %v58_v14 = vrot.slane %v11_v5, 4  ;;  %v64_v15 = vrot.slane %v12_v6, 4  ;;  %v70_v16 = vrot.slane %v13_v7, 4  ;;  %v270_v17 = vunpack.c.0.s8 %v493_v4  ;;  %v16_v46 = vld [vmem:[%s670_s0 + $0x40] sm:$0xff] }
   0x4   :  { %v41_v18 = vmax.f32 %v8_v0, %v40_v8  ;;  %v47_v19 = vmax.f32 %v9_v1, %v46_v9  ;;  %v53_v20 = vmax.f32 %v10_v2, %v52_v10  ;;  %v76_v21 = vrot.slane %v14_v12, 4  ;;  %v17_v47 = vld [vmem:[%s670_s0 + $0x48] sm:$0xff]  ;;  %v18_v48 = vld [vmem:[%s670_s0 + $0x50] sm:$0xff]  ;;  %v19_v53 = vld [vmem:[%s670_s0 + $0x58] sm:$0xff] }
   0x5   :  { %v59_v22 = vmax.f32 %v11_v5, %v58_v14  ;;  %v65_v23 = vmax.f32 %v12_v6, %v64_v15  ;;  %v71_v24 = vmax.f32 %v13_v7, %v70_v16  ;;  %v82_v25 = vrot.slane %v15_v13, 4  ;;  %v20_v54 = vld [vmem:[%s670_s0 + $0x60] sm:$0xff]  ;;  %v21_v55 = vld [vmem:[%s670_s0 + $0x68] sm:$0xff]  ;;  %v22_v60 = vld [vmem:[%s670_s0 + $0x70] sm:$0xff] }
   0x6   :  { %v42_v26 = vrot.slane %v41_v18, 2  ;;  %v48_v27 = vrot.slane %v47_v19, 2  ;;  %v54_v28 = vrot.slane %v53_v20, 2  ;;  %v77_v29 = vmax.f32 %v14_v12, %v76_v21  ;;  %v23_v1 = vld [vmem:[%s670_s0 + $0x78] sm:$0xff] }
   0x7   :  { %v60_v30 = vrot.slane %v59_v22, 2  ;;  %v66_v31 = vrot.slane %v65_v23, 2  ;;  %v72_v32 = vrot.slane %v71_v24, 2  ;;  %v83_v33 = vmax.f32 %v15_v13, %v82_v25 }
   0x8   :  { %v43_v34 = vmax.f32 %v41_v18, %v42_v26  ;;  %v49_v35 = vmax.f32 %v47_v19, %v48_v27  ;;  %v55_v36 = vmax.f32 %v53_v20, %v54_v28  ;;  %v78_v37 = vrot.slane %v77_v29, 2 }
   0x9   :  { %v61_v38 = vmax.f32 %v59_v22, %v60_v30  ;;  %v67_v39 = vmax.f32 %v65_v23, %v66_v31  ;;  %v73_v40 = vmax.f32 %v71_v24, %v72_v32  ;;  %v84_v41 = vrot.slane %v83_v33, 2 }
   0xa   :  { %v44_v42 = vrot.slane %v43_v34, 1  ;;  %v50_v43 = vrot.slane %v49_v35, 1  ;;  %v56_v44 = vrot.slane %v55_v36, 1  ;;  %v79_v45 = vmax.f32 %v77_v29, %v78_v37 }
   0xb   :  { %v62_v49 = vrot.slane %v61_v38, 1  ;;  %v68_v50 = vrot.slane %v67_v39, 1  ;;  %v74_v51 = vrot.slane %v73_v40, 1  ;;  %v85_v52 = vmax.f32 %v83_v33, %v84_v41  ;;  %v24_v41 = vld [vmem:[%s670_s0 + $0x80] sm:$0xff] }
   0xc   :  { %v529_v56 = vmax.f32 %v43_v34, %v44_v42  ;;  %v531_v57 = vmax.f32 %v49_v35, %v50_v43  ;;  %v533_v58 = vmax.f32 %v55_v36, %v56_v44  ;;  %v80_v59 = vrot.slane %v79_v45, 1  ;;  %v25_v42 = vld [vmem:[%s670_s0 + $0x88] sm:$0xff]  ;;  %v26_v43 = vld [vmem:[%s670_s0 + $0x90] sm:$0xff] }
   0xd   :  { %v538_v61 = vmax.f32 %v61_v38, %v62_v49  ;;  %v540_v62 = vmax.f32 %v67_v39, %v68_v50  ;;  %v542_v63 = vmax.f32 %v73_v40, %v74_v51  ;;  %v86_v0 = vrot.slane %v85_v52, 1  ;;  %v28_v49 = vld [vmem:[%s670_s0 + $0xa0] sm:$0xff]  ;;  %v29_v50 = vld [vmem:[%s670_s0 + $0xa8] sm:$0xff] }
   0xe   :  { %v547_v2 = vmax.f32 %v79_v45, %v80_v59  ;;  %v88_v3 = vrot.slane %v16_v46, 4  ;;  %v94_v5 = vrot.slane %v17_v47, 4  ;;  %v100_v6 = vrot.slane %v18_v48, 4 }
   0xf   :  { %v549_v7 = vmax.f32 %v85_v52, %v86_v0  ;;  %v106_v8 = vrot.slane %v19_v53, 4  ;;  %v112_v9 = vrot.slane %v20_v54, 4  ;;  %v118_v10 = vrot.slane %v21_v55, 4 }
  0x10   :  { %v89_v12 = vmax.f32 %v16_v46, %v88_v3  ;;  %v95_v13 = vmax.f32 %v17_v47, %v94_v5  ;;  %v101_v14 = vmax.f32 %v18_v48, %v100_v6  ;;  %v124_v15 = vrot.slane %v22_v60, 4  ;;  %v27_v48 = vld [vmem:[%s670_s0 + $0x98] sm:$0xff] }
  0x11   :  { %v107_v16 = vmax.f32 %v19_v53, %v106_v8  ;;  %v113_v18 = vmax.f32 %v20_v54, %v112_v9  ;;  %v119_v19 = vmax.f32 %v21_v55, %v118_v10  ;;  %v130_v20 = vrot.slane %v23_v1, 4  ;;  %v30_v55 = vld [vmem:[%s670_s0 + $0xb0] sm:$0xff]  ;;  %v31_v3 = vld [vmem:[%s670_s0 + $0xb8] sm:$0xff] }
  0x12   :  { %v90_v21 = vrot.slane %v89_v12, 2  ;;  %v96_v22 = vrot.slane %v95_v13, 2  ;;  %v102_v23 = vrot.slane %v101_v14, 2  ;;  %v125_v24 = vmax.f32 %v22_v60, %v124_v15 }
  0x13   :  { %v108_v25 = vrot.slane %v107_v16, 2  ;;  %v114_v26 = vrot.slane %v113_v18, 2  ;;  %v120_v27 = vrot.slane %v119_v19, 2  ;;  %v131_v28 = vmax.f32 %v23_v1, %v130_v20 }
  0x14   :  { %v91_v29 = vmax.f32 %v89_v12, %v90_v21  ;;  %v97_v30 = vmax.f32 %v95_v13, %v96_v22  ;;  %v103_v31 = vmax.f32 %v101_v14, %v102_v23  ;;  %v126_v32 = vrot.slane %v125_v24, 2 }
  0x15   :  { %v109_v33 = vmax.f32 %v107_v16, %v108_v25  ;;  %v115_v34 = vmax.f32 %v113_v18, %v114_v26  ;;  %v121_v35 = vmax.f32 %v119_v19, %v120_v27  ;;  %v132_v36 = vrot.slane %v131_v28, 2 }
  0x16   :  { %v92_v37 = vrot.slane %v91_v29, 1  ;;  %v98_v38 = vrot.slane %v97_v30, 1  ;;  %v104_v39 = vrot.slane %v103_v31, 1  ;;  %v127_v40 = vmax.f32 %v125_v24, %v126_v32 }
  0x17   :  { %v110_v44 = vrot.slane %v109_v33, 1  ;;  %v116_v45 = vrot.slane %v115_v34, 1  ;;  %v122_v46 = vrot.slane %v121_v35, 1  ;;  %v133_v47 = vmax.f32 %v131_v28, %v132_v36 }
  0x18   :  { %v569_v51 = vmax.f32 %v91_v29, %v92_v37  ;;  %v571_v52 = vmax.f32 %v97_v30, %v98_v38  ;;  %v573_v53 = vmax.f32 %v103_v31, %v104_v39  ;;  %v128_v54 = vrot.slane %v127_v40, 1 }
  0x19   :  { %v578_v59 = vmax.f32 %v109_v33, %v110_v44  ;;  %v580_v60 = vmax.f32 %v115_v34, %v116_v45  ;;  %v582_v0 = vmax.f32 %v121_v35, %v122_v46  ;;  %v134_v1 = vrot.slane %v133_v47, 1  ;;  %v32_v44 = vld [vmem:[%s670_s0 + $0xc0] sm:$0xff]  ;;  %v33_v45 = vld [vmem:[%s670_s0 + $0xc8] sm:$0xff]  ;;  %v34_v46 = vld [vmem:[%s670_s0 + $0xd0] sm:$0xff] }
  0x1a   :  { %v587_v5 = vmax.f32 %v127_v40, %v128_v54  ;;  %v136_v6 = vrot.slane %v24_v41, 4  ;;  %v142_v8 = vrot.slane %v25_v42, 4  ;;  %v148_v9 = vrot.slane %v26_v43, 4  ;;  %v35_v54 = vld [vmem:[%s670_s0 + $0xd8] sm:$0xff] }
  0x1b   :  { %v589_v10 = vmax.f32 %v133_v47, %v134_v1  ;;  %v154_v12 = vrot.slane %v27_v48, 4  ;;  %v160_v13 = vrot.slane %v28_v49, 4  ;;  %v166_v14 = vrot.slane %v29_v50, 4  ;;  %v37_v1 = vld [vmem:[%s670_s0 + $0xe8] sm:$0xff] }
  0x1c   :  { %v137_v15 = vmax.f32 %v24_v41, %v136_v6  ;;  %v143_v16 = vmax.f32 %v25_v42, %v142_v8  ;;  %v149_v18 = vmax.f32 %v26_v43, %v148_v9  ;;  %v172_v19 = vrot.slane %v30_v55, 4 }
  0x1d   :  { %v155_v20 = vmax.f32 %v27_v48, %v154_v12  ;;  %v161_v21 = vmax.f32 %v28_v49, %v160_v13  ;;  %v167_v22 = vmax.f32 %v29_v50, %v166_v14  ;;  %v178_v23 = vrot.slane %v31_v3, 4  ;;  %v38_v12 = vld [vmem:[%s670_s0 + $0xf0] sm:$0xff] }
  0x1e   :  { %v138_v24 = vrot.slane %v137_v15, 2  ;;  %v144_v25 = vrot.slane %v143_v16, 2  ;;  %v150_v26 = vrot.slane %v149_v18, 2  ;;  %v173_v27 = vmax.f32 %v30_v55, %v172_v19  ;;  %v36_v55 = vld [vmem:[%s670_s0 + $0xe0] sm:$0xff] }
  0x1f   :  { %v156_v28 = vrot.slane %v155_v20, 2  ;;  %v162_v29 = vrot.slane %v161_v21, 2  ;;  %v168_v30 = vrot.slane %v167_v22, 2  ;;  %v179_v31 = vmax.f32 %v31_v3, %v178_v23 }
  0x20   :  { %v139_v32 = vmax.f32 %v137_v15, %v138_v24  ;;  %v145_v33 = vmax.f32 %v143_v16, %v144_v25  ;;  %v151_v34 = vmax.f32 %v149_v18, %v150_v26  ;;  %v174_v35 = vrot.slane %v173_v27, 2  ;;  %v39_v18 = vld [vmem:[%s670_s0 + $0xf8] sm:$0xff] }
  0x21   :  { %v157_v36 = vmax.f32 %v155_v20, %v156_v28  ;;  %v163_v37 = vmax.f32 %v161_v21, %v162_v29  ;;  %v169_v38 = vmax.f32 %v167_v22, %v168_v30  ;;  %v180_v39 = vrot.slane %v179_v31, 2 }
  0x22   :  { %v140_v40 = vrot.slane %v139_v32, 1  ;;  %v146_v41 = vrot.slane %v145_v33, 1  ;;  %v152_v42 = vrot.slane %v151_v34, 1  ;;  %v175_v43 = vmax.f32 %v173_v27, %v174_v35 }
  0x23   :  { %v158_v47 = vrot.slane %v157_v36, 1  ;;  %v164_v48 = vrot.slane %v163_v37, 1  ;;  %v170_v49 = vrot.slane %v169_v38, 1  ;;  %v181_v50 = vmax.f32 %v179_v31, %v180_v39 }
  0x24   :  { %v609_v3 = vmax.f32 %v139_v32, %v140_v40  ;;  %v611_v6 = vmax.f32 %v145_v33, %v146_v41  ;;  %v613_v8 = vmax.f32 %v151_v34, %v152_v42  ;;  %v176_v9 = vrot.slane %v175_v43, 1 }
  0x25   :  { %v618_v13 = vmax.f32 %v157_v36, %v158_v47  ;;  %v620_v14 = vmax.f32 %v163_v37, %v164_v48  ;;  %v622_v15 = vmax.f32 %v169_v38, %v170_v49  ;;  %v182_v16 = vrot.slane %v181_v50, 1 }
  0x26   :  { %v627_v19 = vmax.f32 %v175_v43, %v176_v9  ;;  %v184_v20 = vrot.slane %v32_v44, 4  ;;  %v190_v21 = vrot.slane %v33_v45, 4  ;;  %v196_v22 = vrot.slane %v34_v46, 4 }
  0x27   :  { %v629_v23 = vmax.f32 %v181_v50, %v182_v16  ;;  %v202_v24 = vrot.slane %v35_v54, 4  ;;  %v208_v25 = vrot.slane %v36_v55, 4  ;;  %v214_v26 = vrot.slane %v37_v1, 4 }
  0x28   :  { %v185_v27 = vmax.f32 %v32_v44, %v184_v20  ;;  %v191_v28 = vmax.f32 %v33_v45, %v190_v21  ;;  %v197_v29 = vmax.f32 %v34_v46, %v196_v22  ;;  %v220_v30 = vrot.slane %v38_v12, 4 }
  0x29   :  { %v203_v31 = vmax.f32 %v35_v54, %v202_v24  ;;  %v209_v32 = vmax.f32 %v36_v55, %v208_v25  ;;  %v215_v33 = vmax.f32 %v37_v1, %v214_v26  ;;  %v226_v34 = vrot.slane %v39_v18, 4 }
  0x2a   :  { %v186_v35 = vrot.slane %v185_v27, 2  ;;  %v192_v36 = vrot.slane %v191_v28, 2  ;;  %v198_v37 = vrot.slane %v197_v29, 2  ;;  %v221_v38 = vmax.f32 %v38_v12, %v220_v30 }
  0x2b   :  { %v204_v39 = vrot.slane %v203_v31, 2  ;;  %v210_v40 = vrot.slane %v209_v32, 2  ;;  %v216_v41 = vrot.slane %v215_v33, 2  ;;  %v227_v42 = vmax.f32 %v39_v18, %v226_v34 }
  0x2c   :  { %v187_v43 = vmax.f32 %v185_v27, %v186_v35  ;;  %v193_v47 = vmax.f32 %v191_v28, %v192_v36  ;;  %v199_v48 = vmax.f32 %v197_v29, %v198_v37  ;;  %v222_v49 = vrot.slane %v221_v38, 2 }
  0x2d   :  { %v205_v44 = vmax.f32 %v203_v31, %v204_v39  ;;  %v211_v45 = vmax.f32 %v209_v32, %v210_v40  ;;  %v217_v46 = vmax.f32 %v215_v33, %v216_v41  ;;  %v228_v50 = vrot.slane %v227_v42, 2 }
  0x2e   :  { %v188_v54 = vrot.slane %v187_v43, 1  ;;  %v194_v55 = vrot.slane %v193_v47, 1  ;;  %v200_v1 = vrot.slane %v199_v48, 1  ;;  %v223_v9 = vmax.f32 %v221_v38, %v222_v49 }
  0x2f   :  { %v206_v16 = vrot.slane %v205_v44, 1  ;;  %v212_v20 = vrot.slane %v211_v45, 1  ;;  %v218_v21 = vrot.slane %v217_v46, 1  ;;  %v229_v12 = vmax.f32 %v227_v42, %v228_v50 }
  0x30   :  { %v189_v22 = vmax.f32 %v187_v43, %v188_v54  ;;  %v195_v24 = vmax.f32 %v193_v47, %v194_v55  ;;  %v201_v25 = vmax.f32 %v199_v48, %v200_v1  ;;  %v224_v18 = vrot.slane %v223_v9, 1 }
  0x31   :  { %v207_v26 = vmax.f32 %v205_v44, %v206_v16  ;;  %v213_v27 = vmax.f32 %v211_v45, %v212_v20  ;;  %v219_v28 = vmax.f32 %v217_v46, %v218_v21  ;;  %v230_v29 = vrot.slane %v229_v12, 1 }
  0x32   :  { %v225_v30 = vmax.f32 %v223_v9, %v224_v18  ;;  %v264_v31 = vcombine.low %v529_v56, %v531_v57  ;;  %v265_v32 = vcombine.low %v533_v58, %v538_v61  ;;  %v266_v33 = vcombine.low %v540_v62, %v542_v63 }
  0x33   :  { %v231_v34 = vmax.f32 %v229_v12, %v230_v29  ;;  %v267_v35 = vcombine.low %v547_v2, %v549_v7  ;;  %v272_v36 = vshrl.u32 %v271_v11, 7  ;;  %v313_v37 = vcombine.low %v569_v51, %v571_v52 }
  0x34   :  { %v314_v38 = vcombine.low %v573_v53, %v578_v59  ;;  %v315_v56 = vcombine.low %v580_v60, %v582_v0  ;;  %v316_v57 = vcombine.low %v587_v5, %v589_v10  ;;  %v362_v58 = vcombine.low %v609_v3, %v611_v6 }
  0x35   :  { %v273_v61 = vsub.s32 %v270_v17, %v272_v36  ;;  %v363_v11 = vcombine.low %v613_v8, %v618_v13  ;;  %v364_v62 = vcombine.low %v620_v14, %v622_v15  ;;  %v365_v63 = vcombine.low %v627_v19, %v629_v23 }
  0x36   :  { %v411_v2 = vcombine.low %v189_v22, %v195_v24  ;;  %v412_v7 = vcombine.low %v201_v25, %v207_v26  ;;  %v413_v51 = vcombine.low %v213_v27, %v219_v28  ;;  %v414_v52 = vcombine.low %v225_v30, %v231_v34 }
  0x37   :  { %v274_v53 = vrot.slane %v264_v31, %v273_v61  ;;  %v281_v59 = vrot.slane %v265_v32, %v273_v61  ;;  %v288_v60 = vrot.slane %v266_v33, %v273_v61  ;;  %v295_v0 = vrot.slane %v267_v35, %v273_v61 }
  0x38   :  { %v323_v5 = vrot.slane %v313_v37, %v273_v61  ;;  %v330_v4 = vrot.slane %v314_v38, %v273_v61  ;;  %v337_v17 = vrot.slane %v315_v56, %v273_v61  ;;  %v344_v10 = vrot.slane %v316_v57, %v273_v61 }
  0x39   :  { %v296_v3 = vcombine.low %v274_v53, %v281_v59  ;;  %v297_v6 = vcombine.low %v288_v60, %v295_v0  ;;  %v372_v8 = vrot.slane %v362_v58, %v273_v61  ;;  %v379_v13 = vrot.slane %v363_v11, %v273_v61 }
  0x3a   :  { %v345_v14 = vcombine.low %v323_v5, %v330_v4  ;;  %v346_v15 = vcombine.low %v337_v17, %v344_v10  ;;  %v386_v39 = vrot.slane %v364_v62, %v273_v61  ;;  %v393_v19 = vrot.slane %v365_v63, %v273_v61 }
  0x3b   :  { %v304_v23 = vrot.slane %v296_v3, %v273_v61  ;;  %v311_v40 = vrot.slane %v297_v6, %v273_v61  ;;  %v394_v41 = vcombine.low %v372_v8, %v379_v13  ;;  %v421_v42 = vrot.slane %v411_v2, %v273_v61 }
  0x3c   :  { %v353_v43 = vrot.slane %v345_v14, %v273_v61  ;;  %v360_v47 = vrot.slane %v346_v15, %v273_v61  ;;  %v395_v48 = vcombine.low %v386_v39, %v393_v19  ;;  %v428_v49 = vrot.slane %v412_v7, %v273_v61 }
  0x3d   :  { %v312_v44 = vcombine.low %v304_v23, %v311_v40  ;;  %v402_v45 = vrot.slane %v394_v41, %v273_v61  ;;  %v435_v46 = vrot.slane %v413_v51, %v273_v61  ;;  %v442_v50 = vrot.slane %v414_v52, %v273_v61 }
  0x3e   :  { %v361_v54 = vcombine.low %v353_v43, %v360_v47  ;;  %v409_v55 = vrot.slane %v395_v48, %v273_v61  ;;  %v443_v1 = vcombine.low %v421_v42, %v428_v49 }
  0x3f   :  { %v444_v9 = vcombine.low %v435_v46, %v442_v50  ;;  %464 = vst [vmem:[%s671_s1] sm:$0xff] %v312_v44 }
  0x40   :  { %v410_v16 = vcombine.low %v402_v45, %v409_v55  ;;  %v451_v20 = vrot.slane %v443_v1, %v273_v61  ;;  %465 = vst [vmem:[%s671_s1 + $0x8] sm:$0xff] %v361_v54 }
  0x41   :  { %v458_v21 = vrot.slane %v444_v9, %v273_v61 }
  0x42   :  { %466 = vst [vmem:[%s671_s1 + $0x10] sm:$0xff] %v410_v16 }
  0x43   :  { %v459_v12 = vcombine.low %v451_v20, %v458_v21 }
  0x45   :  { %467 = vst [vmem:[%s671_s1 + $0x18] sm:$0xff] %v459_v12 }

// kernel: unet_down_block_forward.8
= control target key start
LH: loop header
LB: loop body
LE: loop exit
PB: predicated region body
PF: predicated region fallthrough
CT: control target
= control target key end

     0   :  { %s1550_s18 = smov 0   ;;  %s1999_s0 = inlined_call_operand.vmem [shape: bf16[1024,108], index: 0, kind: input, shape index: {}]   ;;  %s2000_s1 = inlined_call_operand.vmem [shape: bf16[108,128], index: 1, kind: input, shape index: {}]   ;;  %s2001_s2 = inlined_call_operand.vmem [shape: f32[1,128], index: 2, kind: input, shape index: {}]   ;;  %s2002_s3 = inlined_call_operand.vmem [shape: f32[1024,128], index: 3, kind: output, shape index: {0}]   ;;  %s2003_s4 = inlined_call_operand.vmem [shape: f32[1,128], index: 4, kind: output, shape index: {1}]   ;;  %s2004_s5 = inlined_call_operand.vmem [shape: f32[1,128], index: 5, kind: output, shape index: {2}]  }
   0x1 LB: > { %s1246_s19 = sadd.s32 4294967295, %s1517_s18   ;;  %p1250_p0 = scmp.ge.s32.totalorder %s1517_s18, 1  ;;  %s1517_s18 = sphi %s1550_s18, %s16_s18  }
   0x2   : > { %p183_p1 = scmp.lt.s32.totalorder %s1517_s18, 3 }
   0x4   : > { %p184_p2 = pnand %p1250_p0, %p183_p1 }
   0x5   : > { %s1251_s20 = sshll.u32 (!%p184_p2), %s1246_s19, 6  ;;  %p1255_p4 = scmp.ne.s32.totalorder (!%p184_p2), %s1246_s19, 0 }
   0x6   : > { %187 = sbr.rel (%p184_p2) target bundleno = 409 (0x199), region = 32  ;;  %p212_p3 = scmp.lt.s32.totalorder (!%p184_p2), %s1251_s20, 127 }
   0xd   : > { %s2006_s20 = smov (!%p212_p3, %s1251_s20), 127  ;;  %227 = sbr.rel (%p1255_p4) target bundleno = 20 (0x14), region = 36 }
   0xe   : > { %s1252_s21 = sshll.u32 %s2006_s20, 2  ;;  %s1254_s22 = sshll.u32 %s2006_s20, 3  ;;  %v1519_v0 = vmov (!%p1255_p4), 0.0  }
   0xf   : > { %s1561_s25 = scalar_lea.vmem %s1999_s0, %s1252_s21  ;;  %s1566_s28 = scalar_lea.vmem %s2002_s3, %s1254_s22  ;;  %228 = vst [vmem:[%s2003_s4] sm:$0x1] (!%p1255_p4), %v1519_v0  ;;  %229 = vst [vmem:[%s2004_s5] sm:$0x1] (!%p1255_p4), %v1519_v0 }
  0x14 PF: > { %v1472_v1 = vld [vmem:[%s2000_s1] sm:$0xff]   ;;  %v1473_v2 = vld [vmem:[%s2000_s1 + $0x8] sm:$0xff]   ;;  %v1474_v3 = vld [vmem:[%s2000_s1 + $0x10] sm:$0xff]   ;;  %vm516_vm0 = vcmask 883712   ;;  %vm613_vm1 = vcmask 1045504  }
  0x15   : > { %1369 = vmatprep.subr.bf16.mxu0 %v1472_v1  ;;  %1447 = vmatprep.subr.bf16.mxu1 %v1472_v1  ;;  %v1479_v4 = vld [vmem:[%s1561_s25] sm:$0xff]   ;;  %v1475_v5 = vld [vmem:[%s2000_s1 + $0x18] sm:$0xff]   ;;  %v1477_v7 = vld [vmem:[%s2000_s1 + $0x28] sm:$0xff]  }
  0x16   : > { %1370 = vmatpush3.bf16.msra.mxu0 %v1472_v1  ;;  %1454 = vmatpush3.bf16.msra.mxu1 %v1472_v1  ;;  %v1476_v6 = vld [vmem:[%s2000_s1 + $0x20] sm:$0xff]   ;;  %v1478_v8 = vld [vmem:[%s2000_s1 + $0x30] sm:$0x3f]   ;;  %v1480_v11 = vld [vmem:[%s1561_s25 + $0x8] sm:$0xff]  }
  0x17   : > { %1371 = vmatprep.subr.bf16.mxu0 %v1473_v2  ;;  %1448 = vmatprep.subr.bf16.mxu1 %v1473_v2  ;;  %v1495_v9 = vld [vmem:[%s1561_s25 + $0x80] sm:$0xff]   ;;  %v615_v10 = vsel %vm613_vm1, %v1478_v8, 0  ;;  %v1481_v12 = vld [vmem:[%s1561_s25 + $0x10] sm:$0xff]   ;;  %v1496_v13 = vld [vmem:[%s1561_s25 + $0x88] sm:$0xff]  }
  0x18   : > { %1383 = vmatprep.mubr.msk.bf16.mxu0 %vm516_vm0, %v1479_v4  ;;  %1415 = vmatprep.mubr.msk.bf16.mxu1 %vm516_vm0, %v1495_v9  ;;  %v1497_v14 = vld [vmem:[%s1561_s25 + $0x90] sm:$0xff]   ;;  %v1482_v15 = vld [vmem:[%s1561_s25 + $0x18] sm:$0xff]   ;;  %v1483_v16 = vld [vmem:[%s1561_s25 + $0x20] sm:$0xff]  }
  0x19   : > { %v1498_v17 = vld [vmem:[%s1561_s25 + $0x98] sm:$0xff]   ;;  %v1499_v18 = vld [vmem:[%s1561_s25 + $0xa0] sm:$0xff]   ;;  %v1484_v19 = vld [vmem:[%s1561_s25 + $0x28] sm:$0xff]  }
  0x1a   : > { %1372 = vmatpush3.bf16.msra.mxu0 %v1473_v2  ;;  %1455 = vmatpush3.bf16.msra.mxu1 %v1473_v2  ;;  %v1500_v20 = vld [vmem:[%s1561_s25 + $0xa8] sm:$0xff]   ;;  %v1485_v21 = vld [vmem:[%s1561_s25 + $0x30] sm:$0xff]   ;;  %v1486_v23 = vld [vmem:[%s1561_s25 + $0x38] sm:$0xff]  }
  0x1b   : > { %1373 = vmatprep.subr.bf16.mxu0 %v1474_v3  ;;  %1449 = vmatprep.subr.bf16.mxu1 %v1474_v3  ;;  %v1501_v22 = vld [vmem:[%s1561_s25 + $0xb0] sm:$0xff]   ;;  %v1502_v24 = vld [vmem:[%s1561_s25 + $0xb8] sm:$0xff]   ;;  %v1487_v25 = vld [vmem:[%s1561_s25 + $0x40] sm:$0xff]  }
  0x1c   : > { %v1503_v26 = vld [vmem:[%s1561_s25 + $0xc0] sm:$0xff]   ;;  %v1488_v27 = vld [vmem:[%s1561_s25 + $0x48] sm:$0xff]   ;;  %v1489_v29 = vld [vmem:[%s1561_s25 + $0x50] sm:$0xff]  }
  0x1d   : > { %v1504_v28 = vld [vmem:[%s1561_s25 + $0xc8] sm:$0xff]   ;;  %v1505_v30 = vld [vmem:[%s1561_s25 + $0xd0] sm:$0xff]   ;;  %v1490_v31 = vld [vmem:[%s1561_s25 + $0x58] sm:$0xff]  }
  0x1e   : > { %1374 = vmatpush3.bf16.msra.mxu0 %v1474_v3  ;;  %1456 = vmatpush3.bf16.msra.mxu1 %v1474_v3  ;;  %v1506_v32 = vld [vmem:[%s1561_s25 + $0xd8] sm:$0xff]   ;;  %v1491_v33 = vld [vmem:[%s1561_s25 + $0x60] sm:$0xff]   ;;  %v1492_v35 = vld [vmem:[%s1561_s25 + $0x68] sm:$0xff]  }
  0x1f   : > { %1375 = vmatprep.subr.bf16.mxu0 %v1475_v5  ;;  %1450 = vmatprep.subr.bf16.mxu1 %v1475_v5  ;;  %v1507_v34 = vld [vmem:[%s1561_s25 + $0xe0] sm:$0xff]   ;;  %v1508_v36 = vld [vmem:[%s1561_s25 + $0xe8] sm:$0xff]   ;;  %v1493_v37 = vld [vmem:[%s1561_s25 + $0x70] sm:$0xff]  }
  0x20   : > { %v1509_v38 = vld [vmem:[%s1561_s25 + $0xf0] sm:$0xff]   ;;  %v1494_v39 = vld [vmem:[%s1561_s25 + $0x78] sm:$0xff]   ;;  %v1662_v41 = vld [vmem:[%s2001_s2] ss:$0 sm:$0xff] }
  0x21   : > { %v1510_v40 = vld [vmem:[%s1561_s25 + $0xf8] sm:$0xff]  }
  0x22   : > { %1376 = vmatpush3.bf16.msra.mxu0 %v1475_v5  ;;  %1457 = vmatpush3.bf16.msra.mxu1 %v1475_v5 }
  0x23   : > { %1377 = vmatprep.subr.bf16.mxu0 %v1476_v6  ;;  %1451 = vmatprep.subr.bf16.mxu1 %v1476_v6 }
  0x26   : > { %1378 = vmatpush3.bf16.msra.mxu0 %v1476_v6  ;;  %1458 = vmatpush3.bf16.msra.mxu1 %v1476_v6 }
  0x27   : > { %1379 = vmatprep.subr.bf16.mxu0 %v1477_v7  ;;  %1452 = vmatprep.subr.bf16.mxu1 %v1477_v7 }
  0x2a   : > { %1380 = vmatpush3.bf16.msra.mxu0 %v1477_v7  ;;  %1459 = vmatpush3.bf16.msra.mxu1 %v1477_v7 }
  0x2b   : > { %1461 = vmatprep.subr.msk.bf16.mxu0 %vm613_vm1, %v1478_v8  ;;  %1462 = vmatprep.subr.msk.bf16.mxu1 %vm613_vm1, %v1478_v8 }
  0x2e   : > { %1382 = vmatpush3.bf16.msra.mxu0 %v615_v10  ;;  %1460 = vmatpush3.bf16.msra.mxu1 %v615_v10 }
  0x31   : > { %1384 = vmatmul.mubr.msk.bf16.vlgmr.msra.gmra.mrb[0].mxu0 %vm516_vm0, %v1480_v11  ;;  %1416 = vmatmul.mubr.msk.bf16.vlgmr.msra.gmra.mrb[0].mxu1 %vm516_vm0, %v1496_v13 }
  0x32   : > { %1387 = vmatprep.mubr.msk.bf16.mxu0 %vm516_vm0, %v1481_v12  ;;  %1419 = vmatprep.mubr.msk.bf16.mxu1 %vm516_vm0, %v1497_v14 }
  0x39   : > { %1388 = vmatmul.mubr.msk.bf16.gmra.mrb[4].mxu0 %vm516_vm0, %v1482_v15  ;;  %1420 = vmatmul.mubr.msk.bf16.gmra.mrb[4].mxu1 %vm516_vm0, %v1498_v17 }
  0x3a   : > { %1391 = vmatprep.mubr.msk.bf16.mxu0 %vm516_vm0, %v1483_v16  ;;  %1423 = vmatprep.mubr.msk.bf16.mxu1 %vm516_vm0, %v1499_v18 }
  0x41   : > { %1392 = vmatmul.mubr.msk.bf16.gmra.mrb[8].mxu0 %vm516_vm0, %v1484_v19  ;;  %1424 = vmatmul.mubr.msk.bf16.gmra.mrb[8].mxu1 %vm516_vm0, %v1500_v20 }
  0x42   : > { %1395 = vmatprep.mubr.msk.bf16.mxu0 %vm516_vm0, %v1485_v21  ;;  %1427 = vmatprep.mubr.msk.bf16.mxu1 %vm516_vm0, %v1501_v22 }
  0x49   : > { %1396 = vmatmul.mubr.msk.bf16.gmra.mrb[12].mxu0 %vm516_vm0, %v1486_v23  ;;  %1428 = vmatmul.mubr.msk.bf16.gmra.mrb[12].mxu1 %vm516_vm0, %v1502_v24 }
  0x4a   : > { %1399 = vmatprep.mubr.msk.bf16.mxu0 %vm516_vm0, %v1487_v25  ;;  %1431 = vmatprep.mubr.msk.bf16.mxu1 %vm516_vm0, %v1503_v26 }
  0x51   : > { %1400 = vmatmul.mubr.msk.bf16.gmra.mrb[16].mxu0 %vm516_vm0, %v1488_v27  ;;  %1432 = vmatmul.mubr.msk.bf16.gmra.mrb[16].mxu1 %vm516_vm0, %v1504_v28 }
  0x52   : > { %1403 = vmatprep.mubr.msk.bf16.mxu0 %vm516_vm0, %v1489_v29  ;;  %1435 = vmatprep.mubr.msk.bf16.mxu1 %vm516_vm0, %v1505_v30 }
  0x59   : > { %1404 = vmatmul.mubr.msk.bf16.gmra.mrb[20].mxu0 %vm516_vm0, %v1490_v31  ;;  %1436 = vmatmul.mubr.msk.bf16.gmra.mrb[20].mxu1 %vm516_vm0, %v1506_v32 }
  0x5a   : > { %1407 = vmatprep.mubr.msk.bf16.mxu0 %vm516_vm0, %v1491_v33  ;;  %1439 = vmatprep.mubr.msk.bf16.mxu1 %vm516_vm0, %v1507_v34 }
  0x61   : > { %1408 = vmatmul.mubr.msk.bf16.gmra.mrb[24].mxu0 %vm516_vm0, %v1492_v35  ;;  %1440 = vmatmul.mubr.msk.bf16.gmra.mrb[24].mxu1 %vm516_vm0, %v1508_v36 }
  0x62   : > { %1411 = vmatprep.mubr.msk.bf16.mxu0 %vm516_vm0, %v1493_v37  ;;  %1443 = vmatprep.mubr.msk.bf16.mxu1 %vm516_vm0, %v1509_v38 }
  0x69   : > { %1412 = vmatmul.mubr.msk.bf16.gmra.mrb[28].mxu0 %vm516_vm0, %v1494_v39  ;;  %1444 = vmatmul.mubr.msk.bf16.gmra.mrb[28].mxu1 %vm516_vm0, %v1510_v40 }
 0x104   : > { %v1385_v42 = vpop.f32.mrb[0].mxu0  ;;  %v1417_v43 = vpop.f32.mrb[0].mxu1 }
 0x105   : > { %v660_v44 = vadd.f32 %v1385_v42, %v1662_v41  ;;  %v651_v45 = vpop.f32.mrb[1].mxu0  ;;  %v1666_v46 = vadd.f32 %v1417_v43, %v1662_v41  ;;  %v779_v47 = vpop.f32.mrb[1].mxu1 }
 0x106   : > { %v652_v48 = vadd.f32 %v1662_v41, %v651_v45  ;;  %v1386_v49 = vpop.f32.mrb[2].mxu0  ;;  %v1670_v50 = vadd.f32 %v1662_v41, %v779_v47  ;;  %v1418_v51 = vpop.f32.mrb[2].mxu1 }
 0x107   : > { %908 = vst [vmem:[%s1566_s28 + $0x10] sm:$0xff] %v660_v44  ;;  %v663_v52 = vadd.f32 %v1386_v49, %v1662_v41  ;;  %v654_v53 = vpop.f32.mrb[3].mxu0  ;;  %940 = vst [vmem:[%s1566_s28 + $0x110] sm:$0xff] %v1666_v46  ;;  %v1677_v54 = vadd.f32 %v1418_v51, %v1662_v41  ;;  %v782_v55 = vpop.f32.mrb[3].mxu1  ;;  %v1045_v61 = vmul.f32 %v660_v44, %v660_v44 }
 0x108   : > { %906 = vst [vmem:[%s1566_s28] sm:$0xff] %v652_v48  ;;  %v655_v56 = vadd.f32 %v1662_v41, %v654_v53  ;;  %938 = vst [vmem:[%s1566_s28 + $0x100] sm:$0xff] %v1670_v50  ;;  %v1684_v57 = vadd.f32 %v1662_v41, %v782_v55  ;;  %v1043_v58 = vmul.f32 %v652_v48, %v652_v48 }
 0x109   : > { %909 = vst [vmem:[%s1566_s28 + $0x18] sm:$0xff] %v663_v52  ;;  %941 = vst [vmem:[%s1566_s28 + $0x118] sm:$0xff] %v1677_v54  ;;  %v1046_v2 = vmul.f32 %v663_v52, %v663_v52 }
 0x10a   : > { %907 = vst [vmem:[%s1566_s28 + $0x8] sm:$0xff] %v655_v56  ;;  %v971_v59 = vadd.f32 %v655_v56, %v652_v48  ;;  %v1044_v60 = vmul.f32 %v655_v56, %v655_v56  ;;  %939 = vst [vmem:[%s1566_s28 + $0x108] sm:$0xff] %v1684_v57 }
 0x10c   : > { %v972_v62 = vadd.f32 %v971_v59, %v660_v44  ;;  %v1107_v63 = vadd.f32 %v1044_v60, %v1043_v58  ;;  %v1389_v0 = vpop.f32.mrb[4].mxu0  ;;  %v1421_v1 = vpop.f32.mrb[4].mxu1 }
 0x10d   : > { %v676_v3 = vadd.f32 %v1389_v0, %v1662_v41  ;;  %v667_v4 = vpop.f32.mrb[5].mxu0  ;;  %v1694_v5 = vadd.f32 %v1421_v1, %v1662_v41  ;;  %v795_v6 = vpop.f32.mrb[5].mxu1 }
 0x10e   : > { %v1108_v7 = vadd.f32 %v1107_v63, %v1045_v61  ;;  %v668_v8 = vadd.f32 %v1662_v41, %v667_v4  ;;  %v973_v9 = vadd.f32 %v972_v62, %v663_v52  ;;  %v1390_v10 = vpop.f32.mrb[6].mxu0  ;;  %v1698_v11 = vadd.f32 %v1662_v41, %v795_v6  ;;  %v1422_v12 = vpop.f32.mrb[6].mxu1 }
 0x10f   : > { %912 = vst [vmem:[%s1566_s28 + $0x30] sm:$0xff] %v676_v3  ;;  %v679_v13 = vadd.f32 %v1390_v10, %v1662_v41  ;;  %v670_v14 = vpop.f32.mrb[7].mxu0  ;;  %944 = vst [vmem:[%s1566_s28 + $0x130] sm:$0xff] %v1694_v5  ;;  %v1705_v15 = vadd.f32 %v1422_v12, %v1662_v41  ;;  %v798_v16 = vpop.f32.mrb[7].mxu1  ;;  %v1049_v25 = vmul.f32 %v676_v3, %v676_v3 }
 0x110   : > { %910 = vst [vmem:[%s1566_s28 + $0x20] sm:$0xff] %v668_v8  ;;  %v974_v17 = vadd.f32 %v973_v9, %v668_v8  ;;  %v1047_v18 = vmul.f32 %v668_v8, %v668_v8  ;;  %v1109_v19 = vadd.f32 %v1108_v7, %v1046_v2  ;;  %v671_v20 = vadd.f32 %v1662_v41, %v670_v14 }
 0x111   : > { %942 = vst [vmem:[%s1566_s28 + $0x120] sm:$0xff] %v1698_v11  ;;  %913 = vst [vmem:[%s1566_s28 + $0x38] sm:$0xff] %v679_v13  ;;  %v1715_v21 = vadd.f32 %v1662_v41, %v798_v16  ;;  %v1050_v30 = vmul.f32 %v679_v13, %v679_v13 }
 0x112   : > { %945 = vst [vmem:[%s1566_s28 + $0x138] sm:$0xff] %v1705_v15  ;;  %v1110_v22 = vadd.f32 %v1109_v19, %v1047_v18  ;;  %911 = vst [vmem:[%s1566_s28 + $0x28] sm:$0xff] %v671_v20  ;;  %v975_v23 = vadd.f32 %v974_v17, %v671_v20  ;;  %v1048_v24 = vmul.f32 %v671_v20, %v671_v20 }
 0x113   : > { %943 = vst [vmem:[%s1566_s28 + $0x128] sm:$0xff] %v1715_v21 }
 0x114   : > { %v976_v26 = vadd.f32 %v975_v23, %v676_v3  ;;  %v1111_v27 = vadd.f32 %v1110_v22, %v1048_v24  ;;  %v1393_v28 = vpop.f32.mrb[8].mxu0  ;;  %v1425_v29 = vpop.f32.mrb[8].mxu1 }
 0x115   : > { %v692_v31 = vadd.f32 %v1393_v28, %v1662_v41  ;;  %v683_v32 = vpop.f32.mrb[9].mxu0  ;;  %v1722_v33 = vadd.f32 %v1425_v29, %v1662_v41  ;;  %v811_v34 = vpop.f32.mrb[9].mxu1 }
 0x116   : > { %v1112_v35 = vadd.f32 %v1111_v27, %v1049_v25  ;;  %v684_v36 = vadd.f32 %v1662_v41, %v683_v32  ;;  %v977_v37 = vadd.f32 %v976_v26, %v679_v13  ;;  %v1394_v38 = vpop.f32.mrb[10].mxu0  ;;  %v1726_v39 = vadd.f32 %v1662_v41, %v811_v34  ;;  %v1426_v40 = vpop.f32.mrb[10].mxu1 }
 0x117   : > { %916 = vst [vmem:[%s1566_s28 + $0x50] sm:$0xff] %v692_v31  ;;  %v695_v42 = vadd.f32 %v1394_v38, %v1662_v41  ;;  %v686_v43 = vpop.f32.mrb[11].mxu0  ;;  %948 = vst [vmem:[%s1566_s28 + $0x150] sm:$0xff] %v1722_v33  ;;  %v1733_v44 = vadd.f32 %v1426_v40, %v1662_v41  ;;  %v814_v45 = vpop.f32.mrb[11].mxu1  ;;  %v1053_v58 = vmul.f32 %v692_v31, %v692_v31 }
 0x118   : > { %914 = vst [vmem:[%s1566_s28 + $0x40] sm:$0xff] %v684_v36  ;;  %v978_v47 = vadd.f32 %v977_v37, %v684_v36  ;;  %v1051_v48 = vmul.f32 %v684_v36, %v684_v36  ;;  %v1113_v49 = vadd.f32 %v1112_v35, %v1050_v30  ;;  %v687_v51 = vadd.f32 %v1662_v41, %v686_v43 }
 0x119   : > { %946 = vst [vmem:[%s1566_s28 + $0x140] sm:$0xff] %v1726_v39  ;;  %917 = vst [vmem:[%s1566_s28 + $0x58] sm:$0xff] %v695_v42  ;;  %v1743_v52 = vadd.f32 %v1662_v41, %v814_v45  ;;  %v1054_v63 = vmul.f32 %v695_v42, %v695_v42 }
 0x11a   : > { %949 = vst [vmem:[%s1566_s28 + $0x158] sm:$0xff] %v1733_v44  ;;  %v1114_v53 = vadd.f32 %v1113_v49, %v1051_v48  ;;  %915 = vst [vmem:[%s1566_s28 + $0x48] sm:$0xff] %v687_v51  ;;  %v979_v55 = vadd.f32 %v978_v47, %v687_v51  ;;  %v1052_v56 = vmul.f32 %v687_v51, %v687_v51 }
 0x11b   : > { %947 = vst [vmem:[%s1566_s28 + $0x148] sm:$0xff] %v1743_v52 }
 0x11c   : > { %v980_v59 = vadd.f32 %v979_v55, %v692_v31  ;;  %v1115_v60 = vadd.f32 %v1114_v53, %v1052_v56  ;;  %v1397_v61 = vpop.f32.mrb[12].mxu0  ;;  %v1429_v62 = vpop.f32.mrb[12].mxu1 }
 0x11d   : > { %v708_v0 = vadd.f32 %v1397_v61, %v1662_v41  ;;  %v699_v1 = vpop.f32.mrb[13].mxu0  ;;  %v1750_v2 = vadd.f32 %v1429_v62, %v1662_v41  ;;  %v827_v3 = vpop.f32.mrb[13].mxu1 }
 0x11e   : > { %v1116_v4 = vadd.f32 %v1115_v60, %v1053_v58  ;;  %v700_v6 = vadd.f32 %v1662_v41, %v699_v1  ;;  %v981_v7 = vadd.f32 %v980_v59, %v695_v42  ;;  %v1398_v8 = vpop.f32.mrb[14].mxu0  ;;  %v1754_v9 = vadd.f32 %v1662_v41, %v827_v3  ;;  %v1430_v10 = vpop.f32.mrb[14].mxu1 }
 0x11f   : > { %920 = vst [vmem:[%s1566_s28 + $0x70] sm:$0xff] %v708_v0  ;;  %v711_v12 = vadd.f32 %v1398_v8, %v1662_v41  ;;  %v702_v13 = vpop.f32.mrb[15].mxu0  ;;  %952 = vst [vmem:[%s1566_s28 + $0x170] sm:$0xff] %v1750_v2  ;;  %v1761_v14 = vadd.f32 %v1430_v10, %v1662_v41  ;;  %v830_v16 = vpop.f32.mrb[15].mxu1  ;;  %v1057_v26 = vmul.f32 %v708_v0, %v708_v0 }
 0x120   : > { %918 = vst [vmem:[%s1566_s28 + $0x60] sm:$0xff] %v700_v6  ;;  %v982_v17 = vadd.f32 %v981_v7, %v700_v6  ;;  %v1055_v18 = vmul.f32 %v700_v6, %v700_v6  ;;  %v1117_v19 = vadd.f32 %v1116_v4, %v1054_v63  ;;  %v703_v20 = vadd.f32 %v1662_v41, %v702_v13 }
 0x121   : > { %950 = vst [vmem:[%s1566_s28 + $0x160] sm:$0xff] %v1754_v9  ;;  %921 = vst [vmem:[%s1566_s28 + $0x78] sm:$0xff] %v711_v12  ;;  %v1771_v22 = vadd.f32 %v1662_v41, %v830_v16  ;;  %v1058_v31 = vmul.f32 %v711_v12, %v711_v12 }
 0x122   : > { %953 = vst [vmem:[%s1566_s28 + $0x178] sm:$0xff] %v1761_v14  ;;  %v1118_v23 = vadd.f32 %v1117_v19, %v1055_v18  ;;  %919 = vst [vmem:[%s1566_s28 + $0x68] sm:$0xff] %v703_v20  ;;  %v983_v24 = vadd.f32 %v982_v17, %v703_v20  ;;  %v1056_v25 = vmul.f32 %v703_v20, %v703_v20 }
 0x123   : > { %951 = vst [vmem:[%s1566_s28 + $0x168] sm:$0xff] %v1771_v22 }
 0x124   : > { %v984_v27 = vadd.f32 %v983_v24, %v708_v0  ;;  %v1119_v28 = vadd.f32 %v1118_v23, %v1056_v25  ;;  %v1401_v29 = vpop.f32.mrb[16].mxu0  ;;  %v1433_v30 = vpop.f32.mrb[16].mxu1 }
 0x125   : > { %v724_v32 = vadd.f32 %v1401_v29, %v1662_v41  ;;  %v715_v34 = vpop.f32.mrb[17].mxu0  ;;  %v1778_v35 = vadd.f32 %v1433_v30, %v1662_v41  ;;  %v843_v36 = vpop.f32.mrb[17].mxu1 }
 0x126   : > { %v1120_v37 = vadd.f32 %v1119_v28, %v1057_v26  ;;  %v716_v38 = vadd.f32 %v1662_v41, %v715_v34  ;;  %v985_v40 = vadd.f32 %v984_v27, %v711_v12  ;;  %v1402_v42 = vpop.f32.mrb[18].mxu0  ;;  %v1782_v43 = vadd.f32 %v1662_v41, %v843_v36  ;;  %v1434_v45 = vpop.f32.mrb[18].mxu1 }
 0x127   : > { %924 = vst [vmem:[%s1566_s28 + $0x90] sm:$0xff] %v724_v32  ;;  %v727_v47 = vadd.f32 %v1402_v42, %v1662_v41  ;;  %v718_v48 = vpop.f32.mrb[19].mxu0  ;;  %956 = vst [vmem:[%s1566_s28 + $0x190] sm:$0xff] %v1778_v35  ;;  %v1789_v49 = vadd.f32 %v1434_v45, %v1662_v41  ;;  %v846_v51 = vpop.f32.mrb[19].mxu1  ;;  %v1061_v63 = vmul.f32 %v724_v32, %v724_v32 }
 0x128   : > { %922 = vst [vmem:[%s1566_s28 + $0x80] sm:$0xff] %v716_v38  ;;  %v986_v53 = vadd.f32 %v985_v40, %v716_v38  ;;  %v1059_v55 = vmul.f32 %v716_v38, %v716_v38  ;;  %v1121_v56 = vadd.f32 %v1120_v37, %v1058_v31  ;;  %v719_v58 = vadd.f32 %v1662_v41, %v718_v48 }
 0x129   : > { %954 = vst [vmem:[%s1566_s28 + $0x180] sm:$0xff] %v1782_v43  ;;  %925 = vst [vmem:[%s1566_s28 + $0x98] sm:$0xff] %v727_v47  ;;  %v1799_v59 = vadd.f32 %v1662_v41, %v846_v51  ;;  %v1062_v6 = vmul.f32 %v727_v47, %v727_v47 }
 0x12a   : > { %957 = vst [vmem:[%s1566_s28 + $0x198] sm:$0xff] %v1789_v49  ;;  %v1122_v60 = vadd.f32 %v1121_v56, %v1059_v55  ;;  %923 = vst [vmem:[%s1566_s28 + $0x88] sm:$0xff] %v719_v58  ;;  %v987_v61 = vadd.f32 %v986_v53, %v719_v58  ;;  %v1060_v62 = vmul.f32 %v719_v58, %v719_v58 }
 0x12b   : > { %955 = vst [vmem:[%s1566_s28 + $0x188] sm:$0xff] %v1799_v59 }
 0x12c   : > { %v988_v0 = vadd.f32 %v987_v61, %v724_v32  ;;  %v1123_v1 = vadd.f32 %v1122_v60, %v1060_v62  ;;  %v1405_v3 = vpop.f32.mrb[20].mxu0  ;;  %v1437_v4 = vpop.f32.mrb[20].mxu1 }
 0x12d   : > { %v740_v7 = vadd.f32 %v1405_v3, %v1662_v41  ;;  %v731_v8 = vpop.f32.mrb[21].mxu0  ;;  %v1806_v10 = vadd.f32 %v1437_v4, %v1662_v41  ;;  %v859_v12 = vpop.f32.mrb[21].mxu1 }
 0x12e   : > { %v1124_v13 = vadd.f32 %v1123_v1, %v1061_v63  ;;  %v732_v16 = vadd.f32 %v1662_v41, %v731_v8  ;;  %v989_v17 = vadd.f32 %v988_v0, %v727_v47  ;;  %v1406_v18 = vpop.f32.mrb[22].mxu0  ;;  %v1810_v19 = vadd.f32 %v1662_v41, %v859_v12  ;;  %v1438_v20 = vpop.f32.mrb[22].mxu1 }
 0x12f   : > { %928 = vst [vmem:[%s1566_s28 + $0xb0] sm:$0xff] %v740_v7  ;;  %v743_v23 = vadd.f32 %v1406_v18, %v1662_v41  ;;  %v734_v24 = vpop.f32.mrb[23].mxu0  ;;  %960 = vst [vmem:[%s1566_s28 + $0x1b0] sm:$0xff] %v1806_v10  ;;  %v1817_v25 = vadd.f32 %v1438_v20, %v1662_v41  ;;  %v862_v26 = vpop.f32.mrb[23].mxu1  ;;  %v1065_v37 = vmul.f32 %v740_v7, %v740_v7 }
 0x130   : > { %926 = vst [vmem:[%s1566_s28 + $0xa0] sm:$0xff] %v732_v16  ;;  %v990_v27 = vadd.f32 %v989_v17, %v732_v16  ;;  %v1063_v28 = vmul.f32 %v732_v16, %v732_v16  ;;  %v1125_v29 = vadd.f32 %v1124_v13, %v1062_v6  ;;  %v735_v30 = vadd.f32 %v1662_v41, %v734_v24 }
 0x131   : > { %958 = vst [vmem:[%s1566_s28 + $0x1a0] sm:$0xff] %v1810_v19  ;;  %929 = vst [vmem:[%s1566_s28 + $0xb8] sm:$0xff] %v743_v23  ;;  %v1827_v31 = vadd.f32 %v1662_v41, %v862_v26  ;;  %v1066_v47 = vmul.f32 %v743_v23, %v743_v23 }
 0x132   : > { %961 = vst [vmem:[%s1566_s28 + $0x1b8] sm:$0xff] %v1817_v25  ;;  %v1126_v32 = vadd.f32 %v1125_v29, %v1063_v28  ;;  %927 = vst [vmem:[%s1566_s28 + $0xa8] sm:$0xff] %v735_v30  ;;  %v991_v34 = vadd.f32 %v990_v27, %v735_v30  ;;  %v1064_v36 = vmul.f32 %v735_v30, %v735_v30 }
 0x133   : > { %959 = vst [vmem:[%s1566_s28 + $0x1a8] sm:$0xff] %v1827_v31 }
 0x134   : > { %v992_v38 = vadd.f32 %v991_v34, %v740_v7  ;;  %v1127_v40 = vadd.f32 %v1126_v32, %v1064_v36  ;;  %v1409_v42 = vpop.f32.mrb[24].mxu0  ;;  %v1441_v45 = vpop.f32.mrb[24].mxu1 }
 0x135   : > { %v756_v48 = vadd.f32 %v1409_v42, %v1662_v41  ;;  %v747_v51 = vpop.f32.mrb[25].mxu0  ;;  %v1834_v53 = vadd.f32 %v1441_v45, %v1662_v41  ;;  %v875_v55 = vpop.f32.mrb[25].mxu1 }
 0x136   : > { %v1128_v56 = vadd.f32 %v1127_v40, %v1065_v37  ;;  %v748_v58 = vadd.f32 %v1662_v41, %v747_v51  ;;  %v993_v60 = vadd.f32 %v992_v38, %v743_v23  ;;  %v1410_v61 = vpop.f32.mrb[26].mxu0  ;;  %v1838_v62 = vadd.f32 %v1662_v41, %v875_v55  ;;  %v1442_v63 = vpop.f32.mrb[26].mxu1 }
 0x137   : > { %932 = vst [vmem:[%s1566_s28 + $0xd0] sm:$0xff] %v756_v48  ;;  %v759_v0 = vadd.f32 %v1410_v61, %v1662_v41  ;;  %v750_v1 = vpop.f32.mrb[27].mxu0  ;;  %964 = vst [vmem:[%s1566_s28 + $0x1d0] sm:$0xff] %v1834_v53  ;;  %v1845_v3 = vadd.f32 %v1442_v63, %v1662_v41  ;;  %v878_v4 = vpop.f32.mrb[27].mxu1  ;;  %v1069_v20 = vmul.f32 %v756_v48, %v756_v48 }
 0x138   : > { %930 = vst [vmem:[%s1566_s28 + $0xc0] sm:$0xff] %v748_v58  ;;  %v994_v6 = vadd.f32 %v993_v60, %v748_v58  ;;  %v1067_v7 = vmul.f32 %v748_v58, %v748_v58  ;;  %v1129_v8 = vadd.f32 %v1128_v56, %v1066_v47  ;;  %v751_v12 = vadd.f32 %v1662_v41, %v750_v1 }
 0x139   : > { %962 = vst [vmem:[%s1566_s28 + $0x1c0] sm:$0xff] %v1838_v62  ;;  %933 = vst [vmem:[%s1566_s28 + $0xd8] sm:$0xff] %v759_v0  ;;  %v1855_v13 = vadd.f32 %v1662_v41, %v878_v4  ;;  %v1070_v28 = vmul.f32 %v759_v0, %v759_v0 }
 0x13a   : > { %965 = vst [vmem:[%s1566_s28 + $0x1d8] sm:$0xff] %v1845_v3  ;;  %v1130_v16 = vadd.f32 %v1129_v8, %v1067_v7  ;;  %931 = vst [vmem:[%s1566_s28 + $0xc8] sm:$0xff] %v751_v12  ;;  %v995_v17 = vadd.f32 %v994_v6, %v751_v12  ;;  %v1068_v18 = vmul.f32 %v751_v12, %v751_v12 }
 0x13b   : > { %963 = vst [vmem:[%s1566_s28 + $0x1c8] sm:$0xff] %v1855_v13 }
 0x13c   : > { %v996_v23 = vadd.f32 %v995_v17, %v756_v48  ;;  %v1131_v24 = vadd.f32 %v1130_v16, %v1068_v18  ;;  %v1413_v26 = vpop.f32.mrb[28].mxu0  ;;  %v1445_v27 = vpop.f32.mrb[28].mxu1  ;;  %v1075_v18 = vmul.f32 %v1670_v50, %v1670_v50 }
 0x13d   : > { %v772_v29 = vadd.f32 %v1413_v26, %v1662_v41  ;;  %v763_v30 = vpop.f32.mrb[29].mxu0  ;;  %v1862_v32 = vadd.f32 %v1445_v27, %v1662_v41  ;;  %v891_v34 = vpop.f32.mrb[29].mxu1  ;;  %v1076_v26 = vmul.f32 %v1684_v57, %v1684_v57  ;;  %v1077_v27 = vmul.f32 %v1666_v46, %v1666_v46 }
 0x13e   : > { %v1132_v36 = vadd.f32 %v1131_v24, %v1069_v20  ;;  %v764_v37 = vadd.f32 %v1662_v41, %v763_v30  ;;  %v997_v38 = vadd.f32 %v996_v23, %v759_v0  ;;  %v1414_v40 = vpop.f32.mrb[30].mxu0  ;;  %v1866_v42 = vadd.f32 %v1662_v41, %v891_v34  ;;  %v1446_v45 = vpop.f32.mrb[30].mxu1 }
 0x13f   : > { %936 = vst [vmem:[%s1566_s28 + $0xf0] sm:$0xff] %v772_v29  ;;  %v775_v47 = vadd.f32 %v1414_v40, %v1662_v41  ;;  %v766_v48 = vpop.f32.mrb[31].mxu0  ;;  %968 = vst [vmem:[%s1566_s28 + $0x1f0] sm:$0xff] %v1862_v32  ;;  %v1873_v51 = vadd.f32 %v1446_v45, %v1662_v41  ;;  %v894_v55 = vpop.f32.mrb[31].mxu1  ;;  %v1073_v6 = vmul.f32 %v772_v29, %v772_v29 }
 0x140   : > { %934 = vst [vmem:[%s1566_s28 + $0xe0] sm:$0xff] %v764_v37  ;;  %v998_v56 = vadd.f32 %v997_v38, %v764_v37  ;;  %v1071_v58 = vmul.f32 %v764_v37, %v764_v37  ;;  %v1133_v60 = vadd.f32 %v1132_v36, %v1070_v28  ;;  %v767_v61 = vadd.f32 %v1662_v41, %v766_v48 }
 0x141   : > { %966 = vst [vmem:[%s1566_s28 + $0x1e0] sm:$0xff] %v1866_v42  ;;  %937 = vst [vmem:[%s1566_s28 + $0xf8] sm:$0xff] %v775_v47  ;;  %v1883_v63 = vadd.f32 %v1662_v41, %v894_v55  ;;  %v1074_v12 = vmul.f32 %v775_v47, %v775_v47  ;;  %v1078_v30 = vmul.f32 %v1677_v54, %v1677_v54 }
 0x142   : > { %969 = vst [vmem:[%s1566_s28 + $0x1f8] sm:$0xff] %v1873_v51  ;;  %v1134_v0 = vadd.f32 %v1133_v60, %v1071_v58  ;;  %935 = vst [vmem:[%s1566_s28 + $0xe8] sm:$0xff] %v767_v61  ;;  %v999_v1 = vadd.f32 %v998_v56, %v767_v61  ;;  %v1072_v4 = vmul.f32 %v767_v61, %v767_v61 }
 0x143   : > { %967 = vst [vmem:[%s1566_s28 + $0x1e8] sm:$0xff] %v1883_v63  ;;  %v1080_v45 = vmul.f32 %v1715_v21, %v1715_v21 }
 0x144   : > { %v1000_v7 = vadd.f32 %v999_v1, %v772_v29  ;;  %v1135_v8 = vadd.f32 %v1134_v0, %v1072_v4  ;;  %v1084_v0 = vmul.f32 %v1743_v52, %v1743_v52 }
 0x146   : > { %v1136_v16 = vadd.f32 %v1135_v8, %v1073_v6  ;;  %v1001_v17 = vadd.f32 %v1000_v7, %v775_v47 }
 0x148   : > { %v1002_v20 = vadd.f32 %v1001_v17, %v1670_v50  ;;  %v1137_v23 = vadd.f32 %v1136_v16, %v1074_v12  ;;  %v1079_v50 = vmul.f32 %v1698_v11, %v1698_v11  ;;  %v1088_v17 = vmul.f32 %v1771_v22, %v1771_v22 }
 0x14a   : > { %v1138_v41 = vadd.f32 %v1137_v23, %v1075_v18  ;;  %v1003_v24 = vadd.f32 %v1002_v20, %v1684_v57 }
 0x14c   : > { %v1004_v28 = vadd.f32 %v1003_v24, %v1666_v46  ;;  %v1139_v29 = vadd.f32 %v1138_v41, %v1076_v26  ;;  %v1081_v46 = vmul.f32 %v1694_v5, %v1694_v5 }
 0x14e   : > { %v1140_v34 = vadd.f32 %v1139_v29, %v1077_v27  ;;  %v1005_v36 = vadd.f32 %v1004_v28, %v1677_v54  ;;  %v1082_v54 = vmul.f32 %v1705_v15, %v1705_v15  ;;  %v1092_v28 = vmul.f32 %v1799_v59, %v1799_v59 }
 0x150   : > { %v1006_v37 = vadd.f32 %v1005_v36, %v1698_v11  ;;  %v1141_v38 = vadd.f32 %v1140_v34, %v1078_v30  ;;  %v1083_v11 = vmul.f32 %v1726_v39, %v1726_v39 }
 0x152   : > { %v1142_v40 = vadd.f32 %v1141_v38, %v1079_v50  ;;  %v1007_v57 = vadd.f32 %v1006_v37, %v1715_v21 }
 0x154   : > { %v1008_v47 = vadd.f32 %v1007_v57, %v1694_v5  ;;  %v1143_v48 = vadd.f32 %v1142_v40, %v1080_v45  ;;  %v1085_v5 = vmul.f32 %v1722_v33, %v1722_v33  ;;  %v1096_v40 = vmul.f32 %v1827_v31, %v1827_v31 }
 0x156   : > { %v1144_v55 = vadd.f32 %v1143_v48, %v1081_v46  ;;  %v1009_v56 = vadd.f32 %v1008_v47, %v1705_v15  ;;  %v1086_v15 = vmul.f32 %v1733_v44, %v1733_v44 }
 0x158   : > { %v1010_v58 = vadd.f32 %v1009_v56, %v1726_v39  ;;  %v1145_v60 = vadd.f32 %v1144_v55, %v1082_v54  ;;  %v1087_v39 = vmul.f32 %v1754_v9, %v1754_v9  ;;  %v1100_v56 = vmul.f32 %v1855_v13, %v1855_v13 }
 0x15a   : > { %v1146_v61 = vadd.f32 %v1145_v60, %v1083_v11  ;;  %v1011_v21 = vadd.f32 %v1010_v58, %v1743_v52 }
 0x15c   : > { %v1012_v1 = vadd.f32 %v1011_v21, %v1722_v33  ;;  %v1147_v4 = vadd.f32 %v1146_v61, %v1084_v0  ;;  %v1089_v33 = vmul.f32 %v1750_v2, %v1750_v2 }
 0x15e   : > { %v1148_v6 = vadd.f32 %v1147_v4, %v1085_v5  ;;  %v1013_v7 = vadd.f32 %v1012_v1, %v1733_v44  ;;  %v1090_v44 = vmul.f32 %v1761_v14, %v1761_v14  ;;  %v1104_v1 = vmul.f32 %v1883_v63, %v1883_v63 }
 0x160   : > { %v1014_v8 = vadd.f32 %v1013_v7, %v1754_v9  ;;  %v1149_v12 = vadd.f32 %v1148_v6, %v1086_v15  ;;  %v1091_v9 = vmul.f32 %v1782_v43, %v1782_v43 }
 0x162   : > { %v1150_v16 = vadd.f32 %v1149_v12, %v1087_v39  ;;  %v1015_v52 = vadd.f32 %v1014_v8, %v1771_v22 }
 0x164   : > { %v1016_v18 = vadd.f32 %v1015_v52, %v1750_v2  ;;  %v1151_v20 = vadd.f32 %v1150_v16, %v1088_v17  ;;  %v1093_v2 = vmul.f32 %v1778_v35, %v1778_v35 }
 0x166   : > { %v1152_v23 = vadd.f32 %v1151_v20, %v1089_v33  ;;  %v1017_v41 = vadd.f32 %v1016_v18, %v1761_v14  ;;  %v1094_v14 = vmul.f32 %v1789_v49, %v1789_v49 }
 0x168   : > { %v1018_v24 = vadd.f32 %v1017_v41, %v1782_v43  ;;  %v1153_v26 = vadd.f32 %v1152_v23, %v1090_v44  ;;  %v1095_v43 = vmul.f32 %v1810_v19, %v1810_v19 }
 0x16a   : > { %v1154_v27 = vadd.f32 %v1153_v26, %v1091_v9  ;;  %v1019_v22 = vadd.f32 %v1018_v24, %v1799_v59 }
 0x16c   : > { %v1020_v29 = vadd.f32 %v1019_v22, %v1778_v35  ;;  %v1155_v30 = vadd.f32 %v1154_v27, %v1092_v28  ;;  %v1097_v35 = vmul.f32 %v1806_v10, %v1806_v10 }
 0x16e   : > { %v1156_v34 = vadd.f32 %v1155_v30, %v1093_v2  ;;  %v1021_v36 = vadd.f32 %v1020_v29, %v1789_v49  ;;  %v1098_v49 = vmul.f32 %v1817_v25, %v1817_v25 }
 0x170   : > { %v1022_v50 = vadd.f32 %v1021_v36, %v1810_v19  ;;  %v1157_v37 = vadd.f32 %v1156_v34, %v1094_v14  ;;  %v1099_v19 = vmul.f32 %v1838_v62, %v1838_v62 }
 0x172   : > { %v1158_v38 = vadd.f32 %v1157_v37, %v1095_v43  ;;  %v1023_v59 = vadd.f32 %v1022_v50, %v1827_v31 }
 0x174   : > { %v1024_v57 = vadd.f32 %v1023_v59, %v1806_v10  ;;  %v1159_v45 = vadd.f32 %v1158_v38, %v1096_v40  ;;  %v1101_v10 = vmul.f32 %v1834_v53, %v1834_v53 }
 0x176   : > { %v1160_v46 = vadd.f32 %v1159_v45, %v1097_v35  ;;  %v1025_v47 = vadd.f32 %v1024_v57, %v1817_v25  ;;  %v1102_v25 = vmul.f32 %v1845_v3, %v1845_v3 }
 0x178   : > { %v1026_v48 = vadd.f32 %v1025_v47, %v1838_v62  ;;  %v1161_v54 = vadd.f32 %v1160_v46, %v1098_v49  ;;  %v1103_v62 = vmul.f32 %v1866_v42, %v1866_v42 }
 0x17a   : > { %v1162_v55 = vadd.f32 %v1161_v54, %v1099_v19  ;;  %v1027_v31 = vadd.f32 %v1026_v48, %v1855_v13 }
 0x17c   : > { %v1028_v11 = vadd.f32 %v1027_v31, %v1834_v53  ;;  %v1163_v58 = vadd.f32 %v1162_v55, %v1100_v56  ;;  %v1105_v53 = vmul.f32 %v1862_v32, %v1862_v32 }
 0x17e   : > { %v1164_v60 = vadd.f32 %v1163_v58, %v1101_v10  ;;  %v1029_v61 = vadd.f32 %v1028_v11, %v1845_v3  ;;  %v1106_v3 = vmul.f32 %v1873_v51, %v1873_v51 }
 0x180   : > { %v1030_v21 = vadd.f32 %v1029_v61, %v1866_v42  ;;  %v1165_v0 = vadd.f32 %v1164_v60, %v1102_v25 }
 0x182   : > { %v1166_v5 = vadd.f32 %v1165_v0, %v1103_v62  ;;  %v1031_v13 = vadd.f32 %v1030_v21, %v1883_v63 }
 0x184   : > { %v1032_v4 = vadd.f32 %v1031_v13, %v1862_v32  ;;  %v1167_v15 = vadd.f32 %v1166_v5, %v1104_v1  ;;  %v970_v32 = vld [vmem:[%s2003_s4] sm:$0x1] }
 0x186   : > { %v1033_v6 = vadd.f32 %v1032_v4, %v1873_v51  ;;  %v1168_v7 = vadd.f32 %v1167_v15, %v1105_v53  ;;  %v1042_v51 = vld [vmem:[%s2004_s5] sm:$0x1] }
 0x188   : > { %v1034_v42 = vrot.slane %v1033_v6, 4  ;;  %v1169_v39 = vadd.f32 %v1168_v7, %v1106_v3 }
 0x18a   : > { %v1035_v8 = vadd.f32 %v1034_v42, %v1033_v6  ;;  %v1170_v12 = vrot.slane %v1169_v39, 4 }
 0x18c   : > { %v1036_v16 = vrot.slane %v1035_v8, 2  ;;  %v1171_v52 = vadd.f32 %v1170_v12, %v1169_v39 }
 0x18e   : > { %v1037_v17 = vadd.f32 %v1036_v16, %v1035_v8  ;;  %v1172_v63 = vrot.slane %v1171_v52, 2 }
 0x190   : > { %v1038_v33 = vrot.slane %v1037_v17, 1  ;;  %v1173_v18 = vadd.f32 %v1172_v63, %v1171_v52 }
 0x192   : > { %v1039_v20 = vadd.f32 %v1038_v33, %v1037_v17  ;;  %v1174_v44 = vrot.slane %v1173_v18, 1 }
 0x194   : > { %v1040_v23 = vadd.f32 %v1039_v20, %v970_v32  ;;  %v1175_v41 = vadd.f32 %v1174_v44, %v1173_v18 }
 0x196   : > { %1041 = vst [vmem:[%s2003_s4] sm:$0x1] %v1040_v23  ;;  %v1176_v9 = vadd.f32 %v1175_v41, %v1042_v51 }
 0x198   : > { %1177 = vst [vmem:[%s2004_s5] sm:$0x1] %v1176_v9 }
 0x199 PF: > { %s16_s18 = sadd.s32 1, %s1517_s18  }
 0x19a   : > { %p13_p5 = scmp.ge.s32.totalorder %s16_s18, 4  }
 0x19c   :  { %15 = sbr.rel (!%p13_p5) target bundleno = 1 (0x1), region = 82 }

// kernel: unet_down_block_forward.9
= control target key start
LH: loop header
LB: loop body
LE: loop exit
PB: predicated region body
PF: predicated region fallthrough
CT: control target
= control target key end

     0   :  { %s1342_s18 = smov 0   ;;  %s2477_s0 = inlined_call_operand.vmem [shape: f32[1024,128], index: 0, kind: input, shape index: {}]   ;;  %s2478_s1 = inlined_call_operand.vmem [shape: f32[1,128], index: 1, kind: input, shape index: {}]   ;;  %s2479_s2 = inlined_call_operand.vmem [shape: f32[1,128], index: 2, kind: input, shape index: {}]   ;;  %s2480_s3 = inlined_call_operand.vmem [shape: f32[1,128], index: 3, kind: input, shape index: {}]   ;;  %s2481_s4 = inlined_call_operand.vmem [shape: f32[1,128], index: 4, kind: input, shape index: {}]   ;;  %s2482_s5 = inlined_call_operand.vmem [shape: f32[1024,128], index: 5, kind: output, shape index: {}]  }
   0x1 LB: > { %s1087_s19 = sadd.s32 4294967295, %s1310_s18   ;;  %p1091_p0 = scmp.ge.s32.totalorder %s1310_s18, 1  ;;  %s1310_s18 = sphi %s1342_s18, %s15_s18  }
   0x2   : > { %p188_p1 = scmp.lt.s32.totalorder %s1310_s18, 3 }
   0x4   : > { %p189_p2 = pnand %p1091_p0, %p188_p1 }
   0x6   : > { %192 = sbr.rel (%p189_p2) target bundleno = 208 (0xd0), region = 40 }
   0xd   : > { %s1092_s20 = sshll.u32 %s1087_s19, 6  ;;  %v228_v0 = vld [vmem:[%s2478_s1] sm:$0x1]  ;;  %v302_v2 = vlaneseq }
   0xe   : > { %v230_v1 = vld [vmem:[%s2479_s2] sm:$0x1]  ;;  %p217_p3 = scmp.lt.s32.totalorder %s1092_s20, 127  ;;  %v229_v3 = vmul.f32 0.0009765625, %v228_v0 }
   0xf   : > { %v231_v4 = vmul.f32 0.0009765625, %v230_v1  ;;  %v1356_v5 = vshrl.u32 %v302_v2, 7 }
  0x10   : > { %s2532_s20 = smov (!%p217_p3, %s1092_s20), 127  ;;  %v232_v6 = vmul.f32 %v229_v3, %v229_v3 }
  0x11   : > { %s1093_s25 = sshll.u32 %s2532_s20, 3  ;;  %v304_v8 = vsub.s32 0, %v1356_v5 }
  0x12   : > { %v233_v7 = vsub.f32 %v231_v4, %v232_v6  ;;  %s1366_s28 = scalar_lea.vmem %s2477_s0, %s1093_s25  ;;  %s1743_s10 = scalar_lea.vmem %s2482_s5, %s1093_s25 }
  0x13   : > { %v1370_v11 = vld [vmem:[%s1366_s28] sm:$0xff]  ;;  %v1373_v12 = vld [vmem:[%s1366_s28 + $0x8] sm:$0xff]  ;;  %v1376_v13 = vld [vmem:[%s1366_s28 + $0x10] sm:$0xff]  ;;  %v1383_v15 = vrot.slane %v229_v3, %v304_v8 }
  0x14   : > { %v234_v9 = vmax.f32 %v233_v7, 0.0  ;;  %v1379_v14 = vld [vmem:[%s1366_s28 + $0x18] sm:$0xff]  ;;  %v1386_v16 = vld [vmem:[%s1366_s28 + $0x20] sm:$0xff]  ;;  %v1389_v17 = vld [vmem:[%s1366_s28 + $0x28] sm:$0xff] }
  0x15   : > { %v1392_v18 = vld [vmem:[%s1366_s28 + $0x30] sm:$0xff]  ;;  %v1395_v19 = vld [vmem:[%s1366_s28 + $0x38] sm:$0xff]  ;;  %v1398_v20 = vld [vmem:[%s1366_s28 + $0x40] sm:$0xff]  ;;  %v307_v30 = vsub.f32 %v1370_v11, %v1383_v15  ;;  %v308_v31 = vsub.f32 %v1373_v12, %v1383_v15  ;;  %v309_v32 = vsub.f32 %v1376_v13, %v1383_v15  ;;  %v310_v33 = vsub.f32 %v1379_v14, %v1383_v15 }
  0x16   : > { %v235_v10 = vadd.f32 1e-05, %v234_v9  ;;  %v1401_v21 = vld [vmem:[%s1366_s28 + $0x48] sm:$0xff]  ;;  %v1404_v22 = vld [vmem:[%s1366_s28 + $0x50] sm:$0xff]  ;;  %v1407_v23 = vld [vmem:[%s1366_s28 + $0x58] sm:$0xff]  ;;  %v311_v37 = vsub.f32 %v1386_v16, %v1383_v15  ;;  %v312_v38 = vsub.f32 %v1389_v17, %v1383_v15  ;;  %v313_v39 = vsub.f32 %v1392_v18, %v1383_v15 }
  0x17   : > { %v1410_v24 = vld [vmem:[%s1366_s28 + $0x60] sm:$0xff]  ;;  %v1413_v25 = vld [vmem:[%s1366_s28 + $0x68] sm:$0xff]  ;;  %v1416_v26 = vld [vmem:[%s1366_s28 + $0x70] sm:$0xff]  ;;  %v314_v40 = vsub.f32 %v1395_v19, %v1383_v15 }
  0x18   : > { %1172 = vrsqrt.f32 %v235_v10  ;;  %v1419_v27 = vld [vmem:[%s1366_s28 + $0x78] sm:$0xff]  ;;  %v1422_v28 = vld [vmem:[%s1366_s28 + $0x80] sm:$0xff]  ;;  %v1425_v29 = vld [vmem:[%s1366_s28 + $0x88] sm:$0xff] }
  0x19   : > { %v1436_v34 = vld [vmem:[%s1366_s28 + $0x90] sm:$0xff]  ;;  %v1439_v35 = vld [vmem:[%s1366_s28 + $0x98] sm:$0xff]  ;;  %v1442_v36 = vld [vmem:[%s1366_s28 + $0xa0] sm:$0xff] }
  0x1a   : > { %v1453_v41 = vld [vmem:[%s1366_s28 + $0xa8] sm:$0xff]  ;;  %v1456_v42 = vld [vmem:[%s1366_s28 + $0xb0] sm:$0xff]  ;;  %v1459_v43 = vld [vmem:[%s1366_s28 + $0xb8] sm:$0xff] }
  0x1b   : > { %v1470_v48 = vld [vmem:[%s1366_s28 + $0xc0] sm:$0xff]  ;;  %v1473_v49 = vld [vmem:[%s1366_s28 + $0xc8] sm:$0xff]  ;;  %v1476_v50 = vld [vmem:[%s1366_s28 + $0xd0] sm:$0xff] }
  0x1c   : > { %v1487_v55 = vld [vmem:[%s1366_s28 + $0xd8] sm:$0xff]  ;;  %v1490_v56 = vld [vmem:[%s1366_s28 + $0xe0] sm:$0xff]  ;;  %v1493_v57 = vld [vmem:[%s1366_s28 + $0xe8] sm:$0xff] }
  0x1d   : > { %v1504_v62 = vld [vmem:[%s1366_s28 + $0xf0] sm:$0xff]  ;;  %v1507_v63 = vld [vmem:[%s1366_s28 + $0xf8] sm:$0xff]  ;;  %v1510_v0 = vld [vmem:[%s1366_s28 + $0x100] sm:$0xff] }
  0x1e   : > { %v1521_v6 = vld [vmem:[%s1366_s28 + $0x108] sm:$0xff]  ;;  %v1524_v7 = vld [vmem:[%s1366_s28 + $0x110] sm:$0xff]  ;;  %v1527_v9 = vld [vmem:[%s1366_s28 + $0x118] sm:$0xff] }
  0x1f   : > { %v1538_v19 = vld [vmem:[%s1366_s28 + $0x120] sm:$0xff]  ;;  %v1541_v4 = vld [vmem:[%s1366_s28 + $0x128] sm:$0xff]  ;;  %v1544_v3 = vld [vmem:[%s1366_s28 + $0x130] sm:$0xff] }
  0x20   : > { %v1567_v16 = vld [vmem:[%s2480_s3] ss:$0 sm:$0xff]  ;;  %v1607_v60 = vld [vmem:[%s1366_s28 + $0x138] sm:$0xff]  ;;  %v1665_v53 = vld [vmem:[%s1366_s28 + $0x168] sm:$0xff] }
  0x21   : > { %v1596_v11 = vld [vmem:[%s2481_s4] ss:$0 sm:$0xff]  ;;  %2487 = vst [vmem:[#allocation3_spill] sm:$0xff] %v1665_v53  ;;  %v1671_v47 = vld [vmem:[%s1366_s28 + $0x170] sm:$0xff] }
  0x22   : > { %v1173_v2 = vpop.eup %1172  ;;  %v1610_v61 = vld [vmem:[%s1366_s28 + $0x140] sm:$0xff]  ;;  %2488 = vst [vmem:[#allocation4_spill] sm:$0xff] %v1671_v47 }
  0x23   : > { %v1556_v18 = vrot.slane %v1173_v2, %v304_v8 }
  0x25   : > { %v377_v1 = vmul.f32 %v1556_v18, %v307_v30  ;;  %v378_v17 = vmul.f32 %v1556_v18, %v308_v31  ;;  %v379_v5 = vmul.f32 %v1556_v18, %v309_v32  ;;  %v380_v2 = vmul.f32 %v1556_v18, %v310_v33 }
  0x26   : > { %v381_v12 = vmul.f32 %v1556_v18, %v311_v37  ;;  %v382_v30 = vmul.f32 %v1556_v18, %v312_v38  ;;  %v383_v31 = vmul.f32 %v1556_v18, %v313_v39  ;;  %v384_v13 = vmul.f32 %v1556_v18, %v314_v40 }
  0x27   : > { %v448_v32 = vmul.f32 %v1567_v16, %v377_v1  ;;  %v449_v14 = vmul.f32 %v1567_v16, %v378_v17  ;;  %v450_v33 = vmul.f32 %v1567_v16, %v379_v5  ;;  %v451_v8 = vmul.f32 %v1567_v16, %v380_v2  ;;  %v1617_v1 = vld [vmem:[%s1366_s28 + $0x148] sm:$0xff] }
  0x28   : > { %v452_v37 = vmul.f32 %v1567_v16, %v381_v12  ;;  %v453_v38 = vmul.f32 %v1567_v16, %v382_v30  ;;  %v454_v39 = vmul.f32 %v1567_v16, %v383_v31  ;;  %v455_v40 = vmul.f32 %v1567_v16, %v384_v13  ;;  %v1632_v30 = vld [vmem:[%s1366_s28 + $0x150] sm:$0xff] }
  0x29   : > { %v1620_v17 = vadd.f32 %v1596_v11, %v448_v32  ;;  %v1623_v5 = vadd.f32 %v1596_v11, %v449_v14  ;;  %v1626_v2 = vadd.f32 %v1596_v11, %v450_v33  ;;  %v1629_v12 = vadd.f32 %v1596_v11, %v451_v8  ;;  %2486 = vst [vmem:[#allocation2_spill] sm:$0xff] %v1632_v30  ;;  %v1645_v33 = vld [vmem:[%s1366_s28 + $0x158] sm:$0xff] }
  0x2a   : > { %v1635_v31 = vadd.f32 %v1596_v11, %v452_v37  ;;  %v1638_v13 = vadd.f32 %v1596_v11, %v453_v38  ;;  %v1650_v59 = vadd.f32 %v1596_v11, %v454_v39  ;;  %v1655_v38 = vld [vmem:[%s1366_s28 + $0x160] sm:$0xff]  ;;  %v1660_v14 = vadd.f32 %v1596_v11, %v455_v40 }
  0x2b   : > { %v647_v8 = vmin.f32 %v1620_v17, 0.0  ;;  %v648_v10 = vmin.f32 %v1623_v5, 0.0  ;;  %v649_v32 = vmin.f32 %v1626_v2, 0.0  ;;  %v650_v58 = vmin.f32 %v1629_v12, 0.0 }
  0x2c   : > { %v651_v51 = vmin.f32 %v1635_v31, 0.0  ;;  %v652_v44 = vmin.f32 %v1638_v13, 0.0  ;;  %v653_v30 = vmin.f32 %v1650_v59, 0.0  ;;  %v654_v37 = vmin.f32 %v1660_v14, 0.0 }
  0x2d   : > { %v711_v52 = vmul.f32 1.442695, %v647_v8  ;;  %v713_v39 = vmul.f32 1.442695, %v648_v10  ;;  %v715_v46 = vmul.f32 1.442695, %v649_v32  ;;  %v2490_v40 = vsub.f32 %v1401_v21, %v1383_v15 }
  0x2e   : > { %v717_v45 = vmul.f32 1.442695, %v650_v58  ;;  %v719_v54 = vmul.f32 1.442695, %v651_v51  ;;  %v721_v8 = vmul.f32 1.442695, %v652_v44  ;;  %v2491_v32 = vsub.f32 %v1404_v22, %v1383_v15 }
  0x2f   : > { %1174 = vpow2.f32 %v711_v52  ;;  %vm583_vm0 = vcmp.gt.f32.partialorder %v1620_v17, 0.0  ;;  %v723_v58 = vmul.f32 1.442695, %v653_v30  ;;  %v2489_v52 = vsub.f32 %v1398_v20, %v1383_v15 }
  0x30   : > { %1176 = vpow2.f32 %v713_v39  ;;  %v386_v39 = vmul.f32 %v1556_v18, %v2490_v40  ;;  %vm584_vm1 = vcmp.gt.f32.partialorder %v1623_v5, 0.0  ;;  %v725_v44 = vmul.f32 1.442695, %v654_v37 }
  0x31   : > { %1178 = vpow2.f32 %v715_v46  ;;  %v385_v51 = vmul.f32 %v1556_v18, %v2489_v52  ;;  %v387_v46 = vmul.f32 %v1556_v18, %v2491_v32  ;;  %v2492_v30 = vsub.f32 %v1407_v23, %v1383_v15 }
  0x32   : > { %1180 = vpow2.f32 %v717_v45  ;;  %v457_v21 = vmul.f32 %v1567_v16, %v386_v39  ;;  %v2493_v40 = vsub.f32 %v1410_v24, %v1383_v15  ;;  %v2494_v23 = vsub.f32 %v1413_v25, %v1383_v15 }
  0x33   : > { %v388_v20 = vmul.f32 %v1556_v18, %v2492_v30  ;;  %1182 = vpow2.f32 %v719_v54  ;;  %v456_v52 = vmul.f32 %v1567_v16, %v385_v51  ;;  %v458_v22 = vmul.f32 %v1567_v16, %v387_v46 }
  0x34   : > { %v389_v45 = vmul.f32 %v1556_v18, %v2493_v40  ;;  %1184 = vpow2.f32 %v721_v8  ;;  %v390_v32 = vmul.f32 %v1556_v18, %v2494_v23  ;;  %v1716_v51 = vadd.f32 %v1596_v11, %v457_v21 }
  0x35   : > { %v459_v37 = vmul.f32 %v1567_v16, %v388_v20  ;;  %1186 = vpow2.f32 %v723_v58  ;;  %v1713_v54 = vadd.f32 %v1596_v11, %v456_v52  ;;  %v1720_v8 = vadd.f32 %v1596_v11, %v458_v22 }
  0x36   : > { %v460_v24 = vmul.f32 %v1567_v16, %v389_v45  ;;  %1188 = vpow2.f32 %v725_v44  ;;  %v461_v25 = vmul.f32 %v1567_v16, %v390_v32  ;;  %vm585_vm2 = vcmp.gt.f32.partialorder %v1626_v2, 0.0 }
  0x37   : > { %v1723_v39 = vadd.f32 %v1596_v11, %v459_v37  ;;  %vm586_vm3 = vcmp.gt.f32.partialorder %v1629_v12, 0.0  ;;  %v655_v58 = vmin.f32 %v1713_v54, 0.0  ;;  %v656_v46 = vmin.f32 %v1716_v51, 0.0 }
  0x38   : > { %vm587_vm4 = vcmp.gt.f32.partialorder %v1635_v31, 0.0  ;;  %vm588_vm5 = vcmp.gt.f32.partialorder %v1638_v13, 0.0  ;;  %v657_v44 = vmin.f32 %v1720_v8, 0.0  ;;  %vm589_vm6 = vcmp.gt.f32.partialorder %v1650_v59, 0.0 }
  0x39   : > { %v658_v30 = vmin.f32 %v1723_v39, 0.0  ;;  %v1175_v20 = vpop.eup %1174  ;;  %v727_v52 = vmul.f32 1.442695, %v655_v58  ;;  %v729_v21 = vmul.f32 1.442695, %v656_v46  ;;  %v1736_v40 = vadd.f32 %v1596_v11, %v460_v24 }
  0x3a   : > { %v1177_v45 = vpop.eup %1176  ;;  %v1098_v22 = vadd.f32 -1.0, %v1175_v20  ;;  %v731_v37 = vmul.f32 1.442695, %v657_v44  ;;  %v1746_v32 = vadd.f32 %v1596_v11, %v461_v25  ;;  %v2495_v46 = vsub.f32 %v1416_v26, %v1383_v15 }
  0x3b   : > { %v733_v23 = vmul.f32 1.442695, %v658_v30  ;;  %v1179_v10 = vpop.eup %1178  ;;  %v1099_v58 = vadd.f32 -1.0, %v1177_v45  ;;  %1190 = vpow2.f32 %v727_v52  ;;  %v659_v24 = vmin.f32 %v1736_v40, 0.0 }
  0x3c   : > { %v391_v47 = vmul.f32 %v1556_v18, %v2495_v46  ;;  %v1181_v53 = vpop.eup %1180  ;;  %v903_v44 = vsel %vm583_vm0, %v1620_v17, %v1098_v22  ;;  %v1100_v30 = vadd.f32 -1.0, %v1179_v10  ;;  %vm590_vm7 = vcmp.gt.f32.partialorder %v1660_v14, 0.0 }
  0x3d   : > { %1192 = vpow2.f32 %v729_v21  ;;  %v1183_v25 = vpop.eup %1182  ;;  %967 = vst [vmem:[%s1743_s10] sm:$0xff] %v903_v44  ;;  %v904_v20 = vsel %vm584_vm1, %v1623_v5, %v1099_v58  ;;  %v1101_v52 = vadd.f32 -1.0, %v1181_v53  ;;  %vm591_vm8 = vcmp.gt.f32.partialorder %v1713_v54, 0.0 }
  0x3e   : > { %1194 = vpow2.f32 %v731_v37  ;;  %v735_v26 = vmul.f32 1.442695, %v659_v24  ;;  %v1185_v45 = vpop.eup %1184  ;;  %968 = vst [vmem:[%s1743_s10 + $0x8] sm:$0xff] %v904_v20  ;;  %v905_v17 = vsel %vm585_vm2, %v1626_v2, %v1100_v30  ;;  %v1102_v10 = vadd.f32 -1.0, %v1183_v25 }
  0x3f   : > { %vm592_vm9 = vcmp.gt.f32.partialorder %v1716_v51, 0.0  ;;  %1196 = vpow2.f32 %v733_v23  ;;  %v660_v21 = vmin.f32 %v1746_v32, 0.0  ;;  %v1187_v5 = vpop.eup %1186  ;;  %969 = vst [vmem:[%s1743_s10 + $0x10] sm:$0xff] %v905_v17  ;;  %v906_v53 = vsel %vm586_vm3, %v1629_v12, %v1101_v52 }
  0x40   : > { %v1103_v22 = vadd.f32 -1.0, %v1185_v45  ;;  %1198 = vpow2.f32 %v735_v26  ;;  %v462_v37 = vmul.f32 %v1567_v16, %v391_v47  ;;  %v1189_v58 = vpop.eup %1188  ;;  %970 = vst [vmem:[%s1743_s10 + $0x18] sm:$0xff] %v906_v53  ;;  %v907_v2 = vsel %vm587_vm4, %v1635_v31, %v1102_v10 }
  0x41   : > { %v1104_v23 = vadd.f32 -1.0, %v1187_v5  ;;  %v737_v24 = vmul.f32 1.442695, %v660_v21  ;;  %v2496_v46 = vsub.f32 %v1419_v27, %v1383_v15  ;;  %971 = vst [vmem:[%s1743_s10 + $0x20] sm:$0xff] %v907_v2  ;;  %v1105_v12 = vadd.f32 -1.0, %v1189_v58 }
  0x42   : > { %v908_v47 = vsel %vm588_vm5, %v1638_v13, %v1103_v22  ;;  %v1786_v30 = vadd.f32 %v1596_v11, %v462_v37  ;;  %v2497_v31 = vsub.f32 %v1422_v28, %v1383_v15  ;;  %v2498_v13 = vsub.f32 %v1425_v29, %v1383_v15 }
  0x43   : > { %v392_v44 = vmul.f32 %v1556_v18, %v2496_v46  ;;  %972 = vst [vmem:[%s1743_s10 + $0x28] sm:$0xff] %v908_v47  ;;  %v909_v27 = vsel %vm589_vm6, %v1650_v59, %v1104_v23  ;;  %1200 = vpow2.f32 %v737_v24  ;;  %v910_v28 = vsel %vm590_vm7, %v1660_v14, %v1105_v12 }
  0x44   : > { %v393_v25 = vmul.f32 %v1556_v18, %v2497_v31  ;;  %v394_v52 = vmul.f32 %v1556_v18, %v2498_v13  ;;  %973 = vst [vmem:[%s1743_s10 + $0x30] sm:$0xff] %v909_v27  ;;  %vm593_vm10 = vcmp.gt.f32.partialorder %v1720_v8, 0.0  ;;  %v661_v26 = vmin.f32 %v1786_v30, 0.0  ;;  %974 = vst [vmem:[%s1743_s10 + $0x38] sm:$0xff] %v910_v28 }
  0x45   : > { %v463_v20 = vmul.f32 %v1567_v16, %v392_v44  ;;  %vm594_vm11 = vcmp.gt.f32.partialorder %v1723_v39, 0.0  ;;  %vm595_vm12 = vcmp.gt.f32.partialorder %v1736_v40, 0.0  ;;  %v1191_v17 = vpop.eup %1190  ;;  %vm596_vm13 = vcmp.gt.f32.partialorder %v1746_v32, 0.0 }
  0x46   : > { %v464_v45 = vmul.f32 %v1567_v16, %v393_v25  ;;  %v465_v59 = vmul.f32 %v1567_v16, %v394_v52  ;;  %v739_v14 = vmul.f32 1.442695, %v661_v26  ;;  %v2499_v21 = vsub.f32 %v1436_v34, %v1383_v15 }
  0x47   : > { %v1812_v29 = vadd.f32 %v1596_v11, %v463_v20  ;;  %v1193_v53 = vpop.eup %1192  ;;  %v1106_v22 = vadd.f32 -1.0, %v1191_v17  ;;  %v2500_v2 = vsub.f32 %v1439_v35, %v1383_v15  ;;  %v2501_v44 = vsub.f32 %v1442_v36, %v1383_v15 }
  0x48   : > { %v1817_v10 = vadd.f32 %v1596_v11, %v464_v45  ;;  %v395_v5 = vmul.f32 %v1556_v18, %v2499_v21  ;;  %v1825_v58 = vadd.f32 %v1596_v11, %v465_v59  ;;  %v1195_v24 = vpop.eup %1194  ;;  %v1107_v46 = vadd.f32 -1.0, %v1193_v53 }
  0x49   : > { %v662_v37 = vmin.f32 %v1812_v29, 0.0  ;;  %v396_v23 = vmul.f32 %v1556_v18, %v2500_v2  ;;  %1202 = vpow2.f32 %v739_v14  ;;  %v397_v47 = vmul.f32 %v1556_v18, %v2501_v44  ;;  %v1197_v12 = vpop.eup %1196  ;;  %v1859_v14 = vld [vmem:[%s1366_s28 + $0x178] sm:$0xff] }
  0x4a   : > { %v663_v34 = vmin.f32 %v1817_v10, 0.0  ;;  %v911_v31 = vsel %vm591_vm8, %v1713_v54, %v1106_v22  ;;  %v1108_v35 = vadd.f32 -1.0, %v1195_v24  ;;  %v2502_v27 = vsub.f32 %v1453_v41, %v1383_v15  ;;  %v1199_v13 = vpop.eup %1198 }
  0x4b   : > { %v741_v25 = vmul.f32 1.442695, %v662_v37  ;;  %975 = vst [vmem:[%s1743_s10 + $0x40] sm:$0xff] %v911_v31  ;;  %v912_v36 = vsel %vm592_vm9, %v1716_v51, %v1107_v46  ;;  %v1109_v52 = vadd.f32 -1.0, %v1197_v12  ;;  %v664_v26 = vmin.f32 %v1825_v58, 0.0 }
  0x4c   : > { %v398_v20 = vmul.f32 %v1556_v18, %v2502_v27  ;;  %v743_v28 = vmul.f32 1.442695, %v663_v34  ;;  %976 = vst [vmem:[%s1743_s10 + $0x48] sm:$0xff] %v912_v36  ;;  %v913_v54 = vsel %vm593_vm10, %v1720_v8, %v1108_v35  ;;  %v1110_v41 = vadd.f32 -1.0, %v1199_v13 }
  0x4d   : > { %1204 = vpow2.f32 %v741_v25  ;;  %v466_v45 = vmul.f32 %v1567_v16, %v395_v5  ;;  %977 = vst [vmem:[%s1743_s10 + $0x50] sm:$0xff] %v913_v54  ;;  %v914_v51 = vsel %vm594_vm11, %v1723_v39, %v1109_v52  ;;  %v745_v59 = vmul.f32 1.442695, %v664_v26  ;;  %v1201_v21 = vpop.eup %1200 }
  0x4e   : > { %1206 = vpow2.f32 %v743_v28  ;;  %v467_v17 = vmul.f32 %v1567_v16, %v396_v23  ;;  %978 = vst [vmem:[%s1743_s10 + $0x58] sm:$0xff] %v914_v51  ;;  %v915_v8 = vsel %vm595_vm12, %v1736_v40, %v1110_v41  ;;  %v468_v5 = vmul.f32 %v1567_v16, %v397_v47 }
  0x4f   : > { %v1866_v53 = vadd.f32 %v1596_v11, %v466_v45  ;;  %v469_v39 = vmul.f32 %v1567_v16, %v398_v20  ;;  %979 = vst [vmem:[%s1743_s10 + $0x60] sm:$0xff] %v915_v8  ;;  %v1111_v22 = vadd.f32 -1.0, %v1201_v21  ;;  %1208 = vpow2.f32 %v745_v59 }
  0x50   : > { %v1872_v37 = vadd.f32 %v1596_v11, %v467_v17  ;;  %v2503_v2 = vsub.f32 %v1456_v42, %v1383_v15  ;;  %v1880_v24 = vadd.f32 %v1596_v11, %v468_v5  ;;  %v354_v34 = vsub.f32 %v1859_v14, %v1383_v15  ;;  %v286_v14 = vld [vmem:[%s1366_s28 + $0x188] sm:$0xff] }
  0x51   : > { %v665_v40 = vmin.f32 %v1866_v53, 0.0  ;;  %v1883_v46 = vadd.f32 %v1596_v11, %v469_v39  ;;  %v916_v44 = vsel %vm596_vm13, %v1746_v32, %v1111_v22  ;;  %vm597_vm14 = vcmp.gt.f32.partialorder %v1786_v30, 0.0 }
  0x52   : > { %v399_v23 = vmul.f32 %v1556_v18, %v2503_v2  ;;  %v666_v42 = vmin.f32 %v1872_v37, 0.0  ;;  %980 = vst [vmem:[%s1743_s10 + $0x68] sm:$0xff] %v916_v44  ;;  %vm598_vm15 = vcmp.gt.f32.partialorder %v1812_v29, 0.0  ;;  %vm599_vm0 = vcmp.gt.f32.partialorder %v1817_v10, 0.0 }
  0x53   : > { %v747_v12 = vmul.f32 1.442695, %v665_v40  ;;  %v667_v31 = vmin.f32 %v1880_v24, 0.0  ;;  %v1203_v35 = vpop.eup %1202  ;;  %v668_v27 = vmin.f32 %v1883_v46, 0.0  ;;  %v2504_v20 = vsub.f32 %v1459_v43, %v1383_v15 }
  0x54   : > { %v470_v47 = vmul.f32 %v1567_v16, %v399_v23  ;;  %v749_v25 = vmul.f32 1.442695, %v666_v42  ;;  %v1112_v36 = vadd.f32 -1.0, %v1203_v35  ;;  %v2505_v28 = vsub.f32 %v1470_v48, %v1383_v15 }
  0x55   : > { %v400_v13 = vmul.f32 %v1556_v18, %v2504_v20  ;;  %1210 = vpow2.f32 %v747_v12  ;;  %v751_v52 = vmul.f32 1.442695, %v667_v31  ;;  %vm600_vm1 = vcmp.gt.f32.partialorder %v1825_v58, 0.0 }
  0x56   : > { %v1899_v32 = vadd.f32 %v1596_v11, %v470_v47  ;;  %v401_v26 = vmul.f32 %v1556_v18, %v2505_v28  ;;  %1212 = vpow2.f32 %v749_v25  ;;  %v753_v54 = vmul.f32 1.442695, %v668_v27 }
  0x57   : > { %v1205_v45 = vpop.eup %1204  ;;  %v917_v43 = vsel %vm597_vm14, %v1786_v30, %v1112_v36  ;;  %vm601_vm2 = vcmp.gt.f32.partialorder %v1866_v53, 0.0  ;;  %1214 = vpow2.f32 %v751_v52  ;;  %v471_v51 = vmul.f32 %v1567_v16, %v400_v13 }
  0x58   : > { %v669_v41 = vmin.f32 %v1899_v32, 0.0  ;;  %v472_v48 = vmul.f32 %v1567_v16, %v401_v26  ;;  %v1207_v59 = vpop.eup %1206  ;;  %981 = vst [vmem:[%s1743_s10 + $0x70] sm:$0xff] %v917_v43  ;;  %v1113_v17 = vadd.f32 -1.0, %v1205_v45  ;;  %1216 = vpow2.f32 %v753_v54 }
  0x59   : > { %v2506_v8 = vsub.f32 %v1473_v49, %v1383_v15  ;;  %v1114_v30 = vadd.f32 -1.0, %v1207_v59  ;;  %v1923_v39 = vadd.f32 %v1596_v11, %v471_v51  ;;  %v2507_v2 = vsub.f32 %v1476_v50, %v1383_v15  ;;  %v1209_v40 = vpop.eup %1208 }
  0x5a   : > { %v755_v21 = vmul.f32 1.442695, %v669_v41  ;;  %v1926_v22 = vadd.f32 %v1596_v11, %v472_v48  ;;  %v918_v49 = vsel %vm598_vm15, %v1812_v29, %v1113_v17  ;;  %v2508_v42 = vsub.f32 %v1487_v55, %v1383_v15 }
  0x5b   : > { %v402_v5 = vmul.f32 %v1556_v18, %v2506_v8  ;;  %v403_v23 = vmul.f32 %v1556_v18, %v2507_v2  ;;  %982 = vst [vmem:[%s1743_s10 + $0x78] sm:$0xff] %v918_v49  ;;  %v919_v50 = vsel %vm599_vm0, %v1817_v10, %v1114_v30  ;;  %v1115_v12 = vadd.f32 -1.0, %v1209_v40 }
  0x5c   : > { %1218 = vpow2.f32 %v755_v21  ;;  %v404_v47 = vmul.f32 %v1556_v18, %v2508_v42  ;;  %vm602_vm3 = vcmp.gt.f32.partialorder %v1872_v37, 0.0  ;;  %v670_v31 = vmin.f32 %v1923_v39, 0.0  ;;  %983 = vst [vmem:[%s1743_s10 + $0x80] sm:$0xff] %v919_v50 }
  0x5d   : > { %v473_v44 = vmul.f32 %v1567_v16, %v402_v5  ;;  %vm603_vm4 = vcmp.gt.f32.partialorder %v1880_v24, 0.0  ;;  %v671_v29 = vmin.f32 %v1926_v22, 0.0  ;;  %v474_v35 = vmul.f32 %v1567_v16, %v403_v23 }
  0x5e   : > { %v920_v25 = vsel %vm600_vm1, %v1825_v58, %v1115_v12  ;;  %v757_v10 = vmul.f32 1.442695, %v670_v31  ;;  %v475_v27 = vmul.f32 %v1567_v16, %v404_v47  ;;  %v2509_v20 = vsub.f32 %v1490_v56, %v1383_v15 }
  0x5f   : > { %v1950_v55 = vadd.f32 %v1596_v11, %v473_v44  ;;  %984 = vst [vmem:[%s1743_s10 + $0x88] sm:$0xff] %v920_v25  ;;  %vm604_vm5 = vcmp.gt.f32.partialorder %v1883_v46, 0.0  ;;  %v759_v36 = vmul.f32 1.442695, %v671_v29  ;;  %v1965_v28 = vadd.f32 %v1596_v11, %v474_v35  ;;  %v1211_v26 = vpop.eup %1210 }
  0x60   : > { %v405_v13 = vmul.f32 %v1556_v18, %v2509_v20  ;;  %vm605_vm6 = vcmp.gt.f32.partialorder %v1899_v32, 0.0  ;;  %1220 = vpow2.f32 %v757_v10  ;;  %v1969_v58 = vadd.f32 %v1596_v11, %v475_v27  ;;  %v1213_v54 = vpop.eup %1212 }
  0x61   : > { %v672_v52 = vmin.f32 %v1950_v55, 0.0  ;;  %v1116_v41 = vadd.f32 -1.0, %v1211_v26  ;;  %1222 = vpow2.f32 %v759_v36  ;;  %v2510_v43 = vsub.f32 %v1493_v57, %v1383_v15  ;;  %v1215_v48 = vpop.eup %1214 }
  0x62   : > { %v476_v56 = vmul.f32 %v1567_v16, %v405_v13  ;;  %v1117_v59 = vadd.f32 -1.0, %v1213_v54  ;;  %vm606_vm7 = vcmp.gt.f32.partialorder %v1923_v39, 0.0  ;;  %v673_v17 = vmin.f32 %v1965_v28, 0.0  ;;  %v1217_v8 = vpop.eup %1216 }
  0x63   : > { %v761_v45 = vmul.f32 1.442695, %v672_v52  ;;  %v406_v51 = vmul.f32 %v1556_v18, %v2510_v43  ;;  %v674_v21 = vmin.f32 %v1969_v58, 0.0  ;;  %v921_v5 = vsel %vm601_vm2, %v1866_v53, %v1116_v41 }
  0x64   : > { %v1118_v30 = vadd.f32 -1.0, %v1215_v48  ;;  %v1983_v57 = vadd.f32 %v1596_v11, %v476_v56  ;;  %985 = vst [vmem:[%s1743_s10 + $0x90] sm:$0xff] %v921_v5  ;;  %v922_v2 = vsel %vm602_vm3, %v1872_v37, %v1117_v59  ;;  %v1119_v23 = vadd.f32 -1.0, %v1217_v8 }
  0x65   : > { %1224 = vpow2.f32 %v761_v45  ;;  %v763_v40 = vmul.f32 1.442695, %v673_v17  ;;  %v765_v49 = vmul.f32 1.442695, %v674_v21  ;;  %986 = vst [vmem:[%s1743_s10 + $0x98] sm:$0xff] %v922_v2  ;;  %vm607_vm8 = vcmp.gt.f32.partialorder %v1926_v22, 0.0 }
  0x66   : > { %v1219_v44 = vpop.eup %1218  ;;  %v923_v53 = vsel %vm603_vm4, %v1880_v24, %v1118_v30  ;;  %v675_v42 = vmin.f32 %v1983_v57, 0.0  ;;  %v477_v47 = vmul.f32 %v1567_v16, %v406_v51  ;;  %v924_v37 = vsel %vm604_vm5, %v1883_v46, %v1119_v23 }
  0x67   : > { %987 = vst [vmem:[%s1743_s10 + $0xa0] sm:$0xff] %v923_v53  ;;  %v1120_v50 = vadd.f32 -1.0, %v1219_v44  ;;  %1226 = vpow2.f32 %v763_v40  ;;  %v2511_v12 = vsub.f32 %v1504_v62, %v1383_v15  ;;  %988 = vst [vmem:[%s1743_s10 + $0xa8] sm:$0xff] %v924_v37  ;;  %v2512_v35 = vsub.f32 %v1507_v63, %v1383_v15 }
  0x68   : > { %1228 = vpow2.f32 %v765_v49  ;;  %v767_v24 = vmul.f32 1.442695, %v675_v42  ;;  %v2006_v29 = vadd.f32 %v1596_v11, %v477_v47  ;;  %v2513_v62 = vsub.f32 %v1510_v0, %v1383_v15 }
  0x69   : > { %v407_v31 = vmul.f32 %v1556_v18, %v2511_v12  ;;  %v408_v25 = vmul.f32 %v1556_v18, %v2512_v35  ;;  %v925_v46 = vsel %vm605_vm6, %v1899_v32, %v1120_v50  ;;  %v2514_v20 = vsub.f32 %v1521_v6, %v1383_v15 }
  0x6a   : > { %v409_v27 = vmul.f32 %v1556_v18, %v2513_v62  ;;  %989 = vst [vmem:[%s1743_s10 + $0xb0] sm:$0xff] %v925_v46  ;;  %vm608_vm9 = vcmp.gt.f32.partialorder %v1950_v55, 0.0  ;;  %1230 = vpow2.f32 %v767_v24  ;;  %v676_v63 = vmin.f32 %v2006_v29, 0.0  ;;  %v1221_v36 = vpop.eup %1220 }
  0x6b   : > { %v478_v10 = vmul.f32 %v1567_v16, %v407_v31  ;;  %v410_v13 = vmul.f32 %v1556_v18, %v2514_v20  ;;  %v479_v32 = vmul.f32 %v1567_v16, %v408_v25  ;;  %vm609_vm10 = vcmp.gt.f32.partialorder %v1965_v28, 0.0  ;;  %v1223_v26 = vpop.eup %1222 }
  0x6c   : > { %v480_v52 = vmul.f32 %v1567_v16, %v409_v27  ;;  %v1121_v56 = vadd.f32 -1.0, %v1221_v36  ;;  %v769_v54 = vmul.f32 1.442695, %v676_v63  ;;  %v2515_v45 = vsub.f32 %v1524_v7, %v1383_v15 }
  0x6d   : > { %v2030_v0 = vadd.f32 %v1596_v11, %v478_v10  ;;  %v481_v6 = vmul.f32 %v1567_v16, %v410_v13  ;;  %v2035_v41 = vadd.f32 %v1596_v11, %v479_v32  ;;  %v1122_v51 = vadd.f32 -1.0, %v1223_v26 }
  0x6e   : > { %v411_v43 = vmul.f32 %v1556_v18, %v2515_v45  ;;  %v2043_v59 = vadd.f32 %v1596_v11, %v480_v52  ;;  %v2516_v17 = vsub.f32 %v1527_v9, %v1383_v15  ;;  %v926_v5 = vsel %vm606_vm7, %v1923_v39, %v1121_v56 }
  0x6f   : > { %v677_v48 = vmin.f32 %v2030_v0, 0.0  ;;  %v1225_v8 = vpop.eup %1224  ;;  %vm610_vm11 = vcmp.gt.f32.partialorder %v1969_v58, 0.0  ;;  %1232 = vpow2.f32 %v769_v54  ;;  %v678_v7 = vmin.f32 %v2035_v41, 0.0  ;;  %990 = vst [vmem:[%s1743_s10 + $0xb8] sm:$0xff] %v926_v5 }
  0x70   : > { %v412_v21 = vmul.f32 %v1556_v18, %v2516_v17  ;;  %v927_v30 = vsel %vm607_vm8, %v1926_v22, %v1122_v51  ;;  %v1123_v2 = vadd.f32 -1.0, %v1225_v8  ;;  %vm611_vm12 = vcmp.gt.f32.partialorder %v1983_v57, 0.0 }
  0x71   : > { %v771_v9 = vmul.f32 1.442695, %v677_v48  ;;  %991 = vst [vmem:[%s1743_s10 + $0xc0] sm:$0xff] %v927_v30  ;;  %v773_v23 = vmul.f32 1.442695, %v678_v7  ;;  %v679_v40 = vmin.f32 %v2043_v59, 0.0  ;;  %v2062_v39 = vadd.f32 %v1596_v11, %v481_v6  ;;  %v1227_v44 = vpop.eup %1226 }
  0x72   : > { %v482_v49 = vmul.f32 %v1567_v16, %v411_v43  ;;  %v928_v53 = vsel %vm608_vm9, %v1950_v55, %v1123_v2  ;;  %v483_v22 = vmul.f32 %v1567_v16, %v412_v21  ;;  %v2517_v42 = vsub.f32 %v1538_v19, %v1383_v15  ;;  %v1229_v37 = vpop.eup %1228 }
  0x73   : > { %1234 = vpow2.f32 %v771_v9  ;;  %992 = vst [vmem:[%s1743_s10 + $0xc8] sm:$0xff] %v928_v53  ;;  %v1124_v50 = vadd.f32 -1.0, %v1227_v44  ;;  %vm612_vm13 = vcmp.gt.f32.partialorder %v2006_v29, 0.0  ;;  %v775_v12 = vmul.f32 1.442695, %v679_v40 }
  0x74   : > { %v413_v47 = vmul.f32 %v1556_v18, %v2517_v42  ;;  %1236 = vpow2.f32 %v773_v23  ;;  %v1125_v31 = vadd.f32 -1.0, %v1229_v37  ;;  %v680_v55 = vmin.f32 %v2062_v39, 0.0  ;;  %v1231_v19 = vpop.eup %1230 }
  0x75   : > { %v2077_v24 = vadd.f32 %v1596_v11, %v482_v49  ;;  %v2080_v35 = vadd.f32 %v1596_v11, %v483_v22  ;;  %v929_v25 = vsel %vm609_vm10, %v1965_v28, %v1124_v50  ;;  %1238 = vpow2.f32 %v775_v12 }
  0x76   : > { %v484_v46 = vmul.f32 %v1567_v16, %v413_v47  ;;  %v2518_v10 = vsub.f32 %v1541_v4, %v1383_v15  ;;  %993 = vst [vmem:[%s1743_s10 + $0xd0] sm:$0xff] %v929_v25  ;;  %v930_v27 = vsel %vm610_vm11, %v1969_v58, %v1125_v31  ;;  %v1126_v20 = vadd.f32 -1.0, %v1231_v19  ;;  %v2523_v25 = vld [vmem:[#allocation2_spill] sm:$0xff] }
  0x77   : > { %vm613_vm14 = vcmp.gt.f32.partialorder %v2030_v0, 0.0  ;;  %v777_v13 = vmul.f32 1.442695, %v680_v55  ;;  %994 = vst [vmem:[%s1743_s10 + $0xd8] sm:$0xff] %v930_v27  ;;  %vm614_vm15 = vcmp.gt.f32.partialorder %v2035_v41, 0.0  ;;  %v681_v28 = vmin.f32 %v2077_v24, 0.0 }
  0x78   : > { %v414_v62 = vmul.f32 %v1556_v18, %v2518_v10  ;;  %v682_v63 = vmin.f32 %v2080_v35, 0.0  ;;  %v2100_v4 = vadd.f32 %v1596_v11, %v484_v46  ;;  %v931_v32 = vsel %vm611_vm12, %v1983_v57, %v1126_v20 }
  0x79   : > { %1240 = vpow2.f32 %v777_v13  ;;  %v2519_v36 = vsub.f32 %v1544_v3, %v1383_v15  ;;  %v1233_v6 = vpop.eup %1232  ;;  %995 = vst [vmem:[%s1743_s10 + $0xe0] sm:$0xff] %v931_v32  ;;  %vm615_vm0 = vcmp.gt.f32.partialorder %v2043_v59, 0.0  ;;  %v779_v26 = vmul.f32 1.442695, %v681_v28 }
  0x7a   : > { %v485_v58 = vmul.f32 %v1567_v16, %v414_v62  ;;  %v781_v56 = vmul.f32 1.442695, %v682_v63  ;;  %v683_v54 = vmin.f32 %v2100_v4, 0.0  ;;  %v1127_v45 = vadd.f32 -1.0, %v1233_v6  ;;  %v2527_v6 = vld [vmem:[#allocation3_spill] sm:$0xff] }
  0x7b   : > { %v415_v52 = vmul.f32 %v1556_v18, %v2519_v36  ;;  %v2520_v3 = vsub.f32 %v1607_v60, %v1383_v15  ;;  %1242 = vpow2.f32 %v779_v26  ;;  %v2521_v17 = vsub.f32 %v1610_v61, %v1383_v15 }
  0x7c   : > { %v2114_v57 = vadd.f32 %v1596_v11, %v485_v58  ;;  %v783_v48 = vmul.f32 1.442695, %v683_v54  ;;  %v2522_v8 = vsub.f32 %v1617_v1, %v1383_v15  ;;  %v932_v30 = vsel %vm612_vm13, %v2006_v29, %v1127_v45 }
  0x7d   : > { %v486_v43 = vmul.f32 %v1567_v16, %v415_v52  ;;  %v416_v51 = vmul.f32 %v1556_v18, %v2520_v3  ;;  %v417_v21 = vmul.f32 %v1556_v18, %v2521_v17  ;;  %v1235_v7 = vpop.eup %1234  ;;  %vm616_vm1 = vcmp.gt.f32.partialorder %v2062_v39, 0.0  ;;  %996 = vst [vmem:[%s1743_s10 + $0xe8] sm:$0xff] %v932_v30 }
  0x7e   : > { %v418_v5 = vmul.f32 %v1556_v18, %v2522_v8  ;;  %1244 = vpow2.f32 %v781_v56  ;;  %v684_v60 = vmin.f32 %v2114_v57, 0.0  ;;  %v1237_v2 = vpop.eup %1236  ;;  %v1128_v61 = vadd.f32 -1.0, %v1235_v7 }
  0x7f   : > { %1246 = vpow2.f32 %v783_v48  ;;  %v2136_v9 = vadd.f32 %v1596_v11, %v486_v43  ;;  %v487_v1 = vmul.f32 %v1567_v16, %v416_v51  ;;  %v1129_v23 = vadd.f32 -1.0, %v1237_v2  ;;  %v1239_v44 = vpop.eup %1238 }
  0x80   : > { %v785_v40 = vmul.f32 1.442695, %v684_v60  ;;  %v488_v29 = vmul.f32 %v1567_v16, %v417_v21  ;;  %v489_v49 = vmul.f32 %v1567_v16, %v418_v5  ;;  %v933_v53 = vsel %vm613_vm14, %v2030_v0, %v1128_v61 }
  0x81   : > { %vm617_vm2 = vcmp.gt.f32.partialorder %v2077_v24, 0.0  ;;  %v685_v22 = vmin.f32 %v2136_v9, 0.0  ;;  %v2147_v42 = vadd.f32 %v1596_v11, %v487_v1  ;;  %997 = vst [vmem:[%s1743_s10 + $0xf0] sm:$0xff] %v933_v53  ;;  %v934_v47 = vsel %vm614_vm15, %v2035_v41, %v1129_v23  ;;  %v285_v53 = vld [vmem:[%s1366_s28 + $0x180] sm:$0xff] }
  0x82   : > { %v1130_v37 = vadd.f32 -1.0, %v1239_v44  ;;  %1248 = vpow2.f32 %v785_v40  ;;  %v2154_v50 = vadd.f32 %v1596_v11, %v488_v29  ;;  %998 = vst [vmem:[%s1743_s10 + $0xf8] sm:$0xff] %v934_v47  ;;  %vm618_vm3 = vcmp.gt.f32.partialorder %v2080_v35, 0.0 }
  0x83   : > { %v787_v0 = vmul.f32 1.442695, %v685_v22  ;;  %v686_v12 = vmin.f32 %v2147_v42, 0.0  ;;  %v2160_v31 = vadd.f32 %v1596_v11, %v489_v49  ;;  %v1241_v55 = vpop.eup %1240  ;;  %vm619_vm4 = vcmp.gt.f32.partialorder %v2100_v4, 0.0 }
  0x84   : > { %v935_v19 = vsel %vm615_vm0, %v2043_v59, %v1130_v37  ;;  %v687_v41 = vmin.f32 %v2154_v50, 0.0  ;;  %v2524_v46 = vsub.f32 %v2523_v25, %v1383_v15  ;;  %v1131_v62 = vadd.f32 -1.0, %v1241_v55 }
  0x85   : > { %999 = vst [vmem:[%s1743_s10 + $0x100] sm:$0xff] %v935_v19  ;;  %vm620_vm5 = vcmp.gt.f32.partialorder %v2114_v57, 0.0  ;;  %1250 = vpow2.f32 %v787_v0  ;;  %v789_v27 = vmul.f32 1.442695, %v686_v12  ;;  %v688_v13 = vmin.f32 %v2160_v31, 0.0  ;;  %v1243_v32 = vpop.eup %1242 }
  0x86   : > { %v419_v10 = vmul.f32 %v1556_v18, %v2524_v46  ;;  %v791_v20 = vmul.f32 1.442695, %v687_v41  ;;  %v2525_v28 = vsub.f32 %v1645_v33, %v1383_v15  ;;  %v936_v58 = vsel %vm616_vm1, %v2062_v39, %v1131_v62 }
  0x87   : > { %1252 = vpow2.f32 %v789_v27  ;;  %v2526_v36 = vsub.f32 %v1655_v38, %v1383_v15  ;;  %v2528_v26 = vsub.f32 %v2527_v6, %v1383_v15  ;;  %1000 = vst [vmem:[%s1743_s10 + $0x108] sm:$0xff] %v936_v58  ;;  %v1132_v54 = vadd.f32 -1.0, %v1243_v32  ;;  %v289_v58 = vld [vmem:[%s1366_s28 + $0x1a0] sm:$0xff] }
  0x88   : > { %v490_v59 = vmul.f32 %v1567_v16, %v419_v10  ;;  %v420_v63 = vmul.f32 %v1556_v18, %v2525_v28  ;;  %v1245_v33 = vpop.eup %1244  ;;  %1254 = vpow2.f32 %v791_v20  ;;  %v793_v45 = vmul.f32 1.442695, %v688_v13  ;;  %v288_v28 = vld [vmem:[%s1366_s28 + $0x198] sm:$0xff] }
  0x89   : > { %v421_v52 = vmul.f32 %v1556_v18, %v2526_v36  ;;  %v422_v56 = vmul.f32 %v1556_v18, %v2528_v26  ;;  %v1247_v39 = vpop.eup %1246  ;;  %v1133_v3 = vadd.f32 -1.0, %v1245_v33  ;;  %v937_v17 = vsel %vm617_vm2, %v2077_v24, %v1132_v54 }
  0x8a   : > { %v2192_v43 = vadd.f32 %v1596_v11, %v490_v59  ;;  %v491_v38 = vmul.f32 %v1567_v16, %v420_v63  ;;  %v1134_v21 = vadd.f32 -1.0, %v1247_v39  ;;  %vm621_vm6 = vcmp.gt.f32.partialorder %v2136_v9, 0.0  ;;  %1001 = vst [vmem:[%s1743_s10 + $0x110] sm:$0xff] %v937_v17  ;;  %v287_v59 = vld [vmem:[%s1366_s28 + $0x190] sm:$0xff] }
  0x8b   : > { %v492_v51 = vmul.f32 %v1567_v16, %v421_v52  ;;  %v493_v48 = vmul.f32 %v1567_v16, %v422_v56  ;;  %1256 = vpow2.f32 %v793_v45  ;;  %v938_v8 = vsel %vm618_vm3, %v2080_v35, %v1133_v3  ;;  %v2529_v35 = vld [vmem:[#allocation4_spill] sm:$0xff]  ;;  %v2274_v56 = vld [vmem:[%s2480_s3] ss:$0 sm:$0xff] }
  0x8c   : > { %v689_v5 = vmin.f32 %v2192_v43, 0.0  ;;  %v2207_v7 = vadd.f32 %v1596_v11, %v491_v38  ;;  %v1249_v60 = vpop.eup %1248  ;;  %1002 = vst [vmem:[%s1743_s10 + $0x118] sm:$0xff] %v938_v8  ;;  %v939_v24 = vsel %vm619_vm4, %v2100_v4, %v1134_v21  ;;  %v2530_v61 = vsub.f32 %v2529_v35, %v1383_v15  ;;  %v290_v38 = vld [vmem:[%s1366_s28 + $0x1a8] sm:$0xff]  ;;  %v291_v21 = vld [vmem:[%s1366_s28 + $0x1b0] sm:$0xff] }
  0x8d   : > { %v2210_v30 = vadd.f32 %v1596_v11, %v492_v51  ;;  %v2217_v2 = vadd.f32 %v1596_v11, %v493_v48  ;;  %v424_v23 = vmul.f32 %v1556_v18, %v354_v34  ;;  %1003 = vst [vmem:[%s1743_s10 + $0x120] sm:$0xff] %v939_v24  ;;  %v1135_v40 = vadd.f32 -1.0, %v1249_v60  ;;  %v2289_v51 = vld [vmem:[%s2481_s4] ss:$0 sm:$0xff] }
  0x8e   : > { %v423_v1 = vmul.f32 %v1556_v18, %v2530_v61  ;;  %vm622_vm7 = vcmp.gt.f32.partialorder %v2147_v42, 0.0  ;;  %v795_v29 = vmul.f32 1.442695, %v689_v5  ;;  %v690_v4 = vmin.f32 %v2207_v7, 0.0 }
  0x8f   : > { %vm623_vm8 = vcmp.gt.f32.partialorder %v2154_v50, 0.0  ;;  %vm624_vm9 = vcmp.gt.f32.partialorder %v2160_v31, 0.0  ;;  %v691_v49 = vmin.f32 %v2210_v30, 0.0  ;;  %v692_v44 = vmin.f32 %v2217_v2, 0.0  ;;  %v1251_v22 = vpop.eup %1250 }
  0x90   : > { %v940_v34 = vsel %vm620_vm5, %v2114_v57, %v1135_v40  ;;  %1258 = vpow2.f32 %v795_v29  ;;  %v797_v47 = vmul.f32 1.442695, %v690_v4  ;;  %v494_v37 = vmul.f32 %v1567_v16, %v423_v1 }
  0x91   : > { %1004 = vst [vmem:[%s1743_s10 + $0x128] sm:$0xff] %v940_v34  ;;  %v1136_v0 = vadd.f32 -1.0, %v1251_v22  ;;  %v799_v12 = vmul.f32 1.442695, %v691_v49  ;;  %v801_v55 = vmul.f32 1.442695, %v692_v44  ;;  %v495_v19 = vmul.f32 %v1567_v16, %v424_v23  ;;  %v1253_v41 = vpop.eup %1252 }
  0x92   : > { %1260 = vpow2.f32 %v797_v47  ;;  %v2243_v25 = vadd.f32 %v1596_v11, %v494_v37  ;;  %v355_v57 = vsub.f32 %v285_v53, %v1383_v15  ;;  %v356_v46 = vsub.f32 %v286_v14, %v1383_v15  ;;  %v1255_v10 = vpop.eup %1254 }
  0x93   : > { %v941_v62 = vsel %vm621_vm6, %v2136_v9, %v1136_v0  ;;  %v1137_v27 = vadd.f32 -1.0, %v1253_v41  ;;  %1262 = vpow2.f32 %v799_v12  ;;  %v2251_v16 = vadd.f32 %v1596_v11, %v495_v19  ;;  %v292_v41 = vld [vmem:[%s1366_s28 + $0x1b8] sm:$0xff] }
  0x94   : > { %1005 = vst [vmem:[%s1743_s10 + $0x130] sm:$0xff] %v941_v62  ;;  %v1138_v20 = vadd.f32 -1.0, %v1255_v10  ;;  %vm625_vm10 = vcmp.gt.f32.partialorder %v2192_v43, 0.0  ;;  %1264 = vpow2.f32 %v801_v55  ;;  %v693_v13 = vmin.f32 %v2243_v25, 0.0  ;;  %v293_v10 = vld [vmem:[%s1366_s28 + $0x1c0] sm:$0xff] }
  0x95   : > { %v1257_v63 = vpop.eup %1256  ;;  %v942_v9 = vsel %vm622_vm7, %v2147_v42, %v1137_v27  ;;  %vm626_vm11 = vcmp.gt.f32.partialorder %v2207_v7, 0.0  ;;  %v694_v11 = vmin.f32 %v2251_v16, 0.0  ;;  %v425_v32 = vmul.f32 %v1556_v18, %v355_v57 }
  0x96   : > { %1006 = vst [vmem:[%s1743_s10 + $0x138] sm:$0xff] %v942_v9  ;;  %v943_v36 = vsel %vm623_vm8, %v2154_v50, %v1138_v20  ;;  %v1139_v52 = vadd.f32 -1.0, %v1257_v63  ;;  %v803_v6 = vmul.f32 1.442695, %v693_v13  ;;  %v426_v26 = vmul.f32 %v1556_v18, %v356_v46 }
  0x97   : > { %1007 = vst [vmem:[%s1743_s10 + $0x140] sm:$0xff] %v943_v36  ;;  %v805_v42 = vmul.f32 1.442695, %v694_v11  ;;  %v496_v33 = vmul.f32 %v2274_v56, %v425_v32  ;;  %v357_v54 = vsub.f32 %v287_v59, %v1383_v15  ;;  %v358_v45 = vsub.f32 %v288_v28, %v1383_v15 }
  0x98   : > { %v944_v50 = vsel %vm624_vm9, %v2160_v31, %v1139_v52  ;;  %1266 = vpow2.f32 %v803_v6  ;;  %v497_v39 = vmul.f32 %v2274_v56, %v426_v26  ;;  %v359_v3 = vsub.f32 %v289_v58, %v1383_v15  ;;  %v294_v6 = vld [vmem:[%s1366_s28 + $0x1c8] sm:$0xff]  ;;  %v295_v26 = vld [vmem:[%s1366_s28 + $0x1d0] sm:$0xff] }
  0x99   : > { %1008 = vst [vmem:[%s1743_s10 + $0x148] sm:$0xff] %v944_v50  ;;  %1268 = vpow2.f32 %v805_v42  ;;  %v2292_v48 = vadd.f32 %v2289_v51, %v496_v33  ;;  %v427_v17 = vmul.f32 %v1556_v18, %v357_v54  ;;  %v428_v31 = vmul.f32 %v1556_v18, %v358_v45 }
  0x9a   : > { %v1259_v8 = vpop.eup %1258  ;;  %vm627_vm12 = vcmp.gt.f32.partialorder %v2210_v30, 0.0  ;;  %vm628_vm13 = vcmp.gt.f32.partialorder %v2217_v2, 0.0  ;;  %v2300_v5 = vadd.f32 %v2289_v51, %v497_v39  ;;  %v429_v60 = vmul.f32 %v1556_v18, %v359_v3 }
  0x9b   : > { %v1140_v24 = vadd.f32 -1.0, %v1259_v8  ;;  %v695_v35 = vmin.f32 %v2292_v48, 0.0  ;;  %v498_v61 = vmul.f32 %v2274_v56, %v427_v17  ;;  %v360_v1 = vsub.f32 %v290_v38, %v1383_v15 }
  0x9c   : > { %v1261_v23 = vpop.eup %1260  ;;  %v696_v40 = vmin.f32 %v2300_v5, 0.0  ;;  %v499_v29 = vmul.f32 %v2274_v56, %v428_v31  ;;  %v500_v4 = vmul.f32 %v2274_v56, %v429_v60  ;;  %v361_v49 = vsub.f32 %v291_v21, %v1383_v15  ;;  %v296_v31 = vld [vmem:[%s1366_s28 + $0x1d8] sm:$0xff] }
  0x9d   : > { %v1263_v44 = vpop.eup %1262  ;;  %v945_v53 = vsel %vm625_vm10, %v2192_v43, %v1140_v24  ;;  %v1141_v14 = vadd.f32 -1.0, %v1261_v23  ;;  %v807_v22 = vmul.f32 1.442695, %v695_v35  ;;  %v2314_v34 = vadd.f32 %v2289_v51, %v498_v61 }
  0x9e   : > { %v1265_v47 = vpop.eup %1264  ;;  %1009 = vst [vmem:[%s1743_s10 + $0x150] sm:$0xff] %v945_v53  ;;  %v1142_v37 = vadd.f32 -1.0, %v1263_v44  ;;  %v809_v0 = vmul.f32 1.442695, %v696_v40  ;;  %v2318_v12 = vadd.f32 %v2289_v51, %v499_v29  ;;  %v2321_v55 = vadd.f32 %v2289_v51, %v500_v4  ;;  %v297_v53 = vld [vmem:[%s1366_s28 + $0x1e0] sm:$0xff] }
  0x9f   : > { %v946_v43 = vsel %vm626_vm11, %v2207_v7, %v1141_v14  ;;  %v1143_v19 = vadd.f32 -1.0, %v1265_v47  ;;  %1270 = vpow2.f32 %v807_v22  ;;  %vm629_vm14 = vcmp.gt.f32.partialorder %v2243_v25, 0.0 }
  0xa0   : > { %1010 = vst [vmem:[%s1743_s10 + $0x158] sm:$0xff] %v946_v43  ;;  %v947_v57 = vsel %vm627_vm12, %v2210_v30, %v1142_v37  ;;  %1272 = vpow2.f32 %v809_v0  ;;  %v697_v46 = vmin.f32 %v2314_v34, 0.0  ;;  %vm630_vm15 = vcmp.gt.f32.partialorder %v2251_v16, 0.0  ;;  %v298_v37 = vld [vmem:[%s1366_s28 + $0x1e8] sm:$0xff] }
  0xa1   : > { %1011 = vst [vmem:[%s1743_s10 + $0x160] sm:$0xff] %v947_v57  ;;  %v948_v7 = vsel %vm628_vm13, %v2217_v2, %v1143_v19  ;;  %v698_v62 = vmin.f32 %v2318_v12, 0.0  ;;  %v699_v27 = vmin.f32 %v2321_v55, 0.0  ;;  %v430_v13 = vmul.f32 %v1556_v18, %v360_v1 }
  0xa2   : > { %v1267_v20 = vpop.eup %1266  ;;  %1012 = vst [vmem:[%s1743_s10 + $0x168] sm:$0xff] %v948_v7  ;;  %v811_v30 = vmul.f32 1.442695, %v697_v46  ;;  %v431_v59 = vmul.f32 %v1556_v18, %v361_v49  ;;  %v362_v28 = vsub.f32 %v292_v41, %v1383_v15  ;;  %v363_v32 = vsub.f32 %v293_v10, %v1383_v15 }
  0xa3   : > { %v1269_v63 = vpop.eup %1268  ;;  %v1144_v2 = vadd.f32 -1.0, %v1267_v20  ;;  %v813_v9 = vmul.f32 1.442695, %v698_v62  ;;  %v815_v11 = vmul.f32 1.442695, %v699_v27  ;;  %v501_v36 = vmul.f32 %v2274_v56, %v430_v13 }
  0xa4   : > { %v1145_v58 = vadd.f32 -1.0, %v1269_v63  ;;  %1274 = vpow2.f32 %v811_v30  ;;  %v502_v52 = vmul.f32 %v2274_v56, %v431_v59  ;;  %v432_v33 = vmul.f32 %v1556_v18, %v362_v28  ;;  %v299_v59 = vld [vmem:[%s1366_s28 + $0x1f0] sm:$0xff] }
  0xa5   : > { %v949_v42 = vsel %vm629_vm14, %v2243_v25, %v1144_v2  ;;  %1276 = vpow2.f32 %v813_v9  ;;  %v433_v54 = vmul.f32 %v1556_v18, %v363_v32  ;;  %v2360_v50 = vadd.f32 %v2289_v51, %v501_v36  ;;  %v300_v9 = vld [vmem:[%s1366_s28 + $0x1f8] sm:$0xff] }
  0xa6   : > { %1013 = vst [vmem:[%s1743_s10 + $0x170] sm:$0xff] %v949_v42  ;;  %v950_v45 = vsel %vm630_vm15, %v2251_v16, %v1145_v58  ;;  %1278 = vpow2.f32 %v815_v11  ;;  %v2363_v39 = vadd.f32 %v2289_v51, %v502_v52  ;;  %v503_v25 = vmul.f32 %v2274_v56, %v432_v33 }
  0xa7   : > { %1014 = vst [vmem:[%s1743_s10 + $0x178] sm:$0xff] %v950_v45  ;;  %v504_v3 = vmul.f32 %v2274_v56, %v433_v54  ;;  %v364_v38 = vsub.f32 %v294_v6, %v1383_v15  ;;  %v365_v17 = vsub.f32 %v295_v26, %v1383_v15  ;;  %vm631_vm0 = vcmp.gt.f32.partialorder %v2292_v48, 0.0 }
  0xa8   : > { %vm632_vm1 = vcmp.gt.f32.partialorder %v2300_v5, 0.0  ;;  %v700_v16 = vmin.f32 %v2360_v50, 0.0  ;;  %v701_v21 = vmin.f32 %v2363_v39, 0.0  ;;  %v2376_v60 = vadd.f32 %v2289_v51, %v503_v25 }
  0xa9   : > { %v1271_v8 = vpop.eup %1270  ;;  %v2379_v24 = vadd.f32 %v2289_v51, %v504_v3  ;;  %v434_v35 = vmul.f32 %v1556_v18, %v364_v38  ;;  %v435_v61 = vmul.f32 %v1556_v18, %v365_v17  ;;  %v366_v4 = vsub.f32 %v296_v31, %v1383_v15 }
  0xaa   : > { %v1273_v1 = vpop.eup %1272  ;;  %v1146_v23 = vadd.f32 -1.0, %v1271_v8  ;;  %v817_v40 = vmul.f32 1.442695, %v700_v16  ;;  %v819_v29 = vmul.f32 1.442695, %v701_v21  ;;  %vm633_vm2 = vcmp.gt.f32.partialorder %v2314_v34, 0.0 }
  0xab   : > { %v1147_v49 = vadd.f32 -1.0, %v1273_v1  ;;  %vm634_vm3 = vcmp.gt.f32.partialorder %v2318_v12, 0.0  ;;  %v702_v44 = vmin.f32 %v2376_v60, 0.0  ;;  %v703_v22 = vmin.f32 %v2379_v24, 0.0 }
  0xac   : > { %v951_v14 = vsel %vm631_vm0, %v2292_v48, %v1146_v23  ;;  %1280 = vpow2.f32 %v817_v40  ;;  %v505_v47 = vmul.f32 %v2274_v56, %v434_v35  ;;  %v506_v19 = vmul.f32 %v2274_v56, %v435_v61 }
  0xad   : > { %1015 = vst [vmem:[%s1743_s10 + $0x180] sm:$0xff] %v951_v14  ;;  %v952_v0 = vsel %vm632_vm1, %v2300_v5, %v1147_v49  ;;  %1282 = vpow2.f32 %v819_v29  ;;  %v821_v43 = vmul.f32 1.442695, %v702_v44  ;;  %v823_v57 = vmul.f32 1.442695, %v703_v22 }
  0xae   : > { %v1275_v41 = vpop.eup %1274  ;;  %1016 = vst [vmem:[%s1743_s10 + $0x188] sm:$0xff] %v952_v0  ;;  %v2401_v48 = vadd.f32 %v2289_v51, %v505_v47  ;;  %v436_v46 = vmul.f32 %v1556_v18, %v366_v4  ;;  %v367_v10 = vsub.f32 %v297_v53, %v1383_v15  ;;  %v2406_v5 = vadd.f32 %v2289_v51, %v506_v19 }
  0xaf   : > { %v1277_v7 = vpop.eup %1276  ;;  %v1148_v62 = vadd.f32 -1.0, %v1275_v41  ;;  %1284 = vpow2.f32 %v821_v43  ;;  %v368_v27 = vsub.f32 %v298_v37, %v1383_v15  ;;  %vm635_vm4 = vcmp.gt.f32.partialorder %v2321_v55, 0.0 }
  0xb0   : > { %v1279_v20 = vpop.eup %1278  ;;  %v1149_v30 = vadd.f32 -1.0, %v1277_v7  ;;  %1286 = vpow2.f32 %v823_v57  ;;  %v704_v13 = vmin.f32 %v2401_v48, 0.0  ;;  %v705_v2 = vmin.f32 %v2406_v5, 0.0 }
  0xb1   : > { %v953_v28 = vsel %vm633_vm2, %v2314_v34, %v1148_v62  ;;  %v1150_v63 = vadd.f32 -1.0, %v1279_v20  ;;  %v507_v58 = vmul.f32 %v2274_v56, %v436_v46  ;;  %v437_v36 = vmul.f32 %v1556_v18, %v367_v10 }
  0xb2   : > { %1017 = vst [vmem:[%s1743_s10 + $0x190] sm:$0xff] %v953_v28  ;;  %v954_v11 = vsel %vm634_vm3, %v2318_v12, %v1149_v30  ;;  %v825_v32 = vmul.f32 1.442695, %v704_v13  ;;  %v827_v6 = vmul.f32 1.442695, %v705_v2  ;;  %v438_v34 = vmul.f32 %v1556_v18, %v368_v27 }
  0xb3   : > { %1018 = vst [vmem:[%s1743_s10 + $0x198] sm:$0xff] %v954_v11  ;;  %v955_v52 = vsel %vm635_vm4, %v2321_v55, %v1150_v63  ;;  %v369_v26 = vsub.f32 %v299_v59, %v1383_v15  ;;  %v2429_v42 = vadd.f32 %v2289_v51, %v507_v58  ;;  %v508_v12 = vmul.f32 %v2274_v56, %v437_v36 }
  0xb4   : > { %1019 = vst [vmem:[%s1743_s10 + $0x1a0] sm:$0xff] %v955_v52  ;;  %1288 = vpow2.f32 %v825_v32  ;;  %v370_v33 = vsub.f32 %v300_v9, %v1383_v15  ;;  %v509_v54 = vmul.f32 %v2274_v56, %v438_v34  ;;  %vm636_vm5 = vcmp.gt.f32.partialorder %v2360_v50, 0.0 }
  0xb5   : > { %1290 = vpow2.f32 %v827_v6  ;;  %v439_v45 = vmul.f32 %v1556_v18, %v369_v26  ;;  %vm637_vm6 = vcmp.gt.f32.partialorder %v2363_v39, 0.0  ;;  %v706_v25 = vmin.f32 %v2429_v42, 0.0 }
  0xb6   : > { %v1281_v55 = vpop.eup %1280  ;;  %v579_v3 = vadd.f32 %v2289_v51, %v508_v12  ;;  %vm638_vm7 = vcmp.gt.f32.partialorder %v2376_v60, 0.0  ;;  %v580_v15 = vadd.f32 %v2289_v51, %v509_v54  ;;  %v440_v35 = vmul.f32 %v1556_v18, %v370_v33 }
  0xb7   : > { %v1283_v38 = vpop.eup %1282  ;;  %v1151_v17 = vadd.f32 -1.0, %v1281_v55  ;;  %v510_v31 = vmul.f32 %v2274_v56, %v439_v45  ;;  %v829_v21 = vmul.f32 1.442695, %v706_v25  ;;  %vm639_vm8 = vcmp.gt.f32.partialorder %v2379_v24, 0.0 }
  0xb8   : > { %v1152_v16 = vadd.f32 -1.0, %v1283_v38  ;;  %v707_v8 = vmin.f32 %v579_v3, 0.0  ;;  %v708_v23 = vmin.f32 %v580_v15, 0.0  ;;  %v511_v22 = vmul.f32 %v2274_v56, %v440_v35 }
  0xb9   : > { %v1285_v61 = vpop.eup %1284  ;;  %v956_v1 = vsel %vm636_vm5, %v2360_v50, %v1151_v17  ;;  %v581_v40 = vadd.f32 %v2289_v51, %v510_v31  ;;  %1292 = vpow2.f32 %v829_v21  ;;  %vm640_vm9 = vcmp.gt.f32.partialorder %v2401_v48, 0.0 }
  0xba   : > { %v1287_v29 = vpop.eup %1286  ;;  %1020 = vst [vmem:[%s1743_s10 + $0x1a8] sm:$0xff] %v956_v1  ;;  %v957_v4 = vsel %vm637_vm6, %v2363_v39, %v1152_v16  ;;  %v1153_v49 = vadd.f32 -1.0, %v1285_v61  ;;  %v831_v44 = vmul.f32 1.442695, %v707_v8  ;;  %v833_v53 = vmul.f32 1.442695, %v708_v23 }
  0xbb   : > { %1021 = vst [vmem:[%s1743_s10 + $0x1b0] sm:$0xff] %v957_v4  ;;  %v1154_v18 = vadd.f32 -1.0, %v1287_v29  ;;  %v709_v50 = vmin.f32 %v581_v40, 0.0  ;;  %v582_v0 = vadd.f32 %v2289_v51, %v511_v22  ;;  %vm641_vm10 = vcmp.gt.f32.partialorder %v2406_v5, 0.0 }
  0xbc   : > { %v958_v14 = vsel %vm638_vm7, %v2376_v60, %v1153_v49  ;;  %1294 = vpow2.f32 %v831_v44  ;;  %vm642_vm11 = vcmp.gt.f32.partialorder %v2429_v42, 0.0  ;;  %vm643_vm12 = vcmp.gt.f32.partialorder %v579_v3, 0.0 }
  0xbd   : > { %1022 = vst [vmem:[%s1743_s10 + $0x1b8] sm:$0xff] %v958_v14  ;;  %v959_v39 = vsel %vm639_vm8, %v2379_v24, %v1154_v18  ;;  %1296 = vpow2.f32 %v833_v53  ;;  %v835_v47 = vmul.f32 1.442695, %v709_v50  ;;  %v710_v19 = vmin.f32 %v582_v0, 0.0 }
  0xbe   : > { %v1289_v37 = vpop.eup %1288  ;;  %1023 = vst [vmem:[%s1743_s10 + $0x1c0] sm:$0xff] %v959_v39  ;;  %vm644_vm13 = vcmp.gt.f32.partialorder %v580_v15, 0.0  ;;  %vm645_vm14 = vcmp.gt.f32.partialorder %v581_v40, 0.0  ;;  %vm646_vm15 = vcmp.gt.f32.partialorder %v582_v0, 0.0 }
  0xbf   : > { %v1291_v43 = vpop.eup %1290  ;;  %v1155_v60 = vadd.f32 -1.0, %v1289_v37  ;;  %1298 = vpow2.f32 %v835_v47  ;;  %v837_v57 = vmul.f32 1.442695, %v710_v19 }
  0xc0   : > { %v1156_v56 = vadd.f32 -1.0, %v1291_v43 }
  0xc1   : > { %v960_v41 = vsel %vm640_vm9, %v2401_v48, %v1155_v60  ;;  %1300 = vpow2.f32 %v837_v57 }
  0xc2   : > { %1024 = vst [vmem:[%s1743_s10 + $0x1c8] sm:$0xff] %v960_v41  ;;  %v961_v24 = vsel %vm641_vm10, %v2406_v5, %v1156_v56 }
  0xc3   : > { %1025 = vst [vmem:[%s1743_s10 + $0x1d0] sm:$0xff] %v961_v24  ;;  %v1293_v46 = vpop.eup %1292 }
  0xc4   : > { %v1157_v51 = vadd.f32 -1.0, %v1293_v46 }
  0xc6   : > { %v1295_v10 = vpop.eup %1294  ;;  %v962_v62 = vsel %vm642_vm11, %v2429_v42, %v1157_v51 }
  0xc7   : > { %v1297_v7 = vpop.eup %1296  ;;  %v1158_v27 = vadd.f32 -1.0, %v1295_v10  ;;  %1026 = vst [vmem:[%s1743_s10 + $0x1d8] sm:$0xff] %v962_v62 }
  0xc8   : > { %v1159_v48 = vadd.f32 -1.0, %v1297_v7 }
  0xc9   : > { %v1299_v5 = vpop.eup %1298  ;;  %v963_v20 = vsel %vm643_vm12, %v579_v3, %v1158_v27 }
  0xca   : > { %1027 = vst [vmem:[%s1743_s10 + $0x1e0] sm:$0xff] %v963_v20  ;;  %v964_v30 = vsel %vm644_vm13, %v580_v15, %v1159_v48  ;;  %v1160_v13 = vadd.f32 -1.0, %v1299_v5 }
  0xcb   : > { %1028 = vst [vmem:[%s1743_s10 + $0x1e8] sm:$0xff] %v964_v30  ;;  %v1301_v28 = vpop.eup %1300 }
  0xcc   : > { %v965_v59 = vsel %vm645_vm14, %v581_v40, %v1160_v13  ;;  %v1161_v63 = vadd.f32 -1.0, %v1301_v28 }
  0xcd   : > { %1029 = vst [vmem:[%s1743_s10 + $0x1f0] sm:$0xff] %v965_v59 }
  0xce   : > { %v966_v2 = vsel %vm646_vm15, %v582_v0, %v1161_v63 }
  0xcf   : > { %1030 = vst [vmem:[%s1743_s10 + $0x1f8] sm:$0xff] %v966_v2 }
  0xd0 PF: > { %s15_s18 = sadd.s32 1, %s1310_s18  }
  0xd1   : > { %p12_p4 = scmp.ge.s32.totalorder %s15_s18, 4  }
  0xd3   :  { %14 = sbr.rel (!%p12_p4) target bundleno = 1 (0x1), region = 70 }

// kernel: unet_down_block_forward.10
= control target key start
LH: loop header
LB: loop body
LE: loop exit
PB: predicated region body
PF: predicated region fallthrough
CT: control target
= control target key end

     0   :  { %s1743_s18 = smov 0   ;;  %s2273_s0 = inlined_call_operand.vmem [shape: bf16[1024,216], index: 0, kind: input, shape index: {}]   ;;  %s2274_s1 = inlined_call_operand.vmem [shape: bf16[216,128], index: 1, kind: input, shape index: {}]   ;;  %s2275_s2 = inlined_call_operand.vmem [shape: f32[1,128], index: 2, kind: input, shape index: {}]   ;;  %s2276_s3 = inlined_call_operand.vmem [shape: f32[1024,128], index: 3, kind: output, shape index: {0}]   ;;  %s2277_s4 = inlined_call_operand.vmem [shape: f32[1,128], index: 4, kind: output, shape index: {1}]   ;;  %s2278_s5 = inlined_call_operand.vmem [shape: f32[1,128], index: 5, kind: output, shape index: {2}]  }
   0x1 LB: > { %s1430_s19 = sadd.s32 4294967295, %s1709_s18   ;;  %p1434_p0 = scmp.ge.s32.totalorder %s1709_s18, 1  ;;  %s1709_s18 = sphi %s1743_s18, %s16_s18  }
   0x2   : > { %p184_p1 = scmp.lt.s32.totalorder %s1709_s18, 3 }
   0x4   : > { %p185_p2 = pnand %p1434_p0, %p184_p1 }
   0x5   : > { %s1435_s20 = sshll.u32 (!%p185_p2), %s1430_s19, 6  ;;  %p1440_p4 = scmp.ne.s32.totalorder (!%p185_p2), %s1430_s19, 0 }
   0x6   : > { %188 = sbr.rel (%p185_p2) target bundleno = 496 (0x1f0), region = 32  ;;  %p214_p3 = scmp.lt.s32.totalorder (!%p185_p2), %s1435_s20, 127 }
   0xd   : > { %s2280_s20 = smov (!%p214_p3, %s1435_s20), 127  ;;  %230 = sbr.rel (%p1440_p4) target bundleno = 20 (0x14), region = 36 }
   0xe   : > { %s1554_s21 = sshll.u32 %s2280_s20, 3  ;;  %v1711_v0 = vmov (!%p1440_p4), 0.0  }
   0xf   : > { %s1754_s24 = scalar_lea.vmem %s2273_s0, %s1554_s21  ;;  %s1759_s27 = scalar_lea.vmem %s2276_s3, %s1554_s21  ;;  %231 = vst [vmem:[%s2277_s4] sm:$0x1] (!%p1440_p4), %v1711_v0  ;;  %232 = vst [vmem:[%s2278_s5] sm:$0x1] (!%p1440_p4), %v1711_v0 }
  0x14 PF: > { %v1593_v1 = vld [vmem:[%s2274_s1] sm:$0xff]   ;;  %v1712_v2 = vmov 0   ;;  %v1594_v3 = vld [vmem:[%s2274_s1 + $0x8] sm:$0xff]   ;;  %v1595_v4 = vld [vmem:[%s2274_s1 + $0x10] sm:$0xff]   ;;  %vm700_vm0 = vcmask 719872   ;;  %vm797_vm1 = vcmask 1043456  }
  0x15   : > { %801 = vmatprep.subr.bf16.mxu0 %v1712_v2  ;;  %1555 = vmatprep.subr.bf16.mxu1 %v1712_v2  ;;  %v1596_v5 = vld [vmem:[%s2274_s1 + $0x18] sm:$0xff]   ;;  %v1597_v6 = vld [vmem:[%s2274_s1 + $0x20] sm:$0xff]   ;;  %v1598_v8 = vld [vmem:[%s2274_s1 + $0x28] sm:$0xff]  }
  0x16   : > { %802 = vmatpush1.bf16.msra.mxu0 %v1593_v1  ;;  %1569 = vmatpush1.bf16.msra.mxu1 %v1593_v1  ;;  %v1609_v7 = vld [vmem:[%s1754_s24 + $0x4] ss:$8 sps:$4 sm:$0xff]   ;;  %v1599_v9 = vld [vmem:[%s2274_s1 + $0x30] sm:$0xff]   ;;  %v1600_v11 = vld [vmem:[%s2274_s1 + $0x38] sm:$0xff]  }
  0x17   : > { %803 = vmatprep.subr.bf16.mxu0 %v1712_v2  ;;  %1556 = vmatprep.subr.bf16.mxu1 %v1712_v2  ;;  %v1633_v10 = vld [vmem:[%s1754_s24 + $0x104] ss:$8 sps:$4 sm:$0xff]   ;;  %v1603_v14 = vld [vmem:[%s2274_s1 + $0x50] sm:$0xff]   ;;  %v1604_v15 = vld [vmem:[%s2274_s1 + $0x58] sm:$0xff]  }
  0x18   : > { %1520 = vmatprep.mubr.msk.bf16.mxu0 %vm700_vm0, %v1609_v7  ;;  %1536 = vmatprep.mubr.msk.bf16.mxu1 %vm700_vm0, %v1633_v10  ;;  %v1601_v12 = vld [vmem:[%s2274_s1 + $0x40] sm:$0xff]   ;;  %v1602_v13 = vld [vmem:[%s2274_s1 + $0x48] sm:$0xff]   ;;  %v1610_v21 = vld [vmem:[%s1754_s24 + $0x14] ss:$8 sps:$4 sm:$0xff]  }
  0x19   : > { %v1605_v16 = vld [vmem:[%s2274_s1 + $0x60] sm:$0xff]   ;;  %v1606_v17 = vld [vmem:[%s2274_s1 + $0x68] ss:$0 sps:$4 sm:$0xff]   ;;  %v1637_v22 = vld [vmem:[%s1754_s24 + $0x114] ss:$8 sps:$4 sm:$0xff]  }
  0x1a   : > { %804 = vmatpush1.bf16.msra.mxu0 %v1594_v3  ;;  %1570 = vmatpush1.bf16.msra.mxu1 %v1594_v3  ;;  %v799_v18 = vsel %vm797_vm1, %v1606_v17, 0  ;;  %v1607_v19 = vld [vmem:[%s1754_s24] ss:$8 sps:$4 sm:$0xff]   ;;  %v1612_v23 = vld [vmem:[%s1754_s24 + $0x10] ss:$8 sps:$4 sm:$0xff]  }
  0x1b   : > { %805 = vmatprep.subr.bf16.mxu0 %v1712_v2  ;;  %1557 = vmatprep.subr.bf16.mxu1 %v1712_v2  ;;  %v1631_v20 = vld [vmem:[%s1754_s24 + $0x100] ss:$8 sps:$4 sm:$0xff]   ;;  %v1639_v24 = vld [vmem:[%s1754_s24 + $0x110] ss:$8 sps:$4 sm:$0xff]   ;;  %v1613_v25 = vld [vmem:[%s1754_s24 + $0x24] ss:$8 sps:$4 sm:$0xff]  }
  0x1c   : > { %v1643_v26 = vld [vmem:[%s1754_s24 + $0x124] ss:$8 sps:$4 sm:$0xff]   ;;  %v1615_v27 = vld [vmem:[%s1754_s24 + $0x20] ss:$8 sps:$4 sm:$0xff]   ;;  %v1616_v29 = vld [vmem:[%s1754_s24 + $0x34] ss:$8 sps:$4 sm:$0xff]  }
  0x1d   : > { %v1645_v28 = vld [vmem:[%s1754_s24 + $0x120] ss:$8 sps:$4 sm:$0xff]   ;;  %v1649_v30 = vld [vmem:[%s1754_s24 + $0x134] ss:$8 sps:$4 sm:$0xff]   ;;  %v1618_v31 = vld [vmem:[%s1754_s24 + $0x30] ss:$8 sps:$4 sm:$0xff]  }
  0x1e   : > { %806 = vmatpush1.bf16.msra.mxu0 %v1595_v4  ;;  %1571 = vmatpush1.bf16.msra.mxu1 %v1595_v4  ;;  %v1651_v32 = vld [vmem:[%s1754_s24 + $0x130] ss:$8 sps:$4 sm:$0xff]   ;;  %v1619_v33 = vld [vmem:[%s1754_s24 + $0x44] ss:$8 sps:$4 sm:$0xff]   ;;  %v1621_v35 = vld [vmem:[%s1754_s24 + $0x40] ss:$8 sps:$4 sm:$0xff]  }
  0x1f   : > { %807 = vmatprep.subr.bf16.mxu0 %v1712_v2  ;;  %1558 = vmatprep.subr.bf16.mxu1 %v1712_v2  ;;  %v1655_v34 = vld [vmem:[%s1754_s24 + $0x144] ss:$8 sps:$4 sm:$0xff]   ;;  %v1657_v36 = vld [vmem:[%s1754_s24 + $0x140] ss:$8 sps:$4 sm:$0xff]   ;;  %v1622_v37 = vld [vmem:[%s1754_s24 + $0x54] ss:$8 sps:$4 sm:$0xff]  }
  0x20   : > { %v1661_v38 = vld [vmem:[%s1754_s24 + $0x154] ss:$8 sps:$4 sm:$0xff]   ;;  %v1624_v39 = vld [vmem:[%s1754_s24 + $0x50] ss:$8 sps:$4 sm:$0xff]   ;;  %v1625_v41 = vld [vmem:[%s1754_s24 + $0x64] ss:$8 sps:$4 sm:$0xff]  }
  0x21   : > { %v1663_v40 = vld [vmem:[%s1754_s24 + $0x150] ss:$8 sps:$4 sm:$0xff]   ;;  %v1667_v42 = vld [vmem:[%s1754_s24 + $0x164] ss:$8 sps:$4 sm:$0xff]   ;;  %v1627_v43 = vld [vmem:[%s1754_s24 + $0x60] ss:$8 sps:$4 sm:$0xff]  }
  0x22   : > { %808 = vmatpush1.bf16.msra.mxu0 %v1596_v5  ;;  %1572 = vmatpush1.bf16.msra.mxu1 %v1596_v5  ;;  %v1669_v44 = vld [vmem:[%s1754_s24 + $0x160] ss:$8 sps:$4 sm:$0xff]   ;;  %v1628_v45 = vld [vmem:[%s1754_s24 + $0x74] ss:$8 sps:$4 sm:$0xff]   ;;  %v1630_v47 = vld [vmem:[%s1754_s24 + $0x70] ss:$8 sps:$4 sm:$0xff]  }
  0x23   : > { %809 = vmatprep.subr.bf16.mxu0 %v1712_v2  ;;  %1559 = vmatprep.subr.bf16.mxu1 %v1712_v2  ;;  %v1673_v46 = vld [vmem:[%s1754_s24 + $0x174] ss:$8 sps:$4 sm:$0xff]   ;;  %v1675_v48 = vld [vmem:[%s1754_s24 + $0x170] ss:$8 sps:$4 sm:$0xff]   ;;  %v1634_v49 = vld [vmem:[%s1754_s24 + $0x84] ss:$8 sps:$4 sm:$0xff]  }
  0x24   : > { %v1679_v50 = vld [vmem:[%s1754_s24 + $0x184] ss:$8 sps:$4 sm:$0xff]   ;;  %v1636_v51 = vld [vmem:[%s1754_s24 + $0x80] ss:$8 sps:$4 sm:$0xff]   ;;  %v1640_v53 = vld [vmem:[%s1754_s24 + $0x94] ss:$8 sps:$4 sm:$0xff]  }
  0x25   : > { %v1681_v52 = vld [vmem:[%s1754_s24 + $0x180] ss:$8 sps:$4 sm:$0xff]   ;;  %v1682_v54 = vld [vmem:[%s1754_s24 + $0x194] ss:$8 sps:$4 sm:$0xff]   ;;  %v1642_v55 = vld [vmem:[%s1754_s24 + $0x90] ss:$8 sps:$4 sm:$0xff]  }
  0x26   : > { %810 = vmatpush1.bf16.msra.mxu0 %v1597_v6  ;;  %1573 = vmatpush1.bf16.msra.mxu1 %v1597_v6  ;;  %v1684_v56 = vld [vmem:[%s1754_s24 + $0x190] ss:$8 sps:$4 sm:$0xff]   ;;  %v1646_v57 = vld [vmem:[%s1754_s24 + $0xa4] ss:$8 sps:$4 sm:$0xff]   ;;  %v1648_v59 = vld [vmem:[%s1754_s24 + $0xa0] ss:$8 sps:$4 sm:$0xff]  }
  0x27   : > { %811 = vmatprep.subr.bf16.mxu0 %v1712_v2  ;;  %1560 = vmatprep.subr.bf16.mxu1 %v1712_v2  ;;  %v1685_v58 = vld [vmem:[%s1754_s24 + $0x1a4] ss:$8 sps:$4 sm:$0xff]   ;;  %v1687_v60 = vld [vmem:[%s1754_s24 + $0x1a0] ss:$8 sps:$4 sm:$0xff]   ;;  %v1652_v61 = vld [vmem:[%s1754_s24 + $0xb4] ss:$8 sps:$4 sm:$0xff]  }
  0x28   : > { %v1688_v62 = vld [vmem:[%s1754_s24 + $0x1b4] ss:$8 sps:$4 sm:$0xff]   ;;  %v1654_v63 = vld [vmem:[%s1754_s24 + $0xb0] ss:$8 sps:$4 sm:$0xff]   ;;  %v1658_v1 = vld [vmem:[%s1754_s24 + $0xc4] ss:$8 sps:$4 sm:$0xff]  }
  0x29   : > { %v1690_v0 = vld [vmem:[%s1754_s24 + $0x1b0] ss:$8 sps:$4 sm:$0xff]   ;;  %v1660_v3 = vld [vmem:[%s1754_s24 + $0xc0] ss:$8 sps:$4 sm:$0xff]   ;;  %v1664_v5 = vld [vmem:[%s1754_s24 + $0xd4] ss:$8 sps:$4 sm:$0xff]  }
  0x2a   : > { %812 = vmatpush1.bf16.msra.mxu0 %v1598_v8  ;;  %1574 = vmatpush1.bf16.msra.mxu1 %v1598_v8  ;;  %v1693_v4 = vld [vmem:[%s1754_s24 + $0x1c0] ss:$8 sps:$4 sm:$0xff]   ;;  %v1694_v6 = vld [vmem:[%s1754_s24 + $0x1d4] ss:$8 sps:$4 sm:$0xff]   ;;  %v1666_v7 = vld [vmem:[%s1754_s24 + $0xd0] ss:$8 sps:$4 sm:$0xff]  }
  0x2b   : > { %813 = vmatprep.subr.bf16.mxu0 %v1712_v2  ;;  %1561 = vmatprep.subr.bf16.mxu1 %v1712_v2  ;;  %v1696_v8 = vld [vmem:[%s1754_s24 + $0x1d0] ss:$8 sps:$4 sm:$0xff]   ;;  %v1697_v10 = vld [vmem:[%s1754_s24 + $0x1e4] ss:$8 sps:$4 sm:$0xff]   ;;  %v1936_v17 = vld [vmem:[%s2275_s2] ss:$0 sm:$0xff] }
  0x2e   : > { %814 = vmatpush1.bf16.msra.mxu0 %v1599_v9  ;;  %1575 = vmatpush1.bf16.msra.mxu1 %v1599_v9  ;;  %v1670_v9 = vld [vmem:[%s1754_s24 + $0xe4] ss:$8 sps:$4 sm:$0xff]  }
  0x2f   : > { %815 = vmatprep.subr.bf16.mxu0 %v1712_v2  ;;  %1562 = vmatprep.subr.bf16.mxu1 %v1712_v2 }
  0x32   : > { %816 = vmatpush1.bf16.msra.mxu0 %v1600_v11  ;;  %1576 = vmatpush1.bf16.msra.mxu1 %v1600_v11  ;;  %v1672_v11 = vld [vmem:[%s1754_s24 + $0xe0] ss:$8 sps:$4 sm:$0xff]  }
  0x33   : > { %817 = vmatprep.subr.bf16.mxu0 %v1712_v2  ;;  %1563 = vmatprep.subr.bf16.mxu1 %v1712_v2 }
  0x36   : > { %818 = vmatpush1.bf16.msra.mxu0 %v1601_v12  ;;  %1577 = vmatpush1.bf16.msra.mxu1 %v1601_v12  ;;  %v1699_v12 = vld [vmem:[%s1754_s24 + $0x1e0] ss:$8 sps:$4 sm:$0xff]  }
  0x37   : > { %819 = vmatprep.subr.bf16.mxu0 %v1712_v2  ;;  %1564 = vmatprep.subr.bf16.mxu1 %v1712_v2 }
  0x3a   : > { %820 = vmatpush1.bf16.msra.mxu0 %v1602_v13  ;;  %1578 = vmatpush1.bf16.msra.mxu1 %v1602_v13  ;;  %v1676_v13 = vld [vmem:[%s1754_s24 + $0xf4] ss:$8 sps:$4 sm:$0xff]  }
  0x3b   : > { %821 = vmatprep.subr.bf16.mxu0 %v1712_v2  ;;  %1565 = vmatprep.subr.bf16.mxu1 %v1712_v2 }
  0x3e   : > { %822 = vmatpush1.bf16.msra.mxu0 %v1603_v14  ;;  %1579 = vmatpush1.bf16.msra.mxu1 %v1603_v14  ;;  %v1700_v14 = vld [vmem:[%s1754_s24 + $0x1f4] ss:$8 sps:$4 sm:$0xff]  }
  0x3f   : > { %823 = vmatprep.subr.bf16.mxu0 %v1712_v2  ;;  %1566 = vmatprep.subr.bf16.mxu1 %v1712_v2 }
  0x42   : > { %824 = vmatpush1.bf16.msra.mxu0 %v1604_v15  ;;  %1580 = vmatpush1.bf16.msra.mxu1 %v1604_v15  ;;  %v1678_v15 = vld [vmem:[%s1754_s24 + $0xf0] ss:$8 sps:$4 sm:$0xff]  }
  0x43   : > { %825 = vmatprep.subr.bf16.mxu0 %v1712_v2  ;;  %1567 = vmatprep.subr.bf16.mxu1 %v1712_v2 }
  0x46   : > { %826 = vmatpush1.bf16.msra.mxu0 %v1605_v16  ;;  %1581 = vmatpush1.bf16.msra.mxu1 %v1605_v16  ;;  %v1702_v16 = vld [vmem:[%s1754_s24 + $0x1f0] ss:$8 sps:$4 sm:$0xff]  }
  0x47   : > { %827 = vmatprep.subr.bf16.mxu0 %v1712_v2  ;;  %1568 = vmatprep.subr.bf16.mxu1 %v1712_v2  ;;  %v1691_v2 = vld [vmem:[%s1754_s24 + $0x1c4] ss:$8 sps:$4 sm:$0xff]  }
  0x4a   : > { %828 = vmatpush1.bf16.msra.mxu0 %v799_v18  ;;  %1582 = vmatpush1.bf16.msra.mxu1 %v799_v18 }
  0x4d   : > { %834 = vmatmul.mubr.bf16.vlgmr.msra.gmra.mrb[0].mxu0 %v1607_v19  ;;  %962 = vmatmul.mubr.bf16.vlgmr.msra.gmra.mrb[0].mxu1 %v1631_v20 }
  0x4e   : > { %1521 = vmatprep.mubr.msk.bf16.mxu0 %vm700_vm0, %v1610_v21  ;;  %1537 = vmatprep.mubr.msk.bf16.mxu1 %vm700_vm0, %v1637_v22 }
  0x55   : > { %842 = vmatmul.mubr.bf16.gmra.mrb[4].mxu0 %v1612_v23  ;;  %970 = vmatmul.mubr.bf16.gmra.mrb[4].mxu1 %v1639_v24 }
  0x56   : > { %1522 = vmatprep.mubr.msk.bf16.mxu0 %vm700_vm0, %v1613_v25  ;;  %1538 = vmatprep.mubr.msk.bf16.mxu1 %vm700_vm0, %v1643_v26 }
  0x5d   : > { %850 = vmatmul.mubr.bf16.gmra.mrb[8].mxu0 %v1615_v27  ;;  %978 = vmatmul.mubr.bf16.gmra.mrb[8].mxu1 %v1645_v28 }
  0x5e   : > { %1523 = vmatprep.mubr.msk.bf16.mxu0 %vm700_vm0, %v1616_v29  ;;  %1539 = vmatprep.mubr.msk.bf16.mxu1 %vm700_vm0, %v1649_v30 }
  0x65   : > { %858 = vmatmul.mubr.bf16.gmra.mrb[12].mxu0 %v1618_v31  ;;  %986 = vmatmul.mubr.bf16.gmra.mrb[12].mxu1 %v1651_v32 }
  0x66   : > { %1524 = vmatprep.mubr.msk.bf16.mxu0 %vm700_vm0, %v1619_v33  ;;  %1540 = vmatprep.mubr.msk.bf16.mxu1 %vm700_vm0, %v1655_v34 }
  0x6d   : > { %866 = vmatmul.mubr.bf16.gmra.mrb[16].mxu0 %v1621_v35  ;;  %994 = vmatmul.mubr.bf16.gmra.mrb[16].mxu1 %v1657_v36 }
  0x6e   : > { %1525 = vmatprep.mubr.msk.bf16.mxu0 %vm700_vm0, %v1622_v37  ;;  %1541 = vmatprep.mubr.msk.bf16.mxu1 %vm700_vm0, %v1661_v38 }
  0x75   : > { %874 = vmatmul.mubr.bf16.gmra.mrb[20].mxu0 %v1624_v39  ;;  %1002 = vmatmul.mubr.bf16.gmra.mrb[20].mxu1 %v1663_v40 }
  0x76   : > { %1526 = vmatprep.mubr.msk.bf16.mxu0 %vm700_vm0, %v1625_v41  ;;  %1542 = vmatprep.mubr.msk.bf16.mxu1 %vm700_vm0, %v1667_v42 }
  0x7d   : > { %882 = vmatmul.mubr.bf16.gmra.mrb[24].mxu0 %v1627_v43  ;;  %1010 = vmatmul.mubr.bf16.gmra.mrb[24].mxu1 %v1669_v44 }
  0x7e   : > { %1527 = vmatprep.mubr.msk.bf16.mxu0 %vm700_vm0, %v1628_v45  ;;  %1543 = vmatprep.mubr.msk.bf16.mxu1 %vm700_vm0, %v1673_v46 }
  0x85   : > { %890 = vmatmul.mubr.bf16.gmra.mrb[28].mxu0 %v1630_v47  ;;  %1018 = vmatmul.mubr.bf16.gmra.mrb[28].mxu1 %v1675_v48 }
  0x86   : > { %1528 = vmatprep.mubr.msk.bf16.mxu0 %vm700_vm0, %v1634_v49  ;;  %1544 = vmatprep.mubr.msk.bf16.mxu1 %vm700_vm0, %v1679_v50 }
  0x8d   : > { %898 = vmatmul.mubr.bf16.gmra.mrb[32].mxu0 %v1636_v51  ;;  %1026 = vmatmul.mubr.bf16.gmra.mrb[32].mxu1 %v1681_v52 }
  0x8e   : > { %1529 = vmatprep.mubr.msk.bf16.mxu0 %vm700_vm0, %v1640_v53  ;;  %1545 = vmatprep.mubr.msk.bf16.mxu1 %vm700_vm0, %v1682_v54 }
  0x95   : > { %906 = vmatmul.mubr.bf16.gmra.mrb[36].mxu0 %v1642_v55  ;;  %1034 = vmatmul.mubr.bf16.gmra.mrb[36].mxu1 %v1684_v56 }
  0x96   : > { %1530 = vmatprep.mubr.msk.bf16.mxu0 %vm700_vm0, %v1646_v57  ;;  %1546 = vmatprep.mubr.msk.bf16.mxu1 %vm700_vm0, %v1685_v58 }
  0x9d   : > { %914 = vmatmul.mubr.bf16.gmra.mrb[40].mxu0 %v1648_v59  ;;  %1042 = vmatmul.mubr.bf16.gmra.mrb[40].mxu1 %v1687_v60 }
  0x9e   : > { %1531 = vmatprep.mubr.msk.bf16.mxu0 %vm700_vm0, %v1652_v61  ;;  %1547 = vmatprep.mubr.msk.bf16.mxu1 %vm700_vm0, %v1688_v62 }
  0xa5   : > { %922 = vmatmul.mubr.bf16.gmra.mrb[44].mxu0 %v1654_v63  ;;  %1050 = vmatmul.mubr.bf16.gmra.mrb[44].mxu1 %v1690_v0 }
  0xa6   : > { %1532 = vmatprep.mubr.msk.bf16.mxu0 %vm700_vm0, %v1658_v1  ;;  %1548 = vmatprep.mubr.msk.bf16.mxu1 %vm700_vm0, %v1691_v2 }
  0xad   : > { %930 = vmatmul.mubr.bf16.gmra.mrb[48].mxu0 %v1660_v3  ;;  %1058 = vmatmul.mubr.bf16.gmra.mrb[48].mxu1 %v1693_v4 }
  0xae   : > { %1533 = vmatprep.mubr.msk.bf16.mxu0 %vm700_vm0, %v1664_v5  ;;  %1549 = vmatprep.mubr.msk.bf16.mxu1 %vm700_vm0, %v1694_v6 }
  0xb5   : > { %938 = vmatmul.mubr.bf16.gmra.mrb[52].mxu0 %v1666_v7  ;;  %1066 = vmatmul.mubr.bf16.gmra.mrb[52].mxu1 %v1696_v8 }
  0xb6   : > { %1534 = vmatprep.mubr.msk.bf16.mxu0 %vm700_vm0, %v1670_v9  ;;  %1550 = vmatprep.mubr.msk.bf16.mxu1 %vm700_vm0, %v1697_v10 }
  0xbd   : > { %946 = vmatmul.mubr.bf16.gmra.mrb[56].mxu0 %v1672_v11  ;;  %1074 = vmatmul.mubr.bf16.gmra.mrb[56].mxu1 %v1699_v12 }
  0xbe   : > { %1535 = vmatprep.mubr.msk.bf16.mxu0 %vm700_vm0, %v1676_v13  ;;  %1551 = vmatprep.mubr.msk.bf16.mxu1 %vm700_vm0, %v1700_v14 }
  0xc5   : > { %954 = vmatmul.mubr.bf16.gmra.mrb[60].mxu0 %v1678_v15  ;;  %1082 = vmatmul.mubr.bf16.gmra.mrb[60].mxu1 %v1702_v16 }
 0x120   : > { %v835_v18 = vpop.f32.mrb[0].mxu0  ;;  %v963_v19 = vpop.f32.mrb[0].mxu1 }
 0x121   : > { %v836_v20 = vadd.f32 %v1936_v17, %v835_v18  ;;  %v837_v21 = vpop.f32.mrb[1].mxu0  ;;  %v1940_v22 = vadd.f32 %v1936_v17, %v963_v19  ;;  %v965_v23 = vpop.f32.mrb[1].mxu1 }
 0x122   : > { %v838_v24 = vpop.f32.mrb[2].mxu0  ;;  %v966_v25 = vpop.f32.mrb[2].mxu1 }
 0x123   : > { %1090 = vst [vmem:[%s1759_s27] sm:$0xff] %v836_v20  ;;  %v839_v26 = vadd.f32 %v1936_v17, %v838_v24  ;;  %v840_v27 = vpop.f32.mrb[3].mxu0  ;;  %1122 = vst [vmem:[%s1759_s27 + $0x100] sm:$0xff] %v1940_v22  ;;  %v1947_v28 = vadd.f32 %v1936_v17, %v966_v25  ;;  %v968_v29 = vpop.f32.mrb[3].mxu1  ;;  %v1227_v30 = vmul.f32 %v836_v20, %v836_v20 }
 0x125   : > { %1091 = vst [vmem:[%s1759_s27 + $0x8] sm:$0xff] %v839_v26  ;;  %v1155_v31 = vadd.f32 %v839_v26, %v836_v20  ;;  %v1228_v32 = vmul.f32 %v839_v26, %v839_v26  ;;  %1123 = vst [vmem:[%s1759_s27 + $0x108] sm:$0xff] %v1947_v28 }
 0x127   : > { %v1291_v33 = vadd.f32 %v1228_v32, %v1227_v30 }
 0x128   : > { %v843_v34 = vpop.f32.mrb[4].mxu0  ;;  %v971_v35 = vpop.f32.mrb[4].mxu1 }
 0x129   : > { %v844_v36 = vadd.f32 %v1936_v17, %v843_v34  ;;  %v845_v37 = vpop.f32.mrb[5].mxu0  ;;  %v1954_v38 = vadd.f32 %v1936_v17, %v971_v35  ;;  %v973_v39 = vpop.f32.mrb[5].mxu1 }
 0x12a   : > { %v846_v40 = vpop.f32.mrb[6].mxu0  ;;  %v974_v41 = vpop.f32.mrb[6].mxu1 }
 0x12b   : > { %1092 = vst [vmem:[%s1759_s27 + $0x10] sm:$0xff] %v844_v36  ;;  %v1156_v42 = vadd.f32 %v1155_v31, %v844_v36  ;;  %v1229_v43 = vmul.f32 %v844_v36, %v844_v36  ;;  %v847_v44 = vadd.f32 %v1936_v17, %v846_v40  ;;  %v848_v45 = vpop.f32.mrb[7].mxu0  ;;  %1124 = vst [vmem:[%s1759_s27 + $0x110] sm:$0xff] %v1954_v38  ;;  %v976_v46 = vpop.f32.mrb[7].mxu1 }
 0x12c   : > { %v1961_v47 = vadd.f32 %v1936_v17, %v974_v41 }
 0x12d   : > { %v1292_v48 = vadd.f32 %v1291_v33, %v1229_v43  ;;  %1093 = vst [vmem:[%s1759_s27 + $0x18] sm:$0xff] %v847_v44  ;;  %v1157_v49 = vadd.f32 %v1156_v42, %v847_v44  ;;  %v1230_v50 = vmul.f32 %v847_v44, %v847_v44 }
 0x12e   : > { %1125 = vst [vmem:[%s1759_s27 + $0x118] sm:$0xff] %v1961_v47 }
 0x12f   : > { %v1293_v51 = vadd.f32 %v1292_v48, %v1230_v50 }
 0x130   : > { %v851_v52 = vpop.f32.mrb[8].mxu0  ;;  %v979_v53 = vpop.f32.mrb[8].mxu1 }
 0x131   : > { %v852_v54 = vadd.f32 %v1936_v17, %v851_v52  ;;  %v853_v55 = vpop.f32.mrb[9].mxu0  ;;  %v1968_v56 = vadd.f32 %v1936_v17, %v979_v53  ;;  %v981_v57 = vpop.f32.mrb[9].mxu1 }
 0x132   : > { %v854_v58 = vpop.f32.mrb[10].mxu0  ;;  %v982_v59 = vpop.f32.mrb[10].mxu1 }
 0x133   : > { %1094 = vst [vmem:[%s1759_s27 + $0x20] sm:$0xff] %v852_v54  ;;  %v1158_v60 = vadd.f32 %v1157_v49, %v852_v54  ;;  %v1231_v61 = vmul.f32 %v852_v54, %v852_v54  ;;  %v855_v62 = vadd.f32 %v1936_v17, %v854_v58  ;;  %v856_v63 = vpop.f32.mrb[11].mxu0  ;;  %1126 = vst [vmem:[%s1759_s27 + $0x120] sm:$0xff] %v1968_v56  ;;  %v984_v0 = vpop.f32.mrb[11].mxu1 }
 0x134   : > { %v1975_v1 = vadd.f32 %v1936_v17, %v982_v59 }
 0x135   : > { %v1294_v2 = vadd.f32 %v1293_v51, %v1231_v61  ;;  %1095 = vst [vmem:[%s1759_s27 + $0x28] sm:$0xff] %v855_v62  ;;  %v1159_v3 = vadd.f32 %v1158_v60, %v855_v62  ;;  %v1232_v4 = vmul.f32 %v855_v62, %v855_v62 }
 0x136   : > { %1127 = vst [vmem:[%s1759_s27 + $0x128] sm:$0xff] %v1975_v1 }
 0x137   : > { %v1295_v5 = vadd.f32 %v1294_v2, %v1232_v4 }
 0x138   : > { %v859_v6 = vpop.f32.mrb[12].mxu0  ;;  %v987_v7 = vpop.f32.mrb[12].mxu1 }
 0x139   : > { %v860_v8 = vadd.f32 %v1936_v17, %v859_v6  ;;  %v861_v9 = vpop.f32.mrb[13].mxu0  ;;  %v1982_v10 = vadd.f32 %v1936_v17, %v987_v7  ;;  %v989_v11 = vpop.f32.mrb[13].mxu1 }
 0x13a   : > { %v862_v12 = vpop.f32.mrb[14].mxu0  ;;  %v990_v13 = vpop.f32.mrb[14].mxu1 }
 0x13b   : > { %1096 = vst [vmem:[%s1759_s27 + $0x30] sm:$0xff] %v860_v8  ;;  %v1160_v14 = vadd.f32 %v1159_v3, %v860_v8  ;;  %v1233_v15 = vmul.f32 %v860_v8, %v860_v8  ;;  %v863_v16 = vadd.f32 %v1936_v17, %v862_v12  ;;  %v864_v18 = vpop.f32.mrb[15].mxu0  ;;  %1128 = vst [vmem:[%s1759_s27 + $0x130] sm:$0xff] %v1982_v10  ;;  %v992_v19 = vpop.f32.mrb[15].mxu1 }
 0x13c   : > { %v1989_v20 = vadd.f32 %v1936_v17, %v990_v13 }
 0x13d   : > { %v1296_v21 = vadd.f32 %v1295_v5, %v1233_v15  ;;  %1097 = vst [vmem:[%s1759_s27 + $0x38] sm:$0xff] %v863_v16  ;;  %v1161_v23 = vadd.f32 %v1160_v14, %v863_v16  ;;  %v1234_v24 = vmul.f32 %v863_v16, %v863_v16 }
 0x13e   : > { %1129 = vst [vmem:[%s1759_s27 + $0x138] sm:$0xff] %v1989_v20 }
 0x13f   : > { %v1297_v25 = vadd.f32 %v1296_v21, %v1234_v24 }
 0x140   : > { %v867_v26 = vpop.f32.mrb[16].mxu0  ;;  %v995_v27 = vpop.f32.mrb[16].mxu1 }
 0x141   : > { %v868_v29 = vadd.f32 %v1936_v17, %v867_v26  ;;  %v869_v30 = vpop.f32.mrb[17].mxu0  ;;  %v1996_v31 = vadd.f32 %v1936_v17, %v995_v27  ;;  %v997_v32 = vpop.f32.mrb[17].mxu1 }
 0x142   : > { %v870_v33 = vpop.f32.mrb[18].mxu0  ;;  %v998_v34 = vpop.f32.mrb[18].mxu1 }
 0x143   : > { %1098 = vst [vmem:[%s1759_s27 + $0x40] sm:$0xff] %v868_v29  ;;  %v1162_v35 = vadd.f32 %v1161_v23, %v868_v29  ;;  %v1235_v36 = vmul.f32 %v868_v29, %v868_v29  ;;  %v871_v37 = vadd.f32 %v1936_v17, %v870_v33  ;;  %v872_v39 = vpop.f32.mrb[19].mxu0  ;;  %1130 = vst [vmem:[%s1759_s27 + $0x140] sm:$0xff] %v1996_v31  ;;  %v1000_v40 = vpop.f32.mrb[19].mxu1 }
 0x144   : > { %v2003_v41 = vadd.f32 %v1936_v17, %v998_v34 }
 0x145   : > { %v1298_v42 = vadd.f32 %v1297_v25, %v1235_v36  ;;  %1099 = vst [vmem:[%s1759_s27 + $0x48] sm:$0xff] %v871_v37  ;;  %v1163_v43 = vadd.f32 %v1162_v35, %v871_v37  ;;  %v1236_v44 = vmul.f32 %v871_v37, %v871_v37 }
 0x146   : > { %1131 = vst [vmem:[%s1759_s27 + $0x148] sm:$0xff] %v2003_v41 }
 0x147   : > { %v1299_v45 = vadd.f32 %v1298_v42, %v1236_v44 }
 0x148   : > { %v875_v46 = vpop.f32.mrb[20].mxu0  ;;  %v1003_v48 = vpop.f32.mrb[20].mxu1 }
 0x149   : > { %v876_v49 = vadd.f32 %v1936_v17, %v875_v46  ;;  %v877_v50 = vpop.f32.mrb[21].mxu0  ;;  %v2010_v51 = vadd.f32 %v1936_v17, %v1003_v48  ;;  %v1005_v52 = vpop.f32.mrb[21].mxu1 }
 0x14a   : > { %v878_v53 = vpop.f32.mrb[22].mxu0  ;;  %v1006_v54 = vpop.f32.mrb[22].mxu1 }
 0x14b   : > { %1100 = vst [vmem:[%s1759_s27 + $0x50] sm:$0xff] %v876_v49  ;;  %v1164_v55 = vadd.f32 %v1163_v43, %v876_v49  ;;  %v1237_v57 = vmul.f32 %v876_v49, %v876_v49  ;;  %v879_v58 = vadd.f32 %v1936_v17, %v878_v53  ;;  %v880_v59 = vpop.f32.mrb[23].mxu0  ;;  %1132 = vst [vmem:[%s1759_s27 + $0x150] sm:$0xff] %v2010_v51  ;;  %v1008_v60 = vpop.f32.mrb[23].mxu1 }
 0x14c   : > { %v2017_v61 = vadd.f32 %v1936_v17, %v1006_v54 }
 0x14d   : > { %v1300_v62 = vadd.f32 %v1299_v45, %v1237_v57  ;;  %1101 = vst [vmem:[%s1759_s27 + $0x58] sm:$0xff] %v879_v58  ;;  %v1165_v63 = vadd.f32 %v1164_v55, %v879_v58  ;;  %v1238_v0 = vmul.f32 %v879_v58, %v879_v58 }
 0x14e   : > { %1133 = vst [vmem:[%s1759_s27 + $0x158] sm:$0xff] %v2017_v61 }
 0x14f   : > { %v1301_v2 = vadd.f32 %v1300_v62, %v1238_v0 }
 0x150   : > { %v883_v3 = vpop.f32.mrb[24].mxu0  ;;  %v1011_v4 = vpop.f32.mrb[24].mxu1 }
 0x151   : > { %v884_v5 = vadd.f32 %v1936_v17, %v883_v3  ;;  %v885_v6 = vpop.f32.mrb[25].mxu0  ;;  %v2024_v7 = vadd.f32 %v1936_v17, %v1011_v4  ;;  %v1013_v8 = vpop.f32.mrb[25].mxu1 }
 0x152   : > { %v886_v9 = vpop.f32.mrb[26].mxu0  ;;  %v1014_v11 = vpop.f32.mrb[26].mxu1 }
 0x153   : > { %1102 = vst [vmem:[%s1759_s27 + $0x60] sm:$0xff] %v884_v5  ;;  %v1166_v12 = vadd.f32 %v1165_v63, %v884_v5  ;;  %v1239_v13 = vmul.f32 %v884_v5, %v884_v5  ;;  %v887_v14 = vadd.f32 %v1936_v17, %v886_v9  ;;  %v888_v15 = vpop.f32.mrb[27].mxu0  ;;  %1134 = vst [vmem:[%s1759_s27 + $0x160] sm:$0xff] %v2024_v7  ;;  %v1016_v16 = vpop.f32.mrb[27].mxu1 }
 0x154   : > { %v2031_v18 = vadd.f32 %v1936_v17, %v1014_v11 }
 0x155   : > { %v1302_v19 = vadd.f32 %v1301_v2, %v1239_v13  ;;  %1103 = vst [vmem:[%s1759_s27 + $0x68] sm:$0xff] %v887_v14  ;;  %v1167_v21 = vadd.f32 %v1166_v12, %v887_v14  ;;  %v1240_v23 = vmul.f32 %v887_v14, %v887_v14 }
 0x156   : > { %1135 = vst [vmem:[%s1759_s27 + $0x168] sm:$0xff] %v2031_v18 }
 0x157   : > { %v1303_v24 = vadd.f32 %v1302_v19, %v1240_v23 }
 0x158   : > { %v891_v25 = vpop.f32.mrb[28].mxu0  ;;  %v1019_v26 = vpop.f32.mrb[28].mxu1 }
 0x159   : > { %v892_v27 = vadd.f32 %v1936_v17, %v891_v25  ;;  %v893_v29 = vpop.f32.mrb[29].mxu0  ;;  %v2038_v30 = vadd.f32 %v1936_v17, %v1019_v26  ;;  %v1021_v32 = vpop.f32.mrb[29].mxu1 }
 0x15a   : > { %v894_v33 = vpop.f32.mrb[30].mxu0  ;;  %v1022_v34 = vpop.f32.mrb[30].mxu1 }
 0x15b   : > { %1104 = vst [vmem:[%s1759_s27 + $0x70] sm:$0xff] %v892_v27  ;;  %v1168_v35 = vadd.f32 %v1167_v21, %v892_v27  ;;  %v1241_v36 = vmul.f32 %v892_v27, %v892_v27  ;;  %v895_v37 = vadd.f32 %v1936_v17, %v894_v33  ;;  %v896_v39 = vpop.f32.mrb[31].mxu0  ;;  %1136 = vst [vmem:[%s1759_s27 + $0x170] sm:$0xff] %v2038_v30  ;;  %v1024_v40 = vpop.f32.mrb[31].mxu1 }
 0x15c   : > { %v2045_v42 = vadd.f32 %v1936_v17, %v1022_v34 }
 0x15d   : > { %v1304_v43 = vadd.f32 %v1303_v24, %v1241_v36  ;;  %1105 = vst [vmem:[%s1759_s27 + $0x78] sm:$0xff] %v895_v37  ;;  %v1169_v44 = vadd.f32 %v1168_v35, %v895_v37  ;;  %v1242_v45 = vmul.f32 %v895_v37, %v895_v37 }
 0x15e   : > { %1137 = vst [vmem:[%s1759_s27 + $0x178] sm:$0xff] %v2045_v42 }
 0x15f   : > { %v1305_v46 = vadd.f32 %v1304_v43, %v1242_v45 }
 0x160   : > { %v899_v48 = vpop.f32.mrb[32].mxu0  ;;  %v1027_v49 = vpop.f32.mrb[32].mxu1 }
 0x161   : > { %v900_v50 = vadd.f32 %v1936_v17, %v899_v48  ;;  %v901_v52 = vpop.f32.mrb[33].mxu0  ;;  %v2052_v53 = vadd.f32 %v1936_v17, %v1027_v49  ;;  %v1029_v54 = vpop.f32.mrb[33].mxu1 }
 0x162   : > { %v902_v55 = vpop.f32.mrb[34].mxu0  ;;  %v1030_v57 = vpop.f32.mrb[34].mxu1 }
 0x163   : > { %1106 = vst [vmem:[%s1759_s27 + $0x80] sm:$0xff] %v900_v50  ;;  %v1170_v58 = vadd.f32 %v1169_v44, %v900_v50  ;;  %v1243_v59 = vmul.f32 %v900_v50, %v900_v50  ;;  %v903_v60 = vadd.f32 %v1936_v17, %v902_v55  ;;  %v904_v62 = vpop.f32.mrb[35].mxu0  ;;  %1138 = vst [vmem:[%s1759_s27 + $0x180] sm:$0xff] %v2052_v53  ;;  %v1032_v63 = vpop.f32.mrb[35].mxu1 }
 0x164   : > { %v2059_v0 = vadd.f32 %v1936_v17, %v1030_v57 }
 0x165   : > { %v1306_v2 = vadd.f32 %v1305_v46, %v1243_v59  ;;  %1107 = vst [vmem:[%s1759_s27 + $0x88] sm:$0xff] %v903_v60  ;;  %v1171_v3 = vadd.f32 %v1170_v58, %v903_v60  ;;  %v1244_v4 = vmul.f32 %v903_v60, %v903_v60 }
 0x166   : > { %1139 = vst [vmem:[%s1759_s27 + $0x188] sm:$0xff] %v2059_v0 }
 0x167   : > { %v1307_v5 = vadd.f32 %v1306_v2, %v1244_v4 }
 0x168   : > { %v907_v6 = vpop.f32.mrb[36].mxu0  ;;  %v1035_v8 = vpop.f32.mrb[36].mxu1 }
 0x169   : > { %v908_v9 = vadd.f32 %v1936_v17, %v907_v6  ;;  %v909_v11 = vpop.f32.mrb[37].mxu0  ;;  %v2066_v12 = vadd.f32 %v1936_v17, %v1035_v8  ;;  %v1037_v13 = vpop.f32.mrb[37].mxu1 }
 0x16a   : > { %v910_v14 = vpop.f32.mrb[38].mxu0  ;;  %v1038_v15 = vpop.f32.mrb[38].mxu1 }
 0x16b   : > { %1108 = vst [vmem:[%s1759_s27 + $0x90] sm:$0xff] %v908_v9  ;;  %v1172_v16 = vadd.f32 %v1171_v3, %v908_v9  ;;  %v1245_v19 = vmul.f32 %v908_v9, %v908_v9  ;;  %v911_v21 = vadd.f32 %v1936_v17, %v910_v14  ;;  %v912_v23 = vpop.f32.mrb[39].mxu0  ;;  %1140 = vst [vmem:[%s1759_s27 + $0x190] sm:$0xff] %v2066_v12  ;;  %v1040_v24 = vpop.f32.mrb[39].mxu1 }
 0x16c   : > { %v2073_v25 = vadd.f32 %v1936_v17, %v1038_v15 }
 0x16d   : > { %v1308_v26 = vadd.f32 %v1307_v5, %v1245_v19  ;;  %1109 = vst [vmem:[%s1759_s27 + $0x98] sm:$0xff] %v911_v21  ;;  %v1173_v27 = vadd.f32 %v1172_v16, %v911_v21  ;;  %v1246_v29 = vmul.f32 %v911_v21, %v911_v21 }
 0x16e   : > { %1141 = vst [vmem:[%s1759_s27 + $0x198] sm:$0xff] %v2073_v25 }
 0x16f   : > { %v1309_v32 = vadd.f32 %v1308_v26, %v1246_v29 }
 0x170   : > { %v915_v33 = vpop.f32.mrb[40].mxu0  ;;  %v1043_v34 = vpop.f32.mrb[40].mxu1 }
 0x171   : > { %v916_v35 = vadd.f32 %v1936_v17, %v915_v33  ;;  %v917_v36 = vpop.f32.mrb[41].mxu0  ;;  %v2080_v37 = vadd.f32 %v1936_v17, %v1043_v34  ;;  %v1045_v39 = vpop.f32.mrb[41].mxu1 }
 0x172   : > { %v918_v40 = vpop.f32.mrb[42].mxu0  ;;  %v1046_v43 = vpop.f32.mrb[42].mxu1 }
 0x173   : > { %1110 = vst [vmem:[%s1759_s27 + $0xa0] sm:$0xff] %v916_v35  ;;  %v1174_v44 = vadd.f32 %v1173_v27, %v916_v35  ;;  %v1247_v45 = vmul.f32 %v916_v35, %v916_v35  ;;  %v919_v46 = vadd.f32 %v1936_v17, %v918_v40  ;;  %v920_v48 = vpop.f32.mrb[43].mxu0  ;;  %1142 = vst [vmem:[%s1759_s27 + $0x1a0] sm:$0xff] %v2080_v37  ;;  %v1048_v49 = vpop.f32.mrb[43].mxu1 }
 0x174   : > { %v2087_v50 = vadd.f32 %v1936_v17, %v1046_v43 }
 0x175   : > { %v1310_v52 = vadd.f32 %v1309_v32, %v1247_v45  ;;  %1111 = vst [vmem:[%s1759_s27 + $0xa8] sm:$0xff] %v919_v46  ;;  %v1175_v54 = vadd.f32 %v1174_v44, %v919_v46  ;;  %v1248_v55 = vmul.f32 %v919_v46, %v919_v46 }
 0x176   : > { %1143 = vst [vmem:[%s1759_s27 + $0x1a8] sm:$0xff] %v2087_v50 }
 0x177   : > { %v1311_v57 = vadd.f32 %v1310_v52, %v1248_v55 }
 0x178   : > { %v923_v58 = vpop.f32.mrb[44].mxu0  ;;  %v1051_v59 = vpop.f32.mrb[44].mxu1 }
 0x179   : > { %v924_v60 = vadd.f32 %v1936_v17, %v923_v58  ;;  %v925_v62 = vpop.f32.mrb[45].mxu0  ;;  %v2094_v63 = vadd.f32 %v1936_v17, %v1051_v59  ;;  %v1053_v2 = vpop.f32.mrb[45].mxu1 }
 0x17a   : > { %v926_v3 = vpop.f32.mrb[46].mxu0  ;;  %v1054_v4 = vpop.f32.mrb[46].mxu1 }
 0x17b   : > { %1112 = vst [vmem:[%s1759_s27 + $0xb0] sm:$0xff] %v924_v60  ;;  %v1176_v5 = vadd.f32 %v1175_v54, %v924_v60  ;;  %v1249_v6 = vmul.f32 %v924_v60, %v924_v60  ;;  %v927_v8 = vadd.f32 %v1936_v17, %v926_v3  ;;  %v928_v9 = vpop.f32.mrb[47].mxu0  ;;  %1144 = vst [vmem:[%s1759_s27 + $0x1b0] sm:$0xff] %v2094_v63  ;;  %v1056_v11 = vpop.f32.mrb[47].mxu1 }
 0x17c   : > { %v2101_v13 = vadd.f32 %v1936_v17, %v1054_v4 }
 0x17d   : > { %v1312_v14 = vadd.f32 %v1311_v57, %v1249_v6  ;;  %1113 = vst [vmem:[%s1759_s27 + $0xb8] sm:$0xff] %v927_v8  ;;  %v1177_v15 = vadd.f32 %v1176_v5, %v927_v8  ;;  %v1250_v16 = vmul.f32 %v927_v8, %v927_v8 }
 0x17e   : > { %1145 = vst [vmem:[%s1759_s27 + $0x1b8] sm:$0xff] %v2101_v13 }
 0x17f   : > { %v1313_v19 = vadd.f32 %v1312_v14, %v1250_v16 }
 0x180   : > { %v931_v21 = vpop.f32.mrb[48].mxu0  ;;  %v1059_v23 = vpop.f32.mrb[48].mxu1 }
 0x181   : > { %v932_v24 = vadd.f32 %v1936_v17, %v931_v21  ;;  %v933_v26 = vpop.f32.mrb[49].mxu0  ;;  %v2108_v27 = vadd.f32 %v1936_v17, %v1059_v23  ;;  %v1061_v29 = vpop.f32.mrb[49].mxu1 }
 0x182   : > { %v934_v32 = vpop.f32.mrb[50].mxu0  ;;  %v1062_v33 = vpop.f32.mrb[50].mxu1 }
 0x183   : > { %1114 = vst [vmem:[%s1759_s27 + $0xc0] sm:$0xff] %v932_v24  ;;  %v1178_v34 = vadd.f32 %v1177_v15, %v932_v24  ;;  %v1251_v35 = vmul.f32 %v932_v24, %v932_v24  ;;  %v935_v36 = vadd.f32 %v1936_v17, %v934_v32  ;;  %v936_v39 = vpop.f32.mrb[51].mxu0  ;;  %1146 = vst [vmem:[%s1759_s27 + $0x1c0] sm:$0xff] %v2108_v27  ;;  %v1064_v40 = vpop.f32.mrb[51].mxu1 }
 0x184   : > { %v2115_v43 = vadd.f32 %v1936_v17, %v1062_v33 }
 0x185   : > { %v1314_v44 = vadd.f32 %v1313_v19, %v1251_v35  ;;  %1115 = vst [vmem:[%s1759_s27 + $0xc8] sm:$0xff] %v935_v36  ;;  %v1179_v45 = vadd.f32 %v1178_v34, %v935_v36  ;;  %v1252_v46 = vmul.f32 %v935_v36, %v935_v36 }
 0x186   : > { %1147 = vst [vmem:[%s1759_s27 + $0x1c8] sm:$0xff] %v2115_v43 }
 0x187   : > { %v1315_v48 = vadd.f32 %v1314_v44, %v1252_v46 }
 0x188   : > { %v939_v49 = vpop.f32.mrb[52].mxu0  ;;  %v1067_v52 = vpop.f32.mrb[52].mxu1 }
 0x189   : > { %v940_v54 = vadd.f32 %v1936_v17, %v939_v49  ;;  %v941_v55 = vpop.f32.mrb[53].mxu0  ;;  %v2122_v57 = vadd.f32 %v1936_v17, %v1067_v52  ;;  %v1069_v58 = vpop.f32.mrb[53].mxu1 }
 0x18a   : > { %v942_v59 = vpop.f32.mrb[54].mxu0  ;;  %v1070_v60 = vpop.f32.mrb[54].mxu1 }
 0x18b   : > { %1116 = vst [vmem:[%s1759_s27 + $0xd0] sm:$0xff] %v940_v54  ;;  %v1180_v62 = vadd.f32 %v1179_v45, %v940_v54  ;;  %v1253_v2 = vmul.f32 %v940_v54, %v940_v54  ;;  %v943_v3 = vadd.f32 %v1936_v17, %v942_v59  ;;  %v944_v4 = vpop.f32.mrb[55].mxu0  ;;  %1148 = vst [vmem:[%s1759_s27 + $0x1d0] sm:$0xff] %v2122_v57  ;;  %v1072_v5 = vpop.f32.mrb[55].mxu1 }
 0x18c   : > { %v2129_v6 = vadd.f32 %v1936_v17, %v1070_v60 }
 0x18d   : > { %v1316_v8 = vadd.f32 %v1315_v48, %v1253_v2  ;;  %1117 = vst [vmem:[%s1759_s27 + $0xd8] sm:$0xff] %v943_v3  ;;  %v1181_v9 = vadd.f32 %v1180_v62, %v943_v3  ;;  %v1254_v11 = vmul.f32 %v943_v3, %v943_v3 }
 0x18e   : > { %1149 = vst [vmem:[%s1759_s27 + $0x1d8] sm:$0xff] %v2129_v6 }
 0x18f   : > { %v1317_v14 = vadd.f32 %v1316_v8, %v1254_v11 }
 0x190   : > { %v947_v15 = vpop.f32.mrb[56].mxu0  ;;  %v1075_v16 = vpop.f32.mrb[56].mxu1 }
 0x191   : > { %v948_v19 = vadd.f32 %v1936_v17, %v947_v15  ;;  %v949_v21 = vpop.f32.mrb[57].mxu0  ;;  %v2136_v23 = vadd.f32 %v1936_v17, %v1075_v16  ;;  %v1077_v24 = vpop.f32.mrb[57].mxu1  ;;  %v1259_v15 = vmul.f32 %v1940_v22, %v1940_v22 }
 0x192   : > { %v950_v26 = vpop.f32.mrb[58].mxu0  ;;  %v1078_v29 = vpop.f32.mrb[58].mxu1  ;;  %v1260_v21 = vmul.f32 %v1947_v28, %v1947_v28 }
 0x193   : > { %1118 = vst [vmem:[%s1759_s27 + $0xe0] sm:$0xff] %v948_v19  ;;  %v1182_v32 = vadd.f32 %v1181_v9, %v948_v19  ;;  %v1255_v33 = vmul.f32 %v948_v19, %v948_v19  ;;  %v951_v34 = vadd.f32 %v1936_v17, %v950_v26  ;;  %v952_v35 = vpop.f32.mrb[59].mxu0  ;;  %1150 = vst [vmem:[%s1759_s27 + $0x1e0] sm:$0xff] %v2136_v23  ;;  %v1080_v36 = vpop.f32.mrb[59].mxu1 }
 0x194   : > { %v2143_v39 = vadd.f32 %v1936_v17, %v1078_v29 }
 0x195   : > { %v1318_v40 = vadd.f32 %v1317_v14, %v1255_v33  ;;  %1119 = vst [vmem:[%s1759_s27 + $0xe8] sm:$0xff] %v951_v34  ;;  %v1183_v44 = vadd.f32 %v1182_v32, %v951_v34  ;;  %v1256_v45 = vmul.f32 %v951_v34, %v951_v34  ;;  %v1262_v33 = vmul.f32 %v1961_v47, %v1961_v47 }
 0x196   : > { %1151 = vst [vmem:[%s1759_s27 + $0x1e8] sm:$0xff] %v2143_v39 }
 0x197   : > { %v1319_v46 = vadd.f32 %v1318_v40, %v1256_v45 }
 0x198   : > { %v955_v48 = vpop.f32.mrb[60].mxu0  ;;  %v1083_v49 = vpop.f32.mrb[60].mxu1 }
 0x199   : > { %v956_v52 = vadd.f32 %v1936_v17, %v955_v48  ;;  %v957_v54 = vpop.f32.mrb[61].mxu0  ;;  %v2150_v55 = vadd.f32 %v1936_v17, %v1083_v49  ;;  %v1085_v58 = vpop.f32.mrb[61].mxu1 }
 0x19a   : > { %v958_v59 = vpop.f32.mrb[62].mxu0  ;;  %v1086_v60 = vpop.f32.mrb[62].mxu1 }
 0x19b   : > { %1120 = vst [vmem:[%s1759_s27 + $0xf0] sm:$0xff] %v956_v52  ;;  %v1184_v62 = vadd.f32 %v1183_v44, %v956_v52  ;;  %v1257_v2 = vmul.f32 %v956_v52, %v956_v52  ;;  %v959_v3 = vadd.f32 %v1936_v17, %v958_v59  ;;  %v960_v4 = vpop.f32.mrb[63].mxu0  ;;  %1152 = vst [vmem:[%s1759_s27 + $0x1f0] sm:$0xff] %v2150_v55  ;;  %v1088_v5 = vpop.f32.mrb[63].mxu1 }
 0x19c   : > { %v2157_v8 = vadd.f32 %v1936_v17, %v1086_v60  ;;  %v1261_v17 = vmul.f32 %v1954_v38, %v1954_v38 }
 0x19d   : > { %v1320_v9 = vadd.f32 %v1319_v46, %v1257_v2  ;;  %1121 = vst [vmem:[%s1759_s27 + $0xf8] sm:$0xff] %v959_v3  ;;  %v1185_v11 = vadd.f32 %v1184_v62, %v959_v3  ;;  %v1258_v14 = vmul.f32 %v959_v3, %v959_v3 }
 0x19e   : > { %1153 = vst [vmem:[%s1759_s27 + $0x1f8] sm:$0xff] %v2157_v8 }
 0x19f   : > { %v1186_v16 = vadd.f32 %v1185_v11, %v1940_v22  ;;  %v1321_v19 = vadd.f32 %v1320_v9, %v1258_v14  ;;  %v1263_v22 = vmul.f32 %v1968_v56, %v1968_v56 }
 0x1a1   : > { %v1187_v24 = vadd.f32 %v1186_v16, %v1947_v28  ;;  %v1322_v26 = vadd.f32 %v1321_v19, %v1259_v15  ;;  %v1264_v28 = vmul.f32 %v1975_v1, %v1975_v1 }
 0x1a3   : > { %v1188_v29 = vadd.f32 %v1187_v24, %v1954_v38  ;;  %v1323_v32 = vadd.f32 %v1322_v26, %v1260_v21  ;;  %v1265_v38 = vmul.f32 %v1982_v10, %v1982_v10  ;;  %v1275_v24 = vmul.f32 %v2052_v53, %v2052_v53 }
 0x1a5   : > { %v1189_v34 = vadd.f32 %v1188_v29, %v1961_v47  ;;  %v1324_v35 = vadd.f32 %v1323_v32, %v1261_v17  ;;  %v1266_v47 = vmul.f32 %v1989_v20, %v1989_v20  ;;  %v1276_v29 = vmul.f32 %v2059_v0, %v2059_v0 }
 0x1a7   : > { %v1190_v36 = vadd.f32 %v1189_v34, %v1968_v56  ;;  %v1325_v40 = vadd.f32 %v1324_v35, %v1262_v33  ;;  %v1267_v56 = vmul.f32 %v1996_v31, %v1996_v31  ;;  %v1277_v33 = vmul.f32 %v2066_v12, %v2066_v12 }
 0x1a8   : > { %v1278_v35 = vmul.f32 %v2073_v25, %v2073_v25 }
 0x1a9   : > { %v1191_v44 = vadd.f32 %v1190_v36, %v1975_v1  ;;  %v1326_v45 = vadd.f32 %v1325_v40, %v1263_v22  ;;  %v1268_v1 = vmul.f32 %v2003_v41, %v2003_v41  ;;  %v1279_v36 = vmul.f32 %v2080_v37, %v2080_v37 }
 0x1ab   : > { %v1192_v46 = vadd.f32 %v1191_v44, %v1982_v10  ;;  %v1327_v48 = vadd.f32 %v1326_v45, %v1264_v28  ;;  %v1269_v10 = vmul.f32 %v2010_v51, %v2010_v51  ;;  %v1280_v28 = vmul.f32 %v2087_v50, %v2087_v50 }
 0x1ac   : > { %v1281_v45 = vmul.f32 %v2094_v63, %v2094_v63 }
 0x1ad   : > { %v1193_v49 = vadd.f32 %v1192_v46, %v1989_v20  ;;  %v1328_v52 = vadd.f32 %v1327_v48, %v1265_v38  ;;  %v1270_v20 = vmul.f32 %v2017_v61, %v2017_v61  ;;  %v1282_v46 = vmul.f32 %v2101_v13, %v2101_v13 }
 0x1af   : > { %v1329_v54 = vadd.f32 %v1328_v52, %v1266_v47  ;;  %v1194_v58 = vadd.f32 %v1193_v49, %v1996_v31  ;;  %v1271_v31 = vmul.f32 %v2024_v7, %v2024_v7  ;;  %v1283_v47 = vmul.f32 %v2108_v27, %v2108_v27 }
 0x1b0   : > { %v1284_v52 = vmul.f32 %v2115_v43, %v2115_v43 }
 0x1b1   : > { %v1195_v59 = vadd.f32 %v1194_v58, %v2003_v41  ;;  %v1330_v60 = vadd.f32 %v1329_v54, %v1267_v56  ;;  %v1272_v41 = vmul.f32 %v2031_v18, %v2031_v18  ;;  %v1285_v54 = vmul.f32 %v2122_v57, %v2122_v57 }
 0x1b3   : > { %v1196_v62 = vadd.f32 %v1195_v59, %v2010_v51  ;;  %v1331_v2 = vadd.f32 %v1330_v60, %v1268_v1  ;;  %v1273_v51 = vmul.f32 %v2038_v30, %v2038_v30  ;;  %v1286_v1 = vmul.f32 %v2129_v6, %v2129_v6 }
 0x1b4   : > { %v1287_v60 = vmul.f32 %v2136_v23, %v2136_v23 }
 0x1b5   : > { %v1197_v3 = vadd.f32 %v1196_v62, %v2017_v61  ;;  %v1332_v4 = vadd.f32 %v1331_v2, %v1269_v10  ;;  %v1274_v61 = vmul.f32 %v2045_v42, %v2045_v42  ;;  %v1288_v62 = vmul.f32 %v2143_v39, %v2143_v39 }
 0x1b7   : > { %v1198_v5 = vadd.f32 %v1197_v3, %v2024_v7  ;;  %v1333_v9 = vadd.f32 %v1332_v4, %v1270_v20  ;;  %v1290_v4 = vmul.f32 %v2157_v8, %v2157_v8 }
 0x1b9   : > { %v1199_v11 = vadd.f32 %v1198_v5, %v2031_v18  ;;  %v1334_v14 = vadd.f32 %v1333_v9, %v1271_v31 }
 0x1bb   : > { %v1200_v15 = vadd.f32 %v1199_v11, %v2038_v30  ;;  %v1335_v16 = vadd.f32 %v1334_v14, %v1272_v41 }
 0x1bd   : > { %v1201_v19 = vadd.f32 %v1200_v15, %v2045_v42  ;;  %v1336_v21 = vadd.f32 %v1335_v16, %v1273_v51 }
 0x1bf   : > { %v1202_v7 = vadd.f32 %v1201_v19, %v2052_v53  ;;  %v1337_v26 = vadd.f32 %v1336_v21, %v1274_v61 }
 0x1c1   : > { %v1338_v18 = vadd.f32 %v1337_v26, %v1275_v24  ;;  %v1203_v17 = vadd.f32 %v1202_v7, %v2059_v0 }
 0x1c3   : > { %v1339_v30 = vadd.f32 %v1338_v18, %v1276_v29  ;;  %v1204_v32 = vadd.f32 %v1203_v17, %v2066_v12 }
 0x1c5   : > { %v1340_v42 = vadd.f32 %v1339_v30, %v1277_v33  ;;  %v1205_v34 = vadd.f32 %v1204_v32, %v2073_v25 }
 0x1c7   : > { %v1341_v53 = vadd.f32 %v1340_v42, %v1278_v35  ;;  %v1206_v22 = vadd.f32 %v1205_v34, %v2080_v37 }
 0x1c9   : > { %v1342_v40 = vadd.f32 %v1341_v53, %v1279_v36  ;;  %v1207_v0 = vadd.f32 %v1206_v22, %v2087_v50 }
 0x1cb   : > { %v1343_v44 = vadd.f32 %v1342_v40, %v1280_v28  ;;  %v1208_v12 = vadd.f32 %v1207_v0, %v2094_v63 }
 0x1cd   : > { %v1344_v38 = vadd.f32 %v1343_v44, %v1281_v45  ;;  %v1209_v25 = vadd.f32 %v1208_v12, %v2101_v13 }
 0x1cf   : > { %v1345_v48 = vadd.f32 %v1344_v38, %v1282_v46  ;;  %v1210_v37 = vadd.f32 %v1209_v25, %v2108_v27 }
 0x1d1   : > { %v1346_v49 = vadd.f32 %v1345_v48, %v1283_v47  ;;  %v1211_v50 = vadd.f32 %v1210_v37, %v2115_v43 }
 0x1d3   : > { %v1347_v56 = vadd.f32 %v1346_v49, %v1284_v52  ;;  %v1212_v63 = vadd.f32 %v1211_v50, %v2122_v57  ;;  %v1289_v57 = vmul.f32 %v2150_v55, %v2150_v55 }
 0x1d5   : > { %v1348_v58 = vadd.f32 %v1347_v56, %v1285_v54  ;;  %v1213_v13 = vadd.f32 %v1212_v63, %v2129_v6 }
 0x1d7   : > { %v1349_v59 = vadd.f32 %v1348_v58, %v1286_v1  ;;  %v1214_v27 = vadd.f32 %v1213_v13, %v2136_v23 }
 0x1d9   : > { %v1350_v10 = vadd.f32 %v1349_v59, %v1287_v60  ;;  %v1215_v43 = vadd.f32 %v1214_v27, %v2143_v39 }
 0x1db   : > { %v1351_v2 = vadd.f32 %v1350_v10, %v1288_v62  ;;  %v1216_v20 = vadd.f32 %v1215_v43, %v2150_v55  ;;  %v1154_v55 = vld [vmem:[%s2277_s4] sm:$0x1] }
 0x1dd   : > { %v1352_v3 = vadd.f32 %v1351_v2, %v1289_v57  ;;  %v1217_v6 = vadd.f32 %v1216_v20, %v2157_v8  ;;  %v1226_v8 = vld [vmem:[%s2278_s5] sm:$0x1] }
 0x1df   : > { %v1218_v31 = vrot.slane %v1217_v6, 4  ;;  %v1353_v23 = vadd.f32 %v1352_v3, %v1290_v4 }
 0x1e1   : > { %v1219_v5 = vadd.f32 %v1218_v31, %v1217_v6  ;;  %v1354_v9 = vrot.slane %v1353_v23, 4 }
 0x1e3   : > { %v1220_v41 = vrot.slane %v1219_v5, 2  ;;  %v1355_v11 = vadd.f32 %v1354_v9, %v1353_v23 }
 0x1e5   : > { %v1221_v14 = vadd.f32 %v1220_v41, %v1219_v5  ;;  %v1356_v39 = vrot.slane %v1355_v11, 2 }
 0x1e7   : > { %v1222_v51 = vrot.slane %v1221_v14, 1  ;;  %v1357_v15 = vadd.f32 %v1356_v39, %v1355_v11 }
 0x1e9   : > { %v1223_v16 = vadd.f32 %v1222_v51, %v1221_v14  ;;  %v1358_v61 = vrot.slane %v1357_v15, 1 }
 0x1eb   : > { %v1224_v19 = vadd.f32 %v1223_v16, %v1154_v55  ;;  %v1359_v21 = vadd.f32 %v1358_v61, %v1357_v15 }
 0x1ed   : > { %1225 = vst [vmem:[%s2277_s4] sm:$0x1] %v1224_v19  ;;  %v1360_v7 = vadd.f32 %v1359_v21, %v1226_v8 }
 0x1ef   : > { %1361 = vst [vmem:[%s2278_s5] sm:$0x1] %v1360_v7 }
 0x1f0 PF: > { %s16_s18 = sadd.s32 1, %s1709_s18  }
 0x1f1   : > { %p13_p5 = scmp.ge.s32.totalorder %s16_s18, 4  }
 0x1f3   :  { %15 = sbr.rel (!%p13_p5) target bundleno = 1 (0x1), region = 82 }

// kernel: unet_down_block_forward.13
= control target key start
LH: loop header
LB: loop body
LE: loop exit
PB: predicated region body
PF: predicated region fallthrough
CT: control target
= control target key end

     0   :  { %s1538_s21 = smov 0   ;;  %s2560_s0 = inlined_call_operand.vmem [shape: f32[1024,128], index: 0, kind: input, shape index: {}]   ;;  %s2561_s1 = inlined_call_operand.vmem [shape: f32[1,128], index: 1, kind: input, shape index: {}]   ;;  %s2562_s2 = inlined_call_operand.vmem [shape: f32[1,128], index: 2, kind: input, shape index: {}]   ;;  %s2563_s3 = inlined_call_operand.vmem [shape: f32[1,128], index: 3, kind: input, shape index: {}]   ;;  %s2564_s4 = inlined_call_operand.vmem [shape: f32[1,128], index: 4, kind: input, shape index: {}]   ;;  %s2565_s5 = inlined_call_operand.vmem [shape: f32[1024,128], index: 5, kind: input, shape index: {}]   ;;  %s2566_s6 = inlined_call_operand.vmem [shape: f32[1024,128], index: 6, kind: output, shape index: {}]  }
   0x1 LB: > { %s1276_s22 = sadd.s32 4294967295, %s1501_s21   ;;  %p1280_p0 = scmp.ge.s32.totalorder %s1501_s21, 1  ;;  %s1501_s21 = sphi %s1538_s21, %s16_s21  }
   0x2   : > { %p224_p1 = scmp.lt.s32.totalorder %s1501_s21, 3 }
   0x4   : > { %p225_p2 = pnand %p1280_p0, %p224_p1 }
   0x5   : > { %s1281_s23 = sshll.u32 (!%p225_p2), %s1276_s22, 6  ;;  %v277_v0 = vld [vmem:[%s2561_s1] sm:$0x1] (!%p225_p2)  ;;  %v351_v5 = vlaneseq (!%p225_p2) }
   0x6   : > { %228 = sbr.rel (%p225_p2) target bundleno = 214 (0xd6), region = 44  ;;  %v279_v1 = vld [vmem:[%s2562_s2] sm:$0x1] (!%p225_p2)  ;;  %p260_p3 = scmp.lt.s32.totalorder (!%p225_p2), %s1281_s23, 127  ;;  %v278_v2 = vmul.f32 (!%p225_p2), 0.0009765625, %v277_v0 }
   0x7   : > { %v280_v3 = vmul.f32 (!%p225_p2), 0.0009765625, %v279_v1  ;;  %v352_v8 = vshrl.u32 (!%p225_p2), %v351_v5, 7  ;;  %v1615_v42 = vld [vmem:[%s2563_s3] ss:$0 sm:$0xff] (!%p225_p2) }
   0x8   : > { %v281_v4 = vmul.f32 (!%p225_p2), %v278_v2, %v278_v2  ;;  %v1632_v51 = vld [vmem:[%s2564_s4] ss:$0 sm:$0xff] (!%p225_p2) }
   0x9   : > { %v353_v10 = vsub.s32 (!%p225_p2), 0, %v352_v8 }
   0xa   : > { %v282_v6 = vsub.f32 (!%p225_p2), %v280_v3, %v281_v4 }
   0xb   : > { %v1561_v12 = vrot.slane (!%p225_p2), %v278_v2, %v353_v10 }
   0xc   : > { %v283_v7 = vmax.f32 (!%p225_p2), %v282_v6, 0.0 }
   0xd   : > { %s2568_s23 = smov (!%p260_p3, %s1281_s23), 127 }
   0xe   : > { %s1552_s28 = sshll.u32 %s2568_s23, 3  ;;  %v284_v9 = vadd.f32 1e-05, %v283_v7 }
   0xf   : > { %s1558_s7 = scalar_lea.vmem %s2560_s0, %s1552_s28  ;;  %s1759_s14 = scalar_lea.vmem %s2565_s5, %s1552_s28 }
  0x10   : > { %1363 = vrsqrt.f32 %v284_v9  ;;  %v286_v11 = vld [vmem:[%s1558_s7] sm:$0xff]  ;;  %v287_v13 = vld [vmem:[%s1558_s7 + $0x8] sm:$0xff]  ;;  %v288_v14 = vld [vmem:[%s1558_s7 + $0x10] sm:$0xff]  ;;  %s1791_s17 = scalar_lea.vmem %s2566_s6, %s1552_s28 }
  0x11   : > { %v289_v15 = vld [vmem:[%s1558_s7 + $0x18] sm:$0xff]  ;;  %v290_v16 = vld [vmem:[%s1558_s7 + $0x20] sm:$0xff]  ;;  %v291_v17 = vld [vmem:[%s1558_s7 + $0x28] sm:$0xff]  ;;  %v356_v22 = vsub.f32 %v286_v11, %v1561_v12  ;;  %v357_v26 = vsub.f32 %v287_v13, %v1561_v12  ;;  %v358_v27 = vsub.f32 %v288_v14, %v1561_v12 }
  0x12   : > { %v292_v18 = vld [vmem:[%s1558_s7 + $0x30] sm:$0xff]  ;;  %v293_v19 = vld [vmem:[%s1558_s7 + $0x38] sm:$0xff]  ;;  %v1571_v20 = vld [vmem:[%s1558_s7 + $0x40] sm:$0xff]  ;;  %v359_v28 = vsub.f32 %v289_v15, %v1561_v12  ;;  %v360_v29 = vsub.f32 %v290_v16, %v1561_v12  ;;  %v361_v34 = vsub.f32 %v291_v17, %v1561_v12 }
  0x13   : > { %v1574_v21 = vld [vmem:[%s1558_s7 + $0x48] sm:$0xff]  ;;  %v1578_v23 = vld [vmem:[%s1558_s7 + $0x50] sm:$0xff]  ;;  %v1581_v24 = vld [vmem:[%s1558_s7 + $0x58] sm:$0xff]  ;;  %v362_v35 = vsub.f32 %v292_v18, %v1561_v12  ;;  %v363_v36 = vsub.f32 %v293_v19, %v1561_v12  ;;  %v364_v37 = vsub.f32 %v1571_v20, %v1561_v12 }
  0x14   : > { %v1584_v25 = vld [vmem:[%s1558_s7 + $0x60] sm:$0xff]  ;;  %v1591_v30 = vld [vmem:[%s1558_s7 + $0x68] sm:$0xff]  ;;  %v1594_v31 = vld [vmem:[%s1558_s7 + $0x70] sm:$0xff]  ;;  %v365_v39 = vsub.f32 %v1574_v21, %v1561_v12  ;;  %v366_v40 = vsub.f32 %v1578_v23, %v1561_v12  ;;  %v367_v41 = vsub.f32 %v1581_v24, %v1561_v12 }
  0x15   : > { %v1597_v32 = vld [vmem:[%s1558_s7 + $0x78] sm:$0xff]  ;;  %v368_v43 = vsub.f32 %v1584_v25, %v1561_v12  ;;  %v369_v44 = vsub.f32 %v1591_v30, %v1561_v12  ;;  %v370_v45 = vsub.f32 %v1594_v31, %v1561_v12  ;;  %v1643_v60 = vld [vmem:[%s1558_s7 + $0x80] sm:$0xff]  ;;  %v1646_v61 = vld [vmem:[%s1558_s7 + $0x88] sm:$0xff] }
  0x16   : > { %v371_v46 = vsub.f32 %v1597_v32, %v1561_v12  ;;  %v1653_v2 = vld [vmem:[%s1558_s7 + $0x90] sm:$0xff]  ;;  %v1668_v7 = vld [vmem:[%s1558_s7 + $0x98] sm:$0xff]  ;;  %v373_v11 = vsub.f32 %v1646_v61, %v1561_v12  ;;  %v1681_v13 = vld [vmem:[%s1558_s7 + $0xa0] sm:$0xff] }
  0x17   : > { %v374_v17 = vsub.f32 %v1653_v2, %v1561_v12  ;;  %v1691_v18 = vld [vmem:[%s1558_s7 + $0xa8] sm:$0xff] }
  0x1a   : > { %v1364_v33 = vpop.eup %1363 }
  0x1b   : > { %v1604_v38 = vrot.slane %v1364_v33, %v353_v10  ;;  %v372_v10 = vsub.f32 %v1643_v60, %v1561_v12 }
  0x1d   : > { %v426_v47 = vmul.f32 %v1604_v38, %v356_v22  ;;  %v427_v48 = vmul.f32 %v1604_v38, %v357_v26  ;;  %v428_v49 = vmul.f32 %v1604_v38, %v358_v27  ;;  %v429_v50 = vmul.f32 %v1604_v38, %v359_v28  ;;  %v1701_v28 = vld [vmem:[%s1558_s7 + $0xb0] sm:$0xff] }
  0x1e   : > { %v430_v52 = vmul.f32 %v1604_v38, %v360_v29  ;;  %v431_v53 = vmul.f32 %v1604_v38, %v361_v34  ;;  %v432_v54 = vmul.f32 %v1604_v38, %v362_v35  ;;  %v433_v55 = vmul.f32 %v1604_v38, %v363_v36  ;;  %v1707_v36 = vld [vmem:[%s1558_s7 + $0xb8] sm:$0xff] }
  0x1f   : > { %v497_v56 = vmul.f32 %v1615_v42, %v426_v47  ;;  %v498_v57 = vmul.f32 %v1615_v42, %v427_v48  ;;  %v499_v58 = vmul.f32 %v1615_v42, %v428_v49  ;;  %v500_v59 = vmul.f32 %v1615_v42, %v429_v50 }
  0x20   : > { %v501_v62 = vmul.f32 %v1615_v42, %v430_v52  ;;  %v502_v63 = vmul.f32 %v1615_v42, %v431_v53  ;;  %v503_v0 = vmul.f32 %v1615_v42, %v432_v54  ;;  %v504_v1 = vmul.f32 %v1615_v42, %v433_v55 }
  0x21   : > { %v1656_v3 = vadd.f32 %v1632_v51, %v497_v56  ;;  %v1659_v4 = vadd.f32 %v1632_v51, %v498_v57  ;;  %v1662_v5 = vadd.f32 %v1632_v51, %v499_v58  ;;  %v1665_v6 = vadd.f32 %v1632_v51, %v500_v59 }
  0x22   : > { %v1671_v8 = vadd.f32 %v1632_v51, %v501_v62  ;;  %v1674_v9 = vadd.f32 %v1632_v51, %v502_v63  ;;  %v1686_v16 = vadd.f32 %v1632_v51, %v503_v0  ;;  %v1696_v26 = vadd.f32 %v1632_v51, %v504_v1 }
  0x23   : > { %v696_v14 = vmin.f32 %v1656_v3, 0.0  ;;  %v697_v15 = vmin.f32 %v1659_v4, 0.0  ;;  %v698_v19 = vmin.f32 %v1662_v5, 0.0  ;;  %v699_v22 = vmin.f32 %v1665_v6, 0.0 }
  0x24   : > { %v375_v27 = vsub.f32 %v1668_v7, %v1561_v12  ;;  %v700_v34 = vmin.f32 %v1671_v8, 0.0  ;;  %v376_v35 = vsub.f32 %v1681_v13, %v1561_v12  ;;  %v701_v49 = vmin.f32 %v1674_v9, 0.0 }
  0x25   : > { %v760_v29 = vmul.f32 1.442695, %v696_v14  ;;  %v762_v33 = vmul.f32 1.442695, %v697_v15  ;;  %v764_v47 = vmul.f32 1.442695, %v698_v19  ;;  %v377_v50 = vsub.f32 %v1691_v18, %v1561_v12 }
  0x26   : > { %v766_v48 = vmul.f32 1.442695, %v699_v22  ;;  %v768_v52 = vmul.f32 1.442695, %v700_v34  ;;  %v702_v53 = vmin.f32 %v1686_v16, 0.0  ;;  %v378_v54 = vsub.f32 %v1701_v28, %v1561_v12 }
  0x27   : > { %1365 = vpow2.f32 %v760_v29  ;;  %v770_v55 = vmul.f32 1.442695, %v701_v49  ;;  %v703_v56 = vmin.f32 %v1696_v26, 0.0  ;;  %v379_v57 = vsub.f32 %v1707_v36, %v1561_v12 }
  0x28   : > { %1367 = vpow2.f32 %v762_v33  ;;  %vm632_vm0 = vcmp.gt.f32.partialorder %v1656_v3, 0.0  ;;  %v772_v58 = vmul.f32 1.442695, %v702_v53  ;;  %v434_v59 = vmul.f32 %v1604_v38, %v364_v37  ;;  %v1016_v33 = vld [vmem:[%s1759_s14] sm:$0xff] }
  0x29   : > { %1369 = vpow2.f32 %v764_v47  ;;  %v435_v62 = vmul.f32 %v1604_v38, %v365_v39  ;;  %vm633_vm1 = vcmp.gt.f32.partialorder %v1659_v4, 0.0  ;;  %v774_v63 = vmul.f32 1.442695, %v703_v56 }
  0x2a   : > { %1371 = vpow2.f32 %v766_v48  ;;  %v436_v0 = vmul.f32 %v1604_v38, %v366_v40  ;;  %v437_v20 = vmul.f32 %v1604_v38, %v367_v41  ;;  %v505_v21 = vmul.f32 %v1615_v42, %v434_v59  ;;  %v1017_v59 = vld [vmem:[%s1759_s14 + $0x8] sm:$0xff] }
  0x2b   : > { %1373 = vpow2.f32 %v768_v52  ;;  %v506_v37 = vmul.f32 %v1615_v42, %v435_v62  ;;  %v438_v39 = vmul.f32 %v1604_v38, %v368_v43  ;;  %v439_v24 = vmul.f32 %v1604_v38, %v369_v44 }
  0x2c   : > { %1375 = vpow2.f32 %v770_v55  ;;  %v507_v23 = vmul.f32 %v1615_v42, %v436_v0  ;;  %v508_v40 = vmul.f32 %v1615_v42, %v437_v20  ;;  %v1749_v41 = vadd.f32 %v1632_v51, %v505_v21 }
  0x2d   : > { %1377 = vpow2.f32 %v772_v58  ;;  %v1752_v1 = vadd.f32 %v1632_v51, %v506_v37  ;;  %v509_v25 = vmul.f32 %v1615_v42, %v438_v39  ;;  %vm634_vm2 = vcmp.gt.f32.partialorder %v1662_v5, 0.0  ;;  %v1018_v37 = vld [vmem:[%s1759_s14 + $0x10] sm:$0xff] }
  0x2e   : > { %1379 = vpow2.f32 %v774_v63  ;;  %v1763_v30 = vadd.f32 %v1632_v51, %v507_v23  ;;  %v1766_v43 = vadd.f32 %v1632_v51, %v508_v40  ;;  %vm635_vm3 = vcmp.gt.f32.partialorder %v1665_v6, 0.0 }
  0x2f   : > { %v704_v44 = vmin.f32 %v1749_v41, 0.0  ;;  %v705_v14 = vmin.f32 %v1752_v1, 0.0  ;;  %v510_v15 = vmul.f32 %v1615_v42, %v439_v24  ;;  %vm636_vm4 = vcmp.gt.f32.partialorder %v1671_v8, 0.0 }
  0x30   : > { %vm637_vm5 = vcmp.gt.f32.partialorder %v1674_v9, 0.0  ;;  %v706_v19 = vmin.f32 %v1763_v30, 0.0  ;;  %v707_v22 = vmin.f32 %v1766_v43, 0.0  ;;  %vm638_vm6 = vcmp.gt.f32.partialorder %v1686_v16, 0.0 }
  0x31   : > { %v1366_v29 = vpop.eup %1365  ;;  %v776_v34 = vmul.f32 1.442695, %v704_v44  ;;  %v778_v47 = vmul.f32 1.442695, %v705_v14  ;;  %v1779_v48 = vadd.f32 %v1632_v51, %v509_v25  ;;  %vm639_vm7 = vcmp.gt.f32.partialorder %v1696_v26, 0.0  ;;  %v1019_v44 = vld [vmem:[%s1759_s14 + $0x18] sm:$0xff] }
  0x32   : > { %v1368_v49 = vpop.eup %1367  ;;  %v1289_v52 = vadd.f32 -1.0, %v1366_v29  ;;  %v780_v53 = vmul.f32 1.442695, %v706_v19  ;;  %v782_v55 = vmul.f32 1.442695, %v707_v22  ;;  %v1785_v63 = vadd.f32 %v1632_v51, %v510_v15  ;;  %v1020_v15 = vld [vmem:[%s1759_s14 + $0x20] sm:$0xff] }
  0x33   : > { %v1370_v56 = vpop.eup %1369  ;;  %v1290_v58 = vadd.f32 -1.0, %v1368_v49  ;;  %1381 = vpow2.f32 %v776_v34  ;;  %v708_v62 = vmin.f32 %v1779_v48, 0.0  ;;  %v440_v39 = vmul.f32 %v1604_v38, %v370_v45 }
  0x34   : > { %v1372_v0 = vpop.eup %1371  ;;  %v952_v20 = vsel %vm632_vm0, %v1656_v3, %v1289_v52  ;;  %v1291_v21 = vadd.f32 -1.0, %v1370_v56  ;;  %1383 = vpow2.f32 %v778_v47  ;;  %vm640_vm8 = vcmp.gt.f32.partialorder %v1749_v41, 0.0 }
  0x35   : > { %v1374_v23 = vpop.eup %1373  ;;  %v1080_v40 = vadd.f32 %v1016_v33, %v952_v20  ;;  %v953_v24 = vsel %vm633_vm1, %v1659_v4, %v1290_v58  ;;  %v1292_v25 = vadd.f32 -1.0, %v1372_v0  ;;  %1385 = vpow2.f32 %v780_v53  ;;  %v1021_v33 = vld [vmem:[%s1759_s14 + $0x28] sm:$0xff]  ;;  %v1022_v53 = vld [vmem:[%s1759_s14 + $0x30] sm:$0xff] }
  0x36   : > { %v1376_v3 = vpop.eup %1375  ;;  %v1081_v14 = vadd.f32 %v1017_v59, %v953_v24  ;;  %v954_v31 = vsel %vm634_vm2, %v1662_v5, %v1291_v21  ;;  %v1293_v45 = vadd.f32 -1.0, %v1374_v23  ;;  %vm641_vm9 = vcmp.gt.f32.partialorder %v1752_v1, 0.0  ;;  %v1023_v59 = vld [vmem:[%s1759_s14 + $0x38] sm:$0xff]  ;;  %v1024_v24 = vld [vmem:[%s1759_s14 + $0x40] sm:$0xff] }
  0x37   : > { %1387 = vpow2.f32 %v782_v55  ;;  %v1378_v4 = vpop.eup %1377  ;;  %1144 = vst [vmem:[%s1791_s17] sm:$0xff] %v1080_v40  ;;  %v1082_v19 = vadd.f32 %v1018_v37, %v954_v31  ;;  %v955_v22 = vsel %vm635_vm3, %v1665_v6, %v1292_v25  ;;  %v1294_v29 = vadd.f32 -1.0, %v1376_v3 }
  0x38   : > { %v784_v34 = vmul.f32 1.442695, %v708_v62  ;;  %v1380_v5 = vpop.eup %1379  ;;  %1145 = vst [vmem:[%s1791_s17 + $0x8] sm:$0xff] %v1081_v14  ;;  %v1083_v47 = vadd.f32 %v1019_v44, %v955_v22  ;;  %v956_v49 = vsel %vm636_vm4, %v1671_v8, %v1293_v45  ;;  %v1295_v52 = vadd.f32 -1.0, %v1378_v4  ;;  %v1025_v14 = vld [vmem:[%s1759_s14 + $0x48] sm:$0xff] }
  0x39   : > { %v709_v55 = vmin.f32 %v1785_v63, 0.0  ;;  %1146 = vst [vmem:[%s1791_s17 + $0x10] sm:$0xff] %v1082_v19  ;;  %v1084_v56 = vadd.f32 %v1020_v15, %v956_v49  ;;  %v957_v6 = vsel %vm637_vm5, %v1674_v9, %v1294_v29  ;;  %v1296_v58 = vadd.f32 -1.0, %v1380_v5  ;;  %v1026_v19 = vld [vmem:[%s1759_s14 + $0x50] sm:$0xff] }
  0x3a   : > { %1389 = vpow2.f32 %v784_v34  ;;  %1147 = vst [vmem:[%s1791_s17 + $0x18] sm:$0xff] %v1083_v47  ;;  %v1085_v62 = vadd.f32 %v1021_v33, %v957_v6  ;;  %v958_v8 = vsel %vm638_vm6, %v1686_v16, %v1295_v52  ;;  %v511_v20 = vmul.f32 %v1615_v42, %v440_v39 }
  0x3b   : > { %v786_v0 = vmul.f32 1.442695, %v709_v55  ;;  %1148 = vst [vmem:[%s1791_s17 + $0x20] sm:$0xff] %v1084_v56  ;;  %v1086_v21 = vadd.f32 %v1022_v53, %v958_v8  ;;  %v959_v9 = vsel %vm639_vm7, %v1696_v26, %v1296_v58  ;;  %v441_v37 = vmul.f32 %v1604_v38, %v371_v46  ;;  %v1028_v58 = vld [vmem:[%s1759_s14 + $0x60] sm:$0xff] }
  0x3c   : > { %v442_v16 = vmul.f32 %v1604_v38, %v372_v10  ;;  %1149 = vst [vmem:[%s1791_s17 + $0x28] sm:$0xff] %v1085_v62  ;;  %v1087_v39 = vadd.f32 %v1023_v59, %v959_v9  ;;  %v1846_v23 = vadd.f32 %v1632_v51, %v511_v20  ;;  %v443_v26 = vmul.f32 %v1604_v38, %v373_v11 }
  0x3d   : > { %1391 = vpow2.f32 %v786_v0  ;;  %v1382_v32 = vpop.eup %1381  ;;  %1150 = vst [vmem:[%s1791_s17 + $0x30] sm:$0xff] %v1086_v21  ;;  %vm642_vm10 = vcmp.gt.f32.partialorder %v1763_v30, 0.0  ;;  %v512_v46 = vmul.f32 %v1615_v42, %v441_v37  ;;  %v444_v10 = vmul.f32 %v1604_v38, %v374_v17 }
  0x3e   : > { %v513_v60 = vmul.f32 %v1615_v42, %v442_v16  ;;  %v1384_v40 = vpop.eup %1383  ;;  %1151 = vst [vmem:[%s1791_s17 + $0x38] sm:$0xff] %v1087_v39  ;;  %v1297_v61 = vadd.f32 -1.0, %v1382_v32  ;;  %vm643_vm11 = vcmp.gt.f32.partialorder %v1766_v43, 0.0  ;;  %v710_v11 = vmin.f32 %v1846_v23, 0.0  ;;  %v1029_v39 = vld [vmem:[%s1759_s14 + $0x68] sm:$0xff] }
  0x3f   : > { %v514_v25 = vmul.f32 %v1615_v42, %v443_v26  ;;  %v1386_v44 = vpop.eup %1385  ;;  %v1298_v3 = vadd.f32 -1.0, %v1384_v40  ;;  %v1867_v31 = vadd.f32 %v1632_v51, %v512_v46  ;;  %v445_v17 = vmul.f32 %v1604_v38, %v375_v27  ;;  %v1027_v27 = vld [vmem:[%s1759_s14 + $0x58] sm:$0xff]  ;;  %v310_v46 = vld [vmem:[%s1558_s7 + $0xc0] sm:$0xff] }
  0x40   : > { %v1870_v2 = vadd.f32 %v1632_v51, %v513_v60  ;;  %v960_v15 = vsel %vm640_vm8, %v1749_v41, %v1297_v61  ;;  %v1299_v4 = vadd.f32 -1.0, %v1386_v44  ;;  %v788_v22 = vmul.f32 1.442695, %v710_v11  ;;  %v311_v60 = vld [vmem:[%s1558_s7 + $0xc8] sm:$0xff] }
  0x41   : > { %v1388_v45 = vpop.eup %1387  ;;  %v515_v29 = vmul.f32 %v1615_v42, %v444_v10  ;;  %v1088_v33 = vadd.f32 %v1024_v24, %v960_v15  ;;  %v961_v34 = vsel %vm641_vm9, %v1752_v1, %v1298_v3  ;;  %v1886_v5 = vadd.f32 %v1632_v51, %v514_v25 }
  0x42   : > { %v1300_v7 = vadd.f32 -1.0, %v1388_v45  ;;  %v1089_v47 = vadd.f32 %v1025_v14, %v961_v34  ;;  %v962_v41 = vsel %vm642_vm10, %v1763_v30, %v1299_v4  ;;  %1393 = vpow2.f32 %v788_v22 }
  0x43   : > { %v711_v49 = vmin.f32 %v1867_v31, 0.0  ;;  %1152 = vst [vmem:[%s1791_s17 + $0x40] sm:$0xff] %v1088_v33  ;;  %v1090_v53 = vadd.f32 %v1026_v19, %v962_v41  ;;  %vm644_vm12 = vcmp.gt.f32.partialorder %v1779_v48, 0.0  ;;  %v712_v55 = vmin.f32 %v1870_v2, 0.0 }
  0x44   : > { %v1390_v52 = vpop.eup %1389  ;;  %v963_v1 = vsel %vm643_vm11, %v1766_v43, %v1300_v7  ;;  %1153 = vst [vmem:[%s1791_s17 + $0x48] sm:$0xff] %v1089_v47  ;;  %vm645_vm13 = vcmp.gt.f32.partialorder %v1785_v63, 0.0  ;;  %v713_v62 = vmin.f32 %v1886_v5, 0.0  ;;  %v1904_v8 = vadd.f32 %v1632_v51, %v515_v29 }
  0x45   : > { %v1091_v56 = vadd.f32 %v1027_v27, %v963_v1  ;;  %v1301_v6 = vadd.f32 -1.0, %v1390_v52  ;;  %v790_v30 = vmul.f32 1.442695, %v711_v49  ;;  %1154 = vst [vmem:[%s1791_s17 + $0x50] sm:$0xff] %v1090_v53  ;;  %v792_v59 = vmul.f32 1.442695, %v712_v55 }
  0x46   : > { %v516_v43 = vmul.f32 %v1615_v42, %v445_v17  ;;  %v446_v21 = vmul.f32 %v1604_v38, %v376_v35  ;;  %v447_v9 = vmul.f32 %v1604_v38, %v377_v50  ;;  %v794_v26 = vmul.f32 1.442695, %v713_v62  ;;  %v1030_v17 = vld [vmem:[%s1759_s14 + $0x70] sm:$0xff]  ;;  %v1031_v49 = vld [vmem:[%s1759_s14 + $0x78] sm:$0xff]  ;;  %v1032_v1 = vld [vmem:[%s1759_s14 + $0x80] sm:$0xff] }
  0x47   : > { %v1392_v0 = vpop.eup %1391  ;;  %1155 = vst [vmem:[%s1791_s17 + $0x58] sm:$0xff] %v1091_v56  ;;  %v964_v20 = vsel %vm644_vm12, %v1779_v48, %v1301_v6  ;;  %1395 = vpow2.f32 %v790_v30  ;;  %vm646_vm14 = vcmp.gt.f32.partialorder %v1846_v23, 0.0  ;;  %v714_v48 = vmin.f32 %v1904_v8, 0.0  ;;  %v312_v62 = vld [vmem:[%s1558_s7 + $0xd0] sm:$0xff] }
  0x48   : > { %v1092_v37 = vadd.f32 %v1028_v58, %v964_v20  ;;  %v1302_v16 = vadd.f32 -1.0, %v1392_v0  ;;  %1397 = vpow2.f32 %v792_v59  ;;  %v1921_v13 = vadd.f32 %v1632_v51, %v516_v43  ;;  %v313_v43 = vld [vmem:[%s1558_s7 + $0xd8] sm:$0xff] }
  0x49   : > { %v517_v35 = vmul.f32 %v1615_v42, %v446_v21  ;;  %1399 = vpow2.f32 %v794_v26  ;;  %v518_v50 = vmul.f32 %v1615_v42, %v447_v9  ;;  %v448_v32 = vmul.f32 %v1604_v38, %v378_v54  ;;  %v1033_v9 = vld [vmem:[%s1759_s14 + $0x88] sm:$0xff] }
  0x4a   : > { %1156 = vst [vmem:[%s1791_s17 + $0x60] sm:$0xff] %v1092_v37  ;;  %v965_v18 = vsel %vm645_vm13, %v1785_v63, %v1302_v16  ;;  %vm647_vm15 = vcmp.gt.f32.partialorder %v1867_v31, 0.0  ;;  %v796_v40 = vmul.f32 1.442695, %v714_v48  ;;  %v715_v61 = vmin.f32 %v1921_v13, 0.0 }
  0x4b   : > { %v1093_v10 = vadd.f32 %v1029_v39, %v965_v18  ;;  %v1938_v24 = vadd.f32 %v1632_v51, %v517_v35  ;;  %v1941_v63 = vadd.f32 %v1632_v51, %v518_v50  ;;  %v519_v11 = vmul.f32 %v1615_v42, %v448_v32  ;;  %v314_v18 = vld [vmem:[%s1558_s7 + $0xe0] sm:$0xff] }
  0x4c   : > { %v449_v28 = vmul.f32 %v1604_v38, %v379_v57  ;;  %v1394_v54 = vpop.eup %1393  ;;  %1401 = vpow2.f32 %v796_v40  ;;  %v798_v25 = vmul.f32 1.442695, %v715_v61  ;;  %v380_v44 = vsub.f32 %v310_v46, %v1561_v12  ;;  %v1034_v46 = vld [vmem:[%s1759_s14 + $0x90] sm:$0xff] }
  0x4d   : > { %1157 = vst [vmem:[%s1791_s17 + $0x68] sm:$0xff] %v1093_v10  ;;  %v381_v3 = vsub.f32 %v311_v60, %v1561_v12  ;;  %v1303_v14 = vadd.f32 -1.0, %v1394_v54  ;;  %vm648_vm0 = vcmp.gt.f32.partialorder %v1870_v2, 0.0  ;;  %vm649_vm1 = vcmp.gt.f32.partialorder %v1886_v5, 0.0 }
  0x4e   : > { %v716_v45 = vmin.f32 %v1938_v24, 0.0  ;;  %1403 = vpow2.f32 %v798_v25  ;;  %v717_v36 = vmin.f32 %v1941_v63, 0.0  ;;  %v1957_v57 = vadd.f32 %v1632_v51, %v519_v11  ;;  %v315_v11 = vld [vmem:[%s1558_s7 + $0xe8] sm:$0xff] }
  0x4f   : > { %v520_v15 = vmul.f32 %v1615_v42, %v449_v28  ;;  %v966_v4 = vsel %vm646_vm14, %v1846_v23, %v1303_v14  ;;  %v450_v22 = vmul.f32 %v1604_v38, %v380_v44  ;;  %v451_v29 = vmul.f32 %v1604_v38, %v381_v3  ;;  %v316_v28 = vld [vmem:[%s1558_s7 + $0xf0] sm:$0xff]  ;;  %v1035_v44 = vld [vmem:[%s1759_s14 + $0x98] sm:$0xff] }
  0x50   : > { %v800_v19 = vmul.f32 1.442695, %v716_v45  ;;  %v1094_v34 = vadd.f32 %v1030_v17, %v966_v4  ;;  %vm650_vm2 = vcmp.gt.f32.partialorder %v1904_v8, 0.0  ;;  %v802_v7 = vmul.f32 1.442695, %v717_v36 }
  0x51   : > { %v1396_v33 = vpop.eup %1395  ;;  %v718_v27 = vmin.f32 %v1957_v57, 0.0  ;;  %v1969_v23 = vadd.f32 %v1632_v51, %v520_v15  ;;  %v521_v52 = vmul.f32 %v1615_v42, %v450_v22  ;;  %v522_v56 = vmul.f32 %v1615_v42, %v451_v29 }
  0x52   : > { %v1398_v47 = vpop.eup %1397  ;;  %v1304_v41 = vadd.f32 -1.0, %v1396_v33  ;;  %1405 = vpow2.f32 %v800_v19  ;;  %1158 = vst [vmem:[%s1791_s17 + $0x70] sm:$0xff] %v1094_v34  ;;  %vm651_vm3 = vcmp.gt.f32.partialorder %v1921_v13, 0.0  ;;  %vm652_vm4 = vcmp.gt.f32.partialorder %v1938_v24, 0.0 }
  0x53   : > { %v1305_v53 = vadd.f32 -1.0, %v1398_v47  ;;  %1407 = vpow2.f32 %v802_v7  ;;  %v804_v55 = vmul.f32 1.442695, %v718_v27  ;;  %v1400_v6 = vpop.eup %1399  ;;  %v719_v30 = vmin.f32 %v1969_v23, 0.0  ;;  %v1036_v7 = vld [vmem:[%s1759_s14 + $0xa0] sm:$0xff] }
  0x54   : > { %v967_v58 = vsel %vm647_vm15, %v1867_v31, %v1304_v41  ;;  %v1981_v59 = vadd.f32 %v1632_v51, %v521_v52  ;;  %v1306_v21 = vadd.f32 -1.0, %v1400_v6  ;;  %v1996_v48 = vadd.f32 %v1632_v51, %v522_v56  ;;  %v317_v6 = vld [vmem:[%s1558_s7 + $0xf8] sm:$0xff] }
  0x55   : > { %v1095_v0 = vadd.f32 %v1031_v49, %v967_v58  ;;  %v968_v20 = vsel %vm648_vm0, %v1870_v2, %v1305_v53  ;;  %1409 = vpow2.f32 %v804_v55  ;;  %v806_v37 = vmul.f32 1.442695, %v719_v30 }
  0x56   : > { %v1096_v31 = vadd.f32 %v1032_v1, %v968_v20  ;;  %v720_v16 = vmin.f32 %v1981_v59, 0.0  ;;  %v1402_v39 = vpop.eup %1401  ;;  %v969_v26 = vsel %vm649_vm1, %v1886_v5, %v1306_v21  ;;  %v382_v2 = vsub.f32 %v312_v62, %v1561_v12 }
  0x57   : > { %1159 = vst [vmem:[%s1791_s17 + $0x78] sm:$0xff] %v1095_v0  ;;  %v383_v35 = vsub.f32 %v313_v43, %v1561_v12  ;;  %v1097_v50 = vadd.f32 %v1033_v9, %v969_v26  ;;  %v1307_v32 = vadd.f32 -1.0, %v1402_v39  ;;  %1411 = vpow2.f32 %v806_v37  ;;  %v1038_v43 = vld [vmem:[%s1759_s14 + $0xb0] sm:$0xff] }
  0x58   : > { %1160 = vst [vmem:[%s1791_s17 + $0x80] sm:$0xff] %v1096_v31  ;;  %v808_v60 = vmul.f32 1.442695, %v720_v16  ;;  %v1404_v10 = vpop.eup %1403  ;;  %vm653_vm5 = vcmp.gt.f32.partialorder %v1941_v63, 0.0  ;;  %v721_v5 = vmin.f32 %v1996_v48, 0.0  ;;  %v452_v40 = vmul.f32 %v1604_v38, %v382_v2  ;;  %v1039_v2 = vld [vmem:[%s1759_s14 + $0xb8] sm:$0xff] }
  0x59   : > { %v453_v61 = vmul.f32 %v1604_v38, %v383_v35  ;;  %1161 = vst [vmem:[%s1791_s17 + $0x88] sm:$0xff] %v1097_v50  ;;  %v970_v54 = vsel %vm650_vm2, %v1904_v8, %v1307_v32  ;;  %v1308_v25 = vadd.f32 -1.0, %v1404_v10  ;;  %v384_v3 = vsub.f32 %v314_v18, %v1561_v12  ;;  %v1040_v10 = vld [vmem:[%s1759_s14 + $0xc0] sm:$0xff] }
  0x5a   : > { %1413 = vpow2.f32 %v808_v60  ;;  %v1098_v14 = vadd.f32 %v1034_v46, %v970_v54  ;;  %v810_v17 = vmul.f32 1.442695, %v721_v5  ;;  %v523_v45 = vmul.f32 %v1615_v42, %v452_v40  ;;  %v319_v54 = vld [vmem:[%s1558_s7 + $0x108] sm:$0xff] }
  0x5b   : > { %v524_v36 = vmul.f32 %v1615_v42, %v453_v61  ;;  %v971_v4 = vsel %vm651_vm3, %v1921_v13, %v1308_v25  ;;  %v454_v8 = vmul.f32 %v1604_v38, %v384_v3  ;;  %v385_v19 = vsub.f32 %v315_v11, %v1561_v12  ;;  %v1037_v13 = vld [vmem:[%s1759_s14 + $0xa8] sm:$0xff] }
  0x5c   : > { %v1406_v15 = vpop.eup %1405  ;;  %v386_v22 = vsub.f32 %v316_v28, %v1561_v12  ;;  %1162 = vst [vmem:[%s1791_s17 + $0x90] sm:$0xff] %v1098_v14  ;;  %v1099_v33 = vadd.f32 %v1035_v44, %v971_v4  ;;  %1415 = vpow2.f32 %v810_v17  ;;  %v2026_v27 = vadd.f32 %v1632_v51, %v523_v45  ;;  %v318_v28 = vld [vmem:[%s1558_s7 + $0x100] sm:$0xff]  ;;  %v320_v14 = vld [vmem:[%s1558_s7 + $0x110] sm:$0xff]  ;;  %v321_v17 = vld [vmem:[%s1558_s7 + $0x118] sm:$0xff] }
  0x5d   : > { %v1408_v29 = vpop.eup %1407  ;;  %v1309_v34 = vadd.f32 -1.0, %v1406_v15  ;;  %v2030_v41 = vadd.f32 %v1632_v51, %v524_v36  ;;  %v525_v49 = vmul.f32 %v1615_v42, %v454_v8  ;;  %v455_v52 = vmul.f32 %v1604_v38, %v385_v19  ;;  %v1041_v15 = vld [vmem:[%s1759_s14 + $0xc8] sm:$0xff] }
  0x5e   : > { %v1310_v47 = vadd.f32 -1.0, %v1408_v29  ;;  %1163 = vst [vmem:[%s1791_s17 + $0x98] sm:$0xff] %v1099_v33  ;;  %vm654_vm6 = vcmp.gt.f32.partialorder %v1957_v57, 0.0  ;;  %v722_v55 = vmin.f32 %v2026_v27, 0.0  ;;  %v456_v56 = vmul.f32 %v1604_v38, %v386_v22 }
  0x5f   : > { %v1410_v53 = vpop.eup %1409  ;;  %v972_v1 = vsel %vm652_vm4, %v1938_v24, %v1309_v34  ;;  %vm655_vm7 = vcmp.gt.f32.partialorder %v1969_v23, 0.0  ;;  %v723_v20 = vmin.f32 %v2030_v41, 0.0  ;;  %v2049_v21 = vadd.f32 %v1632_v51, %v525_v49 }
  0x60   : > { %v1100_v58 = vadd.f32 %v1036_v7, %v972_v1  ;;  %v973_v30 = vsel %vm653_vm5, %v1941_v63, %v1310_v47  ;;  %v1311_v62 = vadd.f32 -1.0, %v1410_v53  ;;  %v812_v24 = vmul.f32 1.442695, %v722_v55  ;;  %v322_v7 = vld [vmem:[%s1558_s7 + $0x120] sm:$0xff]  ;;  %v323_v1 = vld [vmem:[%s1558_s7 + $0x128] sm:$0xff] }
  0x61   : > { %v1101_v0 = vadd.f32 %v1037_v13, %v973_v30  ;;  %v1412_v9 = vpop.eup %1411  ;;  %v526_v37 = vmul.f32 %v1615_v42, %v455_v52  ;;  %v527_v63 = vmul.f32 %v1615_v42, %v456_v56  ;;  %v387_v16 = vsub.f32 %v317_v6, %v1561_v12  ;;  %v1042_v30 = vld [vmem:[%s1759_s14 + $0xd0] sm:$0xff] }
  0x62   : > { %1164 = vst [vmem:[%s1791_s17 + $0xa0] sm:$0xff] %v1100_v58  ;;  %v974_v31 = vsel %vm654_vm6, %v1957_v57, %v1311_v62  ;;  %v1312_v26 = vadd.f32 -1.0, %v1412_v9  ;;  %1417 = vpow2.f32 %v812_v24  ;;  %v814_v35 = vmul.f32 1.442695, %v723_v20 }
  0x63   : > { %1165 = vst [vmem:[%s1791_s17 + $0xa8] sm:$0xff] %v1101_v0  ;;  %v1102_v39 = vadd.f32 %v1038_v43, %v974_v31  ;;  %vm656_vm8 = vcmp.gt.f32.partialorder %v1981_v59, 0.0  ;;  %v724_v57 = vmin.f32 %v2049_v21, 0.0  ;;  %v2061_v50 = vadd.f32 %v1632_v51, %v526_v37 }
  0x64   : > { %v1414_v18 = vpop.eup %1413  ;;  %v2064_v32 = vadd.f32 %v1632_v51, %v527_v63  ;;  %v975_v46 = vsel %vm655_vm7, %v1969_v23, %v1312_v26  ;;  %1419 = vpow2.f32 %v814_v35  ;;  %v457_v5 = vmul.f32 %v1604_v38, %v387_v16  ;;  %v1043_v16 = vld [vmem:[%s1759_s14 + $0xd8] sm:$0xff] }
  0x65   : > { %1166 = vst [vmem:[%s1791_s17 + $0xb0] sm:$0xff] %v1102_v39  ;;  %v1313_v60 = vadd.f32 -1.0, %v1414_v18  ;;  %v1103_v40 = vadd.f32 %v1039_v2, %v975_v46  ;;  %v816_v61 = vmul.f32 1.442695, %v724_v57  ;;  %v725_v11 = vmin.f32 %v2061_v50, 0.0  ;;  %v324_v2 = vld [vmem:[%s1558_s7 + $0x130] sm:$0xff] }
  0x66   : > { %v1416_v25 = vpop.eup %1415  ;;  %vm657_vm9 = vcmp.gt.f32.partialorder %v1996_v48, 0.0  ;;  %v726_v23 = vmin.f32 %v2064_v32, 0.0  ;;  %v528_v3 = vmul.f32 %v1615_v42, %v457_v5  ;;  %v389_v22 = vsub.f32 %v319_v54, %v1561_v12 }
  0x67   : > { %v976_v44 = vsel %vm656_vm8, %v1981_v59, %v1313_v60  ;;  %1167 = vst [vmem:[%s1791_s17 + $0xb8] sm:$0xff] %v1103_v40  ;;  %v1314_v36 = vadd.f32 -1.0, %v1416_v25  ;;  %1421 = vpow2.f32 %v816_v61  ;;  %v818_v4 = vmul.f32 1.442695, %v725_v11  ;;  %v1044_v61 = vld [vmem:[%s1759_s14 + $0xe0] sm:$0xff] }
  0x68   : > { %v1104_v45 = vadd.f32 %v1040_v10, %v976_v44  ;;  %v820_v8 = vmul.f32 1.442695, %v726_v23  ;;  %v2086_v19 = vadd.f32 %v1632_v51, %v528_v3  ;;  %v388_v59 = vsub.f32 %v318_v28, %v1561_v12 }
  0x69   : > { %v977_v29 = vsel %vm657_vm9, %v1996_v48, %v1314_v36  ;;  %1423 = vpow2.f32 %v818_v4  ;;  %v390_v33 = vsub.f32 %v320_v14, %v1561_v12  ;;  %v391_v34 = vsub.f32 %v321_v17, %v1561_v12 }
  0x6a   : > { %1168 = vst [vmem:[%s1791_s17 + $0xc0] sm:$0xff] %v1104_v45  ;;  %v1105_v47 = vadd.f32 %v1041_v15, %v977_v29  ;;  %vm658_vm10 = vcmp.gt.f32.partialorder %v2026_v27, 0.0  ;;  %1425 = vpow2.f32 %v820_v8  ;;  %v727_v13 = vmin.f32 %v2086_v19, 0.0  ;;  %v1045_v45 = vld [vmem:[%s1759_s14 + $0xe8] sm:$0xff] }
  0x6b   : > { %v458_v49 = vmul.f32 %v1604_v38, %v388_v59  ;;  %v459_v52 = vmul.f32 %v1604_v38, %v389_v22  ;;  %v460_v53 = vmul.f32 %v1604_v38, %v390_v33  ;;  %v461_v48 = vmul.f32 %v1604_v38, %v391_v34  ;;  %v1046_v59 = vld [vmem:[%s1759_s14 + $0xf0] sm:$0xff]  ;;  %v325_v33 = vld [vmem:[%s1558_s7 + $0x138] sm:$0xff]  ;;  %v326_v34 = vld [vmem:[%s1558_s7 + $0x140] sm:$0xff] }
  0x6c   : > { %v1418_v55 = vpop.eup %1417  ;;  %1169 = vst [vmem:[%s1791_s17 + $0xc8] sm:$0xff] %v1105_v47  ;;  %vm659_vm11 = vcmp.gt.f32.partialorder %v2030_v41, 0.0  ;;  %vm660_vm12 = vcmp.gt.f32.partialorder %v2049_v21, 0.0  ;;  %v822_v56 = vmul.f32 1.442695, %v727_v13  ;;  %v392_v6 = vsub.f32 %v322_v7, %v1561_v12  ;;  %v327_v13 = vld [vmem:[%s1558_s7 + $0x148] sm:$0xff] }
  0x6d   : > { %v1315_v58 = vadd.f32 -1.0, %v1418_v55  ;;  %v529_v62 = vmul.f32 %v1615_v42, %v458_v49  ;;  %v530_v43 = vmul.f32 %v1615_v42, %v459_v52  ;;  %v531_v0 = vmul.f32 %v1615_v42, %v460_v53  ;;  %v328_v49 = vld [vmem:[%s1558_s7 + $0x150] sm:$0xff] }
  0x6e   : > { %v1420_v24 = vpop.eup %1419  ;;  %1427 = vpow2.f32 %v822_v56  ;;  %v532_v20 = vmul.f32 %v1615_v42, %v461_v48  ;;  %v462_v9 = vmul.f32 %v1604_v38, %v392_v6  ;;  %v393_v31 = vsub.f32 %v323_v1, %v1561_v12  ;;  %v1047_v56 = vld [vmem:[%s1759_s14 + $0xf8] sm:$0xff] }
  0x6f   : > { %v978_v37 = vsel %vm658_vm10, %v2026_v27, %v1315_v58  ;;  %v1316_v63 = vadd.f32 -1.0, %v1420_v24  ;;  %v2120_v39 = vadd.f32 %v1632_v51, %v529_v62  ;;  %v2123_v26 = vadd.f32 %v1632_v51, %v530_v43 }
  0x70   : > { %v1106_v35 = vadd.f32 %v1042_v30, %v978_v37  ;;  %v2127_v18 = vadd.f32 %v1632_v51, %v531_v0  ;;  %v2130_v57 = vadd.f32 %v1632_v51, %v532_v20  ;;  %v533_v46 = vmul.f32 %v1615_v42, %v462_v9 }
  0x71   : > { %v1422_v27 = vpop.eup %1421  ;;  %v979_v60 = vsel %vm659_vm11, %v2030_v41, %v1316_v63  ;;  %vm661_vm13 = vcmp.gt.f32.partialorder %v2061_v50, 0.0  ;;  %vm662_vm14 = vcmp.gt.f32.partialorder %v2064_v32, 0.0  ;;  %v728_v10 = vmin.f32 %v2120_v39, 0.0 }
  0x72   : > { %1170 = vst [vmem:[%s1791_s17 + $0xd0] sm:$0xff] %v1106_v35  ;;  %v1107_v5 = vadd.f32 %v1043_v16, %v979_v60  ;;  %v1317_v40 = vadd.f32 -1.0, %v1422_v27  ;;  %v729_v11 = vmin.f32 %v2123_v26, 0.0  ;;  %v394_v28 = vsub.f32 %v324_v2, %v1561_v12  ;;  %v2196_v16 = vld [vmem:[%s2563_s3] ss:$0 sm:$0xff] }
  0x73   : > { %v1424_v54 = vpop.eup %1423  ;;  %v824_v25 = vmul.f32 1.442695, %v728_v10  ;;  %v730_v41 = vmin.f32 %v2127_v18, 0.0  ;;  %v731_v44 = vmin.f32 %v2130_v57, 0.0  ;;  %v463_v23 = vmul.f32 %v1604_v38, %v393_v31  ;;  %v329_v31 = vld [vmem:[%s1558_s7 + $0x158] sm:$0xff] }
  0x74   : > { %v1426_v3 = vpop.eup %1425  ;;  %1171 = vst [vmem:[%s1791_s17 + $0xd8] sm:$0xff] %v1107_v5  ;;  %v980_v14 = vsel %vm660_vm12, %v2049_v21, %v1317_v40  ;;  %v1318_v17 = vadd.f32 -1.0, %v1424_v54  ;;  %v826_v36 = vmul.f32 1.442695, %v729_v11  ;;  %v2152_v15 = vadd.f32 %v1632_v51, %v533_v46  ;;  %v2211_v5 = vld [vmem:[%s2564_s4] ss:$0 sm:$0xff] }
  0x75   : > { %v1108_v4 = vadd.f32 %v1044_v61, %v980_v14  ;;  %v1319_v8 = vadd.f32 -1.0, %v1426_v3  ;;  %1429 = vpow2.f32 %v824_v25  ;;  %v828_v22 = vmul.f32 1.442695, %v730_v41  ;;  %v1048_v54 = vld [vmem:[%s1759_s14 + $0x100] sm:$0xff]  ;;  %v1049_v3 = vld [vmem:[%s1759_s14 + $0x108] sm:$0xff] }
  0x76   : > { %v981_v29 = vsel %vm661_vm13, %v2061_v50, %v1318_v17  ;;  %vm663_vm15 = vcmp.gt.f32.partialorder %v2086_v19, 0.0  ;;  %1431 = vpow2.f32 %v826_v36  ;;  %v830_v21 = vmul.f32 1.442695, %v731_v44 }
  0x77   : > { %1172 = vst [vmem:[%s1791_s17 + $0xe0] sm:$0xff] %v1108_v4  ;;  %v1109_v7 = vadd.f32 %v1045_v45, %v981_v29  ;;  %v982_v47 = vsel %vm662_vm14, %v2064_v32, %v1319_v8  ;;  %vm664_vm0 = vcmp.gt.f32.partialorder %v2120_v39, 0.0  ;;  %1433 = vpow2.f32 %v828_v22 }
  0x78   : > { %v732_v50 = vmin.f32 %v2152_v15, 0.0  ;;  %v1428_v52 = vpop.eup %1427  ;;  %v1110_v53 = vadd.f32 %v1046_v59, %v982_v47  ;;  %1435 = vpow2.f32 %v830_v21  ;;  %v534_v48 = vmul.f32 %v1615_v42, %v463_v23  ;;  %v1050_v59 = vld [vmem:[%s1759_s14 + $0x110] sm:$0xff] }
  0x79   : > { %v464_v1 = vmul.f32 %v1604_v38, %v394_v28  ;;  %1173 = vst [vmem:[%s1791_s17 + $0xe8] sm:$0xff] %v1109_v7  ;;  %v1320_v55 = vadd.f32 -1.0, %v1428_v52  ;;  %v395_v6 = vsub.f32 %v325_v33, %v1561_v12  ;;  %v396_v58 = vsub.f32 %v326_v34, %v1561_v12  ;;  %v1051_v34 = vld [vmem:[%s1759_s14 + $0x118] sm:$0xff] }
  0x7a   : > { %v832_v32 = vmul.f32 1.442695, %v732_v50  ;;  %1174 = vst [vmem:[%s1791_s17 + $0xf0] sm:$0xff] %v1110_v53  ;;  %v2177_v30 = vadd.f32 %v1632_v51, %v534_v48  ;;  %v397_v43 = vsub.f32 %v327_v13, %v1561_v12  ;;  %v398_v0 = vsub.f32 %v328_v49, %v1561_v12  ;;  %v330_v48 = vld [vmem:[%s1558_s7 + $0x160] sm:$0xff] }
  0x7b   : > { %v535_v62 = vmul.f32 %v1615_v42, %v464_v1  ;;  %v983_v24 = vsel %vm663_vm15, %v2086_v19, %v1320_v55  ;;  %v465_v20 = vmul.f32 %v1604_v38, %v395_v6  ;;  %v466_v9 = vmul.f32 %v1604_v38, %v396_v58  ;;  %v332_v1 = vld [vmem:[%s1558_s7 + $0x170] sm:$0xff] }
  0x7c   : > { %1437 = vpow2.f32 %v832_v32  ;;  %v1111_v37 = vadd.f32 %v1047_v56, %v983_v24  ;;  %vm665_vm1 = vcmp.gt.f32.partialorder %v2123_v26, 0.0  ;;  %v733_v42 = vmin.f32 %v2177_v30, 0.0  ;;  %v1052_v32 = vld [vmem:[%s1759_s14 + $0x120] sm:$0xff] }
  0x7d   : > { %v2191_v63 = vadd.f32 %v1632_v51, %v535_v62  ;;  %v536_v19 = vmul.f32 %v2196_v16, %v465_v20  ;;  %v537_v2 = vmul.f32 %v2196_v16, %v466_v9  ;;  %v467_v35 = vmul.f32 %v1604_v38, %v397_v43  ;;  %v333_v62 = vld [vmem:[%s1558_s7 + $0x178] sm:$0xff] }
  0x7e   : > { %v468_v46 = vmul.f32 %v1604_v38, %v398_v0  ;;  %1175 = vst [vmem:[%s1791_s17 + $0xf8] sm:$0xff] %v1111_v37  ;;  %vm666_vm2 = vcmp.gt.f32.partialorder %v2127_v18, 0.0  ;;  %v834_v27 = vmul.f32 1.442695, %v733_v42  ;;  %v399_v60 = vsub.f32 %v329_v31, %v1561_v12 }
  0x7f   : > { %v734_v51 = vmin.f32 %v2191_v63, 0.0  ;;  %v1430_v10 = vpop.eup %1429  ;;  %vm667_vm3 = vcmp.gt.f32.partialorder %v2130_v57, 0.0  ;;  %vm668_vm4 = vcmp.gt.f32.partialorder %v2152_v15, 0.0  ;;  %v2214_v40 = vadd.f32 %v2211_v5, %v536_v19 }
  0x80   : > { %v2217_v61 = vadd.f32 %v2211_v5, %v537_v2  ;;  %v1432_v11 = vpop.eup %1431  ;;  %v1321_v28 = vadd.f32 -1.0, %v1430_v10  ;;  %1439 = vpow2.f32 %v834_v27  ;;  %v538_v41 = vmul.f32 %v2196_v16, %v467_v35 }
  0x81   : > { %v836_v25 = vmul.f32 1.442695, %v734_v51  ;;  %v1434_v44 = vpop.eup %1433  ;;  %v1322_v23 = vadd.f32 -1.0, %v1432_v11  ;;  %v735_v14 = vmin.f32 %v2214_v40, 0.0  ;;  %v539_v17 = vmul.f32 %v2196_v16, %v468_v46  ;;  %v1053_v51 = vld [vmem:[%s1759_s14 + $0x128] sm:$0xff] }
  0x82   : > { %v469_v45 = vmul.f32 %v1604_v38, %v399_v60  ;;  %v1436_v36 = vpop.eup %1435  ;;  %v984_v4 = vsel %vm664_vm0, %v2120_v39, %v1321_v28  ;;  %v1323_v8 = vadd.f32 -1.0, %v1434_v44  ;;  %v736_v22 = vmin.f32 %v2217_v61, 0.0 }
  0x83   : > { %1441 = vpow2.f32 %v836_v25  ;;  %v1112_v29 = vadd.f32 %v1048_v54, %v984_v4  ;;  %v985_v21 = vsel %vm665_vm1, %v2123_v26, %v1322_v23  ;;  %v1324_v33 = vadd.f32 -1.0, %v1436_v36  ;;  %v334_v25 = vld [vmem:[%s1558_s7 + $0x180] sm:$0xff]  ;;  %v1054_v23 = vld [vmem:[%s1759_s14 + $0x130] sm:$0xff] }
  0x84   : > { %v838_v7 = vmul.f32 1.442695, %v735_v14  ;;  %v1113_v47 = vadd.f32 %v1049_v3, %v985_v21  ;;  %v986_v39 = vsel %vm666_vm2, %v2127_v18, %v1323_v8  ;;  %v840_v50 = vmul.f32 1.442695, %v736_v22  ;;  %v331_v18 = vld [vmem:[%s1558_s7 + $0x168] sm:$0xff] }
  0x85   : > { %v2238_v13 = vadd.f32 %v2211_v5, %v538_v41  ;;  %1176 = vst [vmem:[%s1791_s17 + $0x100] sm:$0xff] %v1112_v29  ;;  %v1114_v52 = vadd.f32 %v1050_v59, %v986_v39  ;;  %v987_v26 = vsel %vm667_vm3, %v2130_v57, %v1324_v33  ;;  %v2245_v53 = vadd.f32 %v2211_v5, %v539_v17  ;;  %v1056_v39 = vld [vmem:[%s1759_s14 + $0x140] sm:$0xff] }
  0x86   : > { %v1438_v49 = vpop.eup %1437  ;;  %1443 = vpow2.f32 %v838_v7  ;;  %1177 = vst [vmem:[%s1791_s17 + $0x108] sm:$0xff] %v1113_v47  ;;  %v1115_v55 = vadd.f32 %v1051_v34, %v987_v26  ;;  %vm669_vm5 = vcmp.gt.f32.partialorder %v2177_v30, 0.0  ;;  %vm670_vm6 = vcmp.gt.f32.partialorder %v2191_v63, 0.0  ;;  %v1055_v34 = vld [vmem:[%s1759_s14 + $0x138] sm:$0xff] }
  0x87   : > { %v1325_v56 = vadd.f32 -1.0, %v1438_v49  ;;  %1445 = vpow2.f32 %v840_v50  ;;  %1178 = vst [vmem:[%s1791_s17 + $0x110] sm:$0xff] %v1114_v52  ;;  %v737_v57 = vmin.f32 %v2238_v13, 0.0  ;;  %v738_v6 = vmin.f32 %v2245_v53, 0.0 }
  0x88   : > { %v540_v58 = vmul.f32 %v2196_v16, %v469_v45  ;;  %1179 = vst [vmem:[%s1791_s17 + $0x118] sm:$0xff] %v1115_v55  ;;  %v400_v0 = vsub.f32 %v330_v48, %v1561_v12  ;;  %v401_v24 = vsub.f32 %v331_v18, %v1561_v12  ;;  %v402_v20 = vsub.f32 %v332_v1, %v1561_v12  ;;  %v335_v48 = vld [vmem:[%s1558_s7 + $0x188] sm:$0xff] }
  0x89   : > { %v988_v43 = vsel %vm668_vm4, %v2152_v15, %v1325_v56  ;;  %v842_v31 = vmul.f32 1.442695, %v737_v57  ;;  %v844_v37 = vmul.f32 1.442695, %v738_v6  ;;  %v403_v46 = vsub.f32 %v333_v62, %v1561_v12  ;;  %v337_v57 = vld [vmem:[%s1558_s7 + $0x198] sm:$0xff] }
  0x8a   : > { %v1116_v9 = vadd.f32 %v1052_v32, %v988_v43  ;;  %v2267_v42 = vadd.f32 %v2211_v5, %v540_v58  ;;  %v1440_v19 = vpop.eup %1439  ;;  %v470_v2 = vmul.f32 %v1604_v38, %v400_v0  ;;  %v471_v35 = vmul.f32 %v1604_v38, %v401_v24  ;;  %v336_v32 = vld [vmem:[%s1558_s7 + $0x190] sm:$0xff]  ;;  %v338_v0 = vld [vmem:[%s1558_s7 + $0x1a0] sm:$0xff] }
  0x8b   : > { %v472_v15 = vmul.f32 %v1604_v38, %v402_v20  ;;  %v1326_v27 = vadd.f32 -1.0, %v1440_v19  ;;  %vm671_vm7 = vcmp.gt.f32.partialorder %v2214_v40, 0.0  ;;  %1447 = vpow2.f32 %v842_v31 }
  0x8c   : > { %1180 = vst [vmem:[%s1791_s17 + $0x120] sm:$0xff] %v1116_v9  ;;  %v739_v60 = vmin.f32 %v2267_v42, 0.0  ;;  %1449 = vpow2.f32 %v844_v37  ;;  %v541_v11 = vmul.f32 %v2196_v16, %v470_v2  ;;  %v542_v28 = vmul.f32 %v2196_v16, %v471_v35  ;;  %v1057_v9 = vld [vmem:[%s1759_s14 + $0x148] sm:$0xff]  ;;  %v1058_v2 = vld [vmem:[%s1759_s14 + $0x150] sm:$0xff] }
  0x8d   : > { %v1442_v10 = vpop.eup %1441  ;;  %v543_v54 = vmul.f32 %v2196_v16, %v472_v15  ;;  %v989_v41 = vsel %vm669_vm5, %v2177_v30, %v1326_v27  ;;  %v473_v14 = vmul.f32 %v1604_v38, %v403_v46  ;;  %v404_v22 = vsub.f32 %v334_v25, %v1561_v12 }
  0x8e   : > { %v1327_v44 = vadd.f32 -1.0, %v1442_v10  ;;  %v846_v3 = vmul.f32 1.442695, %v739_v60  ;;  %v1117_v17 = vadd.f32 %v1053_v51, %v989_v41  ;;  %v2287_v45 = vadd.f32 %v2211_v5, %v541_v11  ;;  %v339_v11 = vld [vmem:[%s1558_s7 + $0x1a8] sm:$0xff] }
  0x8f   : > { %v2290_v36 = vadd.f32 %v2211_v5, %v542_v28  ;;  %v2293_v4 = vadd.f32 %v2211_v5, %v543_v54  ;;  %v544_v59 = vmul.f32 %v2196_v16, %v473_v14  ;;  %vm672_vm8 = vcmp.gt.f32.partialorder %v2217_v61, 0.0 }
  0x90   : > { %v1444_v8 = vpop.eup %1443  ;;  %v990_v30 = vsel %vm670_vm6, %v2191_v63, %v1327_v44  ;;  %1451 = vpow2.f32 %v846_v3  ;;  %1181 = vst [vmem:[%s1791_s17 + $0x128] sm:$0xff] %v1117_v17  ;;  %v740_v7 = vmin.f32 %v2287_v45, 0.0  ;;  %vm673_vm9 = vcmp.gt.f32.partialorder %v2238_v13, 0.0  ;;  %v1059_v44 = vld [vmem:[%s1759_s14 + $0x158] sm:$0xff] }
  0x91   : > { %v1446_v29 = vpop.eup %1445  ;;  %v1118_v21 = vadd.f32 %v1054_v23, %v990_v30  ;;  %v1328_v33 = vadd.f32 -1.0, %v1444_v8  ;;  %v741_v63 = vmin.f32 %v2290_v36, 0.0  ;;  %v742_v52 = vmin.f32 %v2293_v4, 0.0 }
  0x92   : > { %v1329_v47 = vadd.f32 -1.0, %v1446_v29  ;;  %v848_v49 = vmul.f32 1.442695, %v740_v7  ;;  %v2313_v26 = vadd.f32 %v2211_v5, %v544_v59  ;;  %v474_v56 = vmul.f32 %v1604_v38, %v404_v22  ;;  %v340_v29 = vld [vmem:[%s1558_s7 + $0x1b0] sm:$0xff] }
  0x93   : > { %1182 = vst [vmem:[%s1791_s17 + $0x130] sm:$0xff] %v1118_v21  ;;  %v991_v50 = vsel %vm671_vm7, %v2214_v40, %v1328_v33  ;;  %v850_v55 = vmul.f32 1.442695, %v741_v63  ;;  %vm674_vm10 = vcmp.gt.f32.partialorder %v2245_v53, 0.0  ;;  %v852_v6 = vmul.f32 1.442695, %v742_v52 }
  0x94   : > { %v1119_v18 = vadd.f32 %v1055_v34, %v991_v50  ;;  %v992_v1 = vsel %vm672_vm8, %v2217_v61, %v1329_v47  ;;  %1453 = vpow2.f32 %v848_v49  ;;  %v743_v62 = vmin.f32 %v2313_v26, 0.0  ;;  %v1060_v49 = vld [vmem:[%s1759_s14 + $0x160] sm:$0xff] }
  0x95   : > { %v1120_v40 = vadd.f32 %v1056_v39, %v992_v1  ;;  %v1448_v58 = vpop.eup %1447  ;;  %1455 = vpow2.f32 %v850_v55  ;;  %v545_v61 = vmul.f32 %v2196_v16, %v474_v56  ;;  %v405_v43 = vsub.f32 %v335_v48, %v1561_v12  ;;  %v1061_v55 = vld [vmem:[%s1759_s14 + $0x168] sm:$0xff] }
  0x96   : > { %1183 = vst [vmem:[%s1791_s17 + $0x138] sm:$0xff] %v1119_v18  ;;  %v1450_v24 = vpop.eup %1449  ;;  %v1330_v20 = vadd.f32 -1.0, %v1448_v58  ;;  %1457 = vpow2.f32 %v852_v6  ;;  %v406_v31 = vsub.f32 %v336_v32, %v1561_v12  ;;  %v407_v37 = vsub.f32 %v337_v57, %v1561_v12  ;;  %v1062_v58 = vld [vmem:[%s1759_s14 + $0x170] sm:$0xff] }
  0x97   : > { %1184 = vst [vmem:[%s1791_s17 + $0x140] sm:$0xff] %v1120_v40  ;;  %v1331_v19 = vadd.f32 -1.0, %v1450_v24  ;;  %v854_v35 = vmul.f32 1.442695, %v743_v62  ;;  %v2332_v15 = vadd.f32 %v2211_v5, %v545_v61  ;;  %v475_v46 = vmul.f32 %v1604_v38, %v405_v43 }
  0x98   : > { %v993_v27 = vsel %vm673_vm9, %v2238_v13, %v1330_v20  ;;  %v476_v51 = vmul.f32 %v1604_v38, %v406_v31  ;;  %v477_v60 = vmul.f32 %v1604_v38, %v407_v37  ;;  %v408_v10 = vsub.f32 %v338_v0, %v1561_v12  ;;  %v341_v20 = vld [vmem:[%s1558_s7 + $0x1b8] sm:$0xff] }
  0x99   : > { %v1121_v54 = vadd.f32 %v1057_v9, %v993_v27  ;;  %v994_v25 = vsel %vm674_vm10, %v2245_v53, %v1331_v19  ;;  %vm675_vm11 = vcmp.gt.f32.partialorder %v2267_v42, 0.0  ;;  %1459 = vpow2.f32 %v854_v35  ;;  %v342_v9 = vld [vmem:[%s1558_s7 + $0x1c0] sm:$0xff]  ;;  %v343_v19 = vld [vmem:[%s1558_s7 + $0x1c8] sm:$0xff] }
  0x9a   : > { %v1452_v28 = vpop.eup %1451  ;;  %v1122_v41 = vadd.f32 %v1058_v2, %v994_v25  ;;  %v744_v23 = vmin.f32 %v2332_v15, 0.0  ;;  %v546_v3 = vmul.f32 %v2196_v16, %v475_v46  ;;  %v547_v14 = vmul.f32 %v2196_v16, %v476_v51  ;;  %v344_v2 = vld [vmem:[%s1558_s7 + $0x1d0] sm:$0xff]  ;;  %v1063_v46 = vld [vmem:[%s1759_s14 + $0x178] sm:$0xff] }
  0x9b   : > { %v1332_v13 = vadd.f32 -1.0, %v1452_v28  ;;  %1185 = vst [vmem:[%s1791_s17 + $0x148] sm:$0xff] %v1121_v54  ;;  %v548_v17 = vmul.f32 %v2196_v16, %v477_v60  ;;  %v478_v8 = vmul.f32 %v1604_v38, %v408_v10  ;;  %v409_v53 = vsub.f32 %v339_v11, %v1561_v12 }
  0x9c   : > { %1186 = vst [vmem:[%s1791_s17 + $0x150] sm:$0xff] %v1122_v41  ;;  %vm676_vm12 = vcmp.gt.f32.partialorder %v2287_v45, 0.0  ;;  %v856_v59 = vmul.f32 1.442695, %v744_v23  ;;  %v2358_v22 = vadd.f32 %v2211_v5, %v546_v3  ;;  %v2362_v33 = vadd.f32 %v2211_v5, %v547_v14  ;;  %v345_v23 = vld [vmem:[%s1558_s7 + $0x1d8] sm:$0xff] }
  0x9d   : > { %v995_v30 = vsel %vm675_vm11, %v2267_v42, %v1332_v13  ;;  %v2365_v34 = vadd.f32 %v2211_v5, %v548_v17  ;;  %v549_v7 = vmul.f32 %v2196_v16, %v478_v8  ;;  %vm677_vm13 = vcmp.gt.f32.partialorder %v2290_v36, 0.0 }
  0x9e   : > { %v1123_v21 = vadd.f32 %v1059_v44, %v995_v30  ;;  %v1454_v47 = vpop.eup %1453  ;;  %1461 = vpow2.f32 %v856_v59  ;;  %v745_v42 = vmin.f32 %v2358_v22, 0.0  ;;  %v479_v39 = vmul.f32 %v1604_v38, %v409_v53  ;;  %v1064_v53 = vld [vmem:[%s1759_s14 + $0x180] sm:$0xff] }
  0x9f   : > { %v1456_v63 = vpop.eup %1455  ;;  %v1333_v50 = vadd.f32 -1.0, %v1454_v47  ;;  %vm678_vm14 = vcmp.gt.f32.partialorder %v2293_v4, 0.0  ;;  %v746_v52 = vmin.f32 %v2362_v33, 0.0  ;;  %v410_v48 = vsub.f32 %v340_v29, %v1561_v12 }
  0xa0   : > { %1187 = vst [vmem:[%s1791_s17 + $0x158] sm:$0xff] %v1123_v21  ;;  %v1458_v18 = vpop.eup %1457  ;;  %v1334_v1 = vadd.f32 -1.0, %v1456_v63  ;;  %v858_v56 = vmul.f32 1.442695, %v745_v42  ;;  %v747_v32 = vmin.f32 %v2365_v34, 0.0  ;;  %v2379_v57 = vadd.f32 %v2211_v5, %v549_v7 }
  0xa1   : > { %v996_v40 = vsel %vm676_vm12, %v2287_v45, %v1333_v50  ;;  %v1335_v6 = vadd.f32 -1.0, %v1458_v18  ;;  %v860_v62 = vmul.f32 1.442695, %v746_v52  ;;  %v550_v61 = vmul.f32 %v2196_v16, %v479_v39 }
  0xa2   : > { %v1124_v43 = vadd.f32 %v1060_v49, %v996_v40  ;;  %v997_v0 = vsel %vm677_vm13, %v2290_v36, %v1334_v1  ;;  %1463 = vpow2.f32 %v858_v56  ;;  %v862_v24 = vmul.f32 1.442695, %v747_v32  ;;  %v1065_v1 = vld [vmem:[%s1759_s14 + $0x188] sm:$0xff] }
  0xa3   : > { %v1460_v45 = vpop.eup %1459  ;;  %v1125_v31 = vadd.f32 %v1061_v55, %v997_v0  ;;  %v998_v37 = vsel %vm678_vm14, %v2293_v4, %v1335_v6  ;;  %vm679_vm15 = vcmp.gt.f32.partialorder %v2313_v26, 0.0  ;;  %1465 = vpow2.f32 %v860_v62  ;;  %v1066_v6 = vld [vmem:[%s1759_s14 + $0x190] sm:$0xff] }
  0xa4   : > { %1188 = vst [vmem:[%s1791_s17 + $0x160] sm:$0xff] %v1124_v43  ;;  %v1126_v35 = vadd.f32 %v1062_v58, %v998_v37  ;;  %v1336_v36 = vadd.f32 -1.0, %v1460_v45  ;;  %1467 = vpow2.f32 %v862_v24  ;;  %v748_v27 = vmin.f32 %v2379_v57, 0.0  ;;  %v1067_v24 = vld [vmem:[%s1759_s14 + $0x198] sm:$0xff]  ;;  %v346_v37 = vld [vmem:[%s1558_s7 + $0x1e0] sm:$0xff] }
  0xa5   : > { %1189 = vst [vmem:[%s1791_s17 + $0x168] sm:$0xff] %v1125_v31  ;;  %v2402_v51 = vadd.f32 %v2211_v5, %v550_v61  ;;  %v480_v4 = vmul.f32 %v1604_v38, %v410_v48  ;;  %v411_v60 = vsub.f32 %v341_v20, %v1561_v12  ;;  %v412_v10 = vsub.f32 %v342_v9, %v1561_v12 }
  0xa6   : > { %1190 = vst [vmem:[%s1791_s17 + $0x170] sm:$0xff] %v1126_v35  ;;  %v999_v11 = vsel %vm679_vm15, %v2313_v26, %v1336_v36  ;;  %v864_v28 = vmul.f32 1.442695, %v748_v27  ;;  %v413_v54 = vsub.f32 %v343_v19, %v1561_v12  ;;  %v414_v25 = vsub.f32 %v344_v2, %v1561_v12  ;;  %v347_v36 = vld [vmem:[%s1558_s7 + $0x1e8] sm:$0xff] }
  0xa7   : > { %v1127_v41 = vadd.f32 %v1063_v46, %v999_v11  ;;  %vm680_vm0 = vcmp.gt.f32.partialorder %v2332_v15, 0.0  ;;  %v749_v13 = vmin.f32 %v2402_v51, 0.0  ;;  %v551_v44 = vmul.f32 %v2196_v16, %v480_v4  ;;  %v1068_v11 = vld [vmem:[%s1759_s14 + $0x1a0] sm:$0xff] }
  0xa8   : > { %v1462_v3 = vpop.eup %1461  ;;  %1469 = vpow2.f32 %v864_v28  ;;  %v481_v14 = vmul.f32 %v1604_v38, %v411_v60  ;;  %v482_v26 = vmul.f32 %v1604_v38, %v412_v10  ;;  %v483_v17 = vmul.f32 %v1604_v38, %v413_v54  ;;  %v348_v60 = vld [vmem:[%s1558_s7 + $0x1f0] sm:$0xff] }
  0xa9   : > { %1191 = vst [vmem:[%s1791_s17 + $0x178] sm:$0xff] %v1127_v41  ;;  %v1337_v8 = vadd.f32 -1.0, %v1462_v3  ;;  %v866_v30 = vmul.f32 1.442695, %v749_v13  ;;  %v2423_v59 = vadd.f32 %v2211_v5, %v551_v44  ;;  %v484_v29 = vmul.f32 %v1604_v38, %v414_v25 }
  0xaa   : > { %v552_v21 = vmul.f32 %v2196_v16, %v481_v14  ;;  %v553_v7 = vmul.f32 %v2196_v16, %v482_v26  ;;  %v554_v47 = vmul.f32 %v2196_v16, %v483_v17  ;;  %v415_v42 = vsub.f32 %v345_v23, %v1561_v12  ;;  %v349_v14 = vld [vmem:[%s1558_s7 + $0x1f8] sm:$0xff] }
  0xab   : > { %v1000_v39 = vsel %vm680_vm0, %v2332_v15, %v1337_v8  ;;  %vm681_vm1 = vcmp.gt.f32.partialorder %v2358_v22, 0.0  ;;  %1471 = vpow2.f32 %v866_v30  ;;  %v750_v63 = vmin.f32 %v2423_v59, 0.0  ;;  %v1069_v8 = vld [vmem:[%s1759_s14 + $0x1a8] sm:$0xff] }
  0xac   : > { %v1464_v50 = vpop.eup %1463  ;;  %v1128_v49 = vadd.f32 %v1064_v53, %v1000_v39  ;;  %vm682_vm2 = vcmp.gt.f32.partialorder %v2362_v33, 0.0  ;;  %v2437_v52 = vadd.f32 %v2211_v5, %v552_v21  ;;  %v2440_v48 = vadd.f32 %v2211_v5, %v553_v7 }
  0xad   : > { %v1466_v18 = vpop.eup %1465  ;;  %v1338_v15 = vadd.f32 -1.0, %v1464_v50  ;;  %vm683_vm3 = vcmp.gt.f32.partialorder %v2365_v34, 0.0  ;;  %v868_v55 = vmul.f32 1.442695, %v750_v63  ;;  %v2445_v56 = vadd.f32 %v2211_v5, %v554_v47 }
  0xae   : > { %v1468_v32 = vpop.eup %1467  ;;  %1192 = vst [vmem:[%s1791_s17 + $0x180] sm:$0xff] %v1128_v49  ;;  %v1339_v40 = vadd.f32 -1.0, %v1466_v18  ;;  %v751_v58 = vmin.f32 %v2437_v52, 0.0  ;;  %v555_v62 = vmul.f32 %v2196_v16, %v484_v29  ;;  %v485_v61 = vmul.f32 %v1604_v38, %v415_v42 }
  0xaf   : > { %v1001_v43 = vsel %vm681_vm1, %v2358_v22, %v1338_v15  ;;  %v1340_v0 = vadd.f32 -1.0, %v1468_v32  ;;  %1473 = vpow2.f32 %v868_v55  ;;  %v752_v20 = vmin.f32 %v2440_v48, 0.0  ;;  %v1070_v15 = vld [vmem:[%s1759_s14 + $0x1b0] sm:$0xff] }
  0xb0   : > { %v1129_v9 = vadd.f32 %v1065_v1, %v1001_v43  ;;  %v1002_v45 = vsel %vm682_vm2, %v2362_v33, %v1339_v40  ;;  %vm684_vm4 = vcmp.gt.f32.partialorder %v2379_v57, 0.0  ;;  %v870_v31 = vmul.f32 1.442695, %v751_v58  ;;  %v1071_v43 = vld [vmem:[%s1759_s14 + $0x1b8] sm:$0xff] }
  0xb1   : > { %v1130_v19 = vadd.f32 %v1066_v6, %v1002_v45  ;;  %v1003_v22 = vsel %vm683_vm3, %v2365_v34, %v1340_v0  ;;  %v872_v2 = vmul.f32 1.442695, %v752_v20  ;;  %v753_v35 = vmin.f32 %v2445_v56, 0.0  ;;  %v1072_v20 = vld [vmem:[%s1759_s14 + $0x1c0] sm:$0xff] }
  0xb2   : > { %v1470_v46 = vpop.eup %1469  ;;  %1193 = vst [vmem:[%s1791_s17 + $0x188] sm:$0xff] %v1129_v9  ;;  %v1131_v27 = vadd.f32 %v1067_v24, %v1003_v22  ;;  %1475 = vpow2.f32 %v870_v31  ;;  %v2469_v33 = vadd.f32 %v2211_v5, %v555_v62  ;;  %v556_v4 = vmul.f32 %v2196_v16, %v485_v61 }
  0xb3   : > { %1194 = vst [vmem:[%s1791_s17 + $0x190] sm:$0xff] %v1130_v19  ;;  %v1341_v10 = vadd.f32 -1.0, %v1470_v46  ;;  %1477 = vpow2.f32 %v872_v2  ;;  %v874_v34 = vmul.f32 1.442695, %v753_v35  ;;  %v416_v28 = vsub.f32 %v346_v37, %v1561_v12  ;;  %v1073_v2 = vld [vmem:[%s1759_s14 + $0x1c8] sm:$0xff] }
  0xb4   : > { %1195 = vst [vmem:[%s1791_s17 + $0x198] sm:$0xff] %v1131_v27  ;;  %vm685_vm5 = vcmp.gt.f32.partialorder %v2402_v51, 0.0  ;;  %v754_v54 = vmin.f32 %v2469_v33, 0.0  ;;  %v2480_v25 = vadd.f32 %v2211_v5, %v556_v4  ;;  %v417_v41 = vsub.f32 %v347_v36, %v1561_v12 }
  0xb5   : > { %v1472_v13 = vpop.eup %1471  ;;  %v1004_v44 = vsel %vm684_vm4, %v2379_v57, %v1341_v10  ;;  %1479 = vpow2.f32 %v874_v34  ;;  %v486_v23 = vmul.f32 %v1604_v38, %v416_v28  ;;  %v418_v3 = vsub.f32 %v348_v60, %v1561_v12 }
  0xb6   : > { %v1132_v26 = vadd.f32 %v1068_v11, %v1004_v44  ;;  %v1342_v17 = vadd.f32 -1.0, %v1472_v13  ;;  %v876_v53 = vmul.f32 1.442695, %v754_v54  ;;  %v755_v30 = vmin.f32 %v2480_v25, 0.0  ;;  %v1075_v54 = vld [vmem:[%s1759_s14 + $0x1d8] sm:$0xff] }
  0xb7   : > { %v557_v29 = vmul.f32 %v2196_v16, %v486_v23  ;;  %v487_v21 = vmul.f32 %v1604_v38, %v417_v41  ;;  %v488_v57 = vmul.f32 %v1604_v38, %v418_v3  ;;  %vm686_vm6 = vcmp.gt.f32.partialorder %v2423_v59, 0.0  ;;  %v1076_v3 = vld [vmem:[%s1759_s14 + $0x1e0] sm:$0xff] }
  0xb8   : > { %1196 = vst [vmem:[%s1791_s17 + $0x1a0] sm:$0xff] %v1132_v26  ;;  %v1005_v7 = vsel %vm685_vm5, %v2402_v51, %v1342_v17  ;;  %1481 = vpow2.f32 %v876_v53  ;;  %v419_v47 = vsub.f32 %v349_v14, %v1561_v12  ;;  %v878_v63 = vmul.f32 1.442695, %v755_v30  ;;  %v1078_v30 = vld [vmem:[%s1759_s14 + $0x1f0] sm:$0xff] }
  0xb9   : > { %v1474_v42 = vpop.eup %1473  ;;  %v1133_v39 = vadd.f32 %v1069_v8, %v1005_v7  ;;  %v2501_v50 = vadd.f32 %v2211_v5, %v557_v29  ;;  %v558_v49 = vmul.f32 %v2196_v16, %v487_v21  ;;  %v559_v1 = vmul.f32 %v2196_v16, %v488_v57 }
  0xba   : > { %v1343_v18 = vadd.f32 -1.0, %v1474_v42  ;;  %v489_v51 = vmul.f32 %v1604_v38, %v419_v47  ;;  %1483 = vpow2.f32 %v878_v63  ;;  %vm687_vm7 = vcmp.gt.f32.partialorder %v2437_v52, 0.0  ;;  %v1079_v42 = vld [vmem:[%s1759_s14 + $0x1f8] sm:$0xff] }
  0xbb   : > { %1197 = vst [vmem:[%s1791_s17 + $0x1a8] sm:$0xff] %v1133_v39  ;;  %v756_v12 = vmin.f32 %v2501_v50, 0.0  ;;  %v2510_v55 = vadd.f32 %v2211_v5, %v558_v49  ;;  %v2517_v6 = vadd.f32 %v2211_v5, %v559_v1  ;;  %vm688_vm8 = vcmp.gt.f32.partialorder %v2440_v48, 0.0 }
  0xbc   : > { %v1476_v32 = vpop.eup %1475  ;;  %v1006_v40 = vsel %vm686_vm6, %v2423_v59, %v1343_v18  ;;  %v560_v38 = vmul.f32 %v2196_v16, %v489_v51  ;;  %vm689_vm9 = vcmp.gt.f32.partialorder %v2445_v56, 0.0  ;;  %vm690_vm10 = vcmp.gt.f32.partialorder %v2469_v33, 0.0 }
  0xbd   : > { %v1478_v58 = vpop.eup %1477  ;;  %v1134_v62 = vadd.f32 %v1070_v15, %v1006_v40  ;;  %v1344_v61 = vadd.f32 -1.0, %v1476_v32  ;;  %v880_v0 = vmul.f32 1.442695, %v756_v12  ;;  %v757_v9 = vmin.f32 %v2510_v55, 0.0 }
  0xbe   : > { %v1345_v24 = vadd.f32 -1.0, %v1478_v58  ;;  %v758_v59 = vmin.f32 %v2517_v6, 0.0  ;;  %v631_v16 = vadd.f32 %v2211_v5, %v560_v38  ;;  %vm691_vm11 = vcmp.gt.f32.partialorder %v2480_v25, 0.0 }
  0xbf   : > { %v1480_v45 = vpop.eup %1479  ;;  %1198 = vst [vmem:[%s1791_s17 + $0x1b0] sm:$0xff] %v1134_v62  ;;  %v1007_v31 = vsel %vm687_vm7, %v2437_v52, %v1344_v61  ;;  %1485 = vpow2.f32 %v880_v0  ;;  %v882_v35 = vmul.f32 1.442695, %v757_v9  ;;  %vm692_vm12 = vcmp.gt.f32.partialorder %v2501_v50, 0.0 }
  0xc0   : > { %v1135_v37 = vadd.f32 %v1071_v43, %v1007_v31  ;;  %v1008_v19 = vsel %vm688_vm8, %v2440_v48, %v1345_v24  ;;  %v1346_v22 = vadd.f32 -1.0, %v1480_v45  ;;  %v884_v46 = vmul.f32 1.442695, %v758_v59  ;;  %v1074_v48 = vld [vmem:[%s1759_s14 + $0x1d0] sm:$0xff] }
  0xc1   : > { %v1136_v36 = vadd.f32 %v1072_v20, %v1008_v19  ;;  %v759_v27 = vmin.f32 %v631_v16, 0.0  ;;  %1487 = vpow2.f32 %v882_v35  ;;  %vm693_vm13 = vcmp.gt.f32.partialorder %v2510_v55, 0.0 }
  0xc2   : > { %v1482_v4 = vpop.eup %1481  ;;  %1199 = vst [vmem:[%s1791_s17 + $0x1b8] sm:$0xff] %v1135_v37  ;;  %v1009_v52 = vsel %vm689_vm9, %v2445_v56, %v1346_v22  ;;  %1489 = vpow2.f32 %v884_v46  ;;  %vm694_vm14 = vcmp.gt.f32.partialorder %v2517_v6, 0.0  ;;  %vm695_vm15 = vcmp.gt.f32.partialorder %v631_v16, 0.0 }
  0xc3   : > { %1200 = vst [vmem:[%s1791_s17 + $0x1c0] sm:$0xff] %v1136_v36  ;;  %v1137_v5 = vadd.f32 %v1073_v2, %v1009_v52  ;;  %v1347_v60 = vadd.f32 -1.0, %v1482_v4  ;;  %v886_v10 = vmul.f32 1.442695, %v759_v27 }
  0xc4   : > { %v1484_v11 = vpop.eup %1483 }
  0xc5   : > { %1201 = vst [vmem:[%s1791_s17 + $0x1c8] sm:$0xff] %v1137_v5  ;;  %v1010_v34 = vsel %vm690_vm10, %v2469_v33, %v1347_v60  ;;  %1491 = vpow2.f32 %v886_v10  ;;  %v1348_v28 = vadd.f32 -1.0, %v1484_v11 }
  0xc6   : > { %v1138_v56 = vadd.f32 %v1074_v48, %v1010_v34 }
  0xc7   : > { %v1011_v41 = vsel %vm691_vm11, %v2480_v25, %v1348_v28  ;;  %v1077_v25 = vld [vmem:[%s1759_s14 + $0x1e8] sm:$0xff] }
  0xc8   : > { %1202 = vst [vmem:[%s1791_s17 + $0x1d0] sm:$0xff] %v1138_v56  ;;  %v1139_v44 = vadd.f32 %v1075_v54, %v1011_v41 }
  0xc9   : > { %v1486_v13 = vpop.eup %1485 }
  0xca   : > { %v1349_v23 = vadd.f32 -1.0, %v1486_v13  ;;  %1203 = vst [vmem:[%s1791_s17 + $0x1d8] sm:$0xff] %v1139_v44 }
  0xcb   : > { %v1488_v33 = vpop.eup %1487 }
  0xcc   : > { %v1012_v14 = vsel %vm692_vm12, %v2501_v50, %v1349_v23  ;;  %v1490_v26 = vpop.eup %1489  ;;  %v1350_v8 = vadd.f32 -1.0, %v1488_v33 }
  0xcd   : > { %v1140_v17 = vadd.f32 %v1076_v3, %v1012_v14  ;;  %v1351_v53 = vadd.f32 -1.0, %v1490_v26 }
  0xce   : > { %v1013_v21 = vsel %vm693_vm13, %v2510_v55, %v1350_v8 }
  0xcf   : > { %v1492_v29 = vpop.eup %1491  ;;  %1204 = vst [vmem:[%s1791_s17 + $0x1e0] sm:$0xff] %v1140_v17  ;;  %v1141_v57 = vadd.f32 %v1077_v25, %v1013_v21  ;;  %v1014_v7 = vsel %vm694_vm14, %v2517_v6, %v1351_v53 }
  0xd0   : > { %v1352_v47 = vadd.f32 -1.0, %v1492_v29  ;;  %v1142_v39 = vadd.f32 %v1078_v30, %v1014_v7 }
  0xd1   : > { %1205 = vst [vmem:[%s1791_s17 + $0x1e8] sm:$0xff] %v1141_v57 }
  0xd2   : > { %v1015_v63 = vsel %vm695_vm15, %v631_v16, %v1352_v47  ;;  %1206 = vst [vmem:[%s1791_s17 + $0x1f0] sm:$0xff] %v1142_v39 }
  0xd3   : > { %v1143_v50 = vadd.f32 %v1079_v42, %v1015_v63 }
  0xd5   : > { %1207 = vst [vmem:[%s1791_s17 + $0x1f8] sm:$0xff] %v1143_v50 }
  0xd6 PF: > { %s16_s21 = sadd.s32 1, %s1501_s21  }
  0xd7   : > { %p13_p4 = scmp.ge.s32.totalorder %s16_s21, 4  }
  0xd9   :  { %15 = sbr.rel (!%p13_p4) target bundleno = 1 (0x1), region = 77 }

</bundles_post_ra>
